<compile_context>
chip_gen: v6e
topology: v6e:2x2x1
jax: 0.10.0
libtpu: 0.0.40
codegen_flags: <defaults>
</compile_context>

<pallas_src>
import functools
import math

import jax
import jax.numpy as jnp
from jax.experimental import pallas as pl
from jax.experimental.pallas import tpu as pltpu

# ----------------------------- model hyper-params ---------------------------
S = 8            # sequence length
N = 2            # batch size
E = 32           # d_model
H = 4            # nhead
FF = 64          # dim_feedforward
NUM_LAYERS = 3   # tied layers
DH = E // H      # head dim
NS = N * S       # flattened rows
EPS = 1e-5       # LayerNorm eps (PyTorch default)


def _layernorm(x, w, b):
    # x: (NS, E); w, b already broadcast to (NS, E).
    # Independent sum / sum-of-squares reductions (shorter XLU dep chain).
    inv_e = 1.0 / x.shape[-1]
    s = jnp.sum(x, axis=-1, keepdims=True)
    ss = jnp.sum(x * x, axis=-1, keepdims=True)
    mu = s * inv_e
    var = ss * inv_e - mu * mu
    return (x - mu) * jax.lax.rsqrt(var + EPS) * w + b


def _encoder_kernel(x_ref,
                    wqkv_t_ref, bqkv_ref, wo_t_ref, bo_ref,
                    w1_t_ref, b1_ref, w2_t_ref, b2_ref,
                    ln1w_ref, ln1b_ref, ln2w_ref, ln2b_ref,
                    lnfw_ref, lnfb_ref,
                    o_ref,
                    *, num_layers, use_final_norm):
    x = x_ref[...]                    # (NS, E)   row-flattened activations
    wqkv_t = wqkv_t_ref[...]          # (E, 3E)   pre-transposed, Q cols prescaled
    wo_t = wo_t_ref[...]              # (E, E)    pre-transposed
    w1_t = w1_t_ref[...]              # (E, FF)   pre-transposed
    w2_t = w2_t_ref[...]              # (FF, E)   pre-transposed

    # ---- hoisted, loop-invariant broadcasts (emitted once, reused 3x) ------
    bqkv = jnp.broadcast_to(bqkv_ref[...], (NS, 3 * E))
    bo = jnp.broadcast_to(bo_ref[...], (NS, E))
    b1 = jnp.broadcast_to(b1_ref[...], (NS, FF))
    b2 = jnp.broadcast_to(b2_ref[...], (NS, E))
    ln1w = jnp.broadcast_to(ln1w_ref[...], (NS, E))
    ln1b = jnp.broadcast_to(ln1b_ref[...], (NS, E))
    ln2w = jnp.broadcast_to(ln2w_ref[...], (NS, E))
    ln2b = jnp.broadcast_to(ln2b_ref[...], (NS, E))

    # Hoisted static per-head slices of the out-projection (fold the head
    # concat into the out-projection instead of concatenating).
    wo_heads = [wo_t[h * DH:(h + 1) * DH, :] for h in range(H)]

    # Tied layers: identical weights, applied num_layers times (static unroll).
    for _ in range(num_layers):
        # ---- fused in_projection over all rows / heads ----------------------
        qkv = jnp.dot(x, wqkv_t, preferred_element_type=jnp.float32) + bqkv  # (NS, 3E)

        # ---- multi-head self-attention, heads folded into out_proj ----------
        attn = bo                                                            # (NS, E)
        for h in range(H):
            qh = qkv[:, h * DH:(h + 1) * DH].reshape(N, S, DH)               # Q prescaled
            kh = qkv[:, E + h * DH:E + (h + 1) * DH].reshape(N, S, DH)
            vh = qkv[:, 2 * E + h * DH:2 * E + (h + 1) * DH].reshape(N, S, DH)

            s = jnp.einsum('nqd,nkd->nqk', qh, kh,
                           preferred_element_type=jnp.float32)               # (N, S, S)
            s = s - jnp.max(s, axis=-1, keepdims=True)
            p = jnp.exp(s)
            p = p * pl.reciprocal(jnp.sum(p, axis=-1, keepdims=True), approx=True)
            oh = jnp.einsum('nqk,nkd->nqd', p, vh,
                            preferred_element_type=jnp.float32)              # (N, S, DH)
            attn = attn + jnp.dot(oh.reshape(NS, DH), wo_heads[h],
                                  preferred_element_type=jnp.float32)        # (NS, E)

        # ---- add & norm 1 ----------------------------------------------------
        x = _layernorm(x + attn, ln1w, ln1b)

        # ---- feed-forward ----------------------------------------------------
        ff = jnp.dot(x, w1_t, preferred_element_type=jnp.float32) + b1
        ff = jnp.maximum(ff, 0.0)                                            # ReLU
        ff = jnp.dot(ff, w2_t, preferred_element_type=jnp.float32) + b2

        # ---- add & norm 2 ----------------------------------------------------
        x = _layernorm(x + ff, ln2w, ln2b)

    if use_final_norm:
        lnfw = jnp.broadcast_to(lnfw_ref[...], (NS, E))
        lnfb = jnp.broadcast_to(lnfb_ref[...], (NS, E))
        x = _layernorm(x, lnfw, lnfb)

    o_ref[...] = x


def tied_transformer_encoder(src, params, *, num_layers=NUM_LAYERS,
                             use_final_norm=True):
    """src: (S, N, E) float32 — PyTorch TransformerEncoder layout."""
    scale = 1.0 / math.sqrt(DH)

    # ---- one-time host-side weight prep (hoisted out of the kernel) --------
    wqkv_t = params["wqkv"].T                       # (E, 3E)
    wqkv_t = wqkv_t.at[:, :E].multiply(scale)       # fold 1/sqrt(DH) into Q cols only
    bqkv = params["bqkv"].at[:, :E].multiply(scale) # ... and the Q third of the bias
    wo_t = params["wo"].T                           # (E, E)
    w1_t = params["w1"].T                           # (E, FF)
    w2_t = params["w2"].T                           # (FF, E)

    # (S, N, E) -> (N, S, E) -> row-flattened (N*S, E)
    x2 = jnp.transpose(src, (1, 0, 2)).reshape(NS, E)

    args = [
        x2,
        wqkv_t, bqkv, wo_t, params["bo"],
        w1_t, params["b1"], w2_t, params["b2"],
        params["ln1w"], params["ln1b"], params["ln2w"], params["ln2b"],
        params["lnfw"], params["lnfb"],
    ]

    def full_spec(shape):
        nd = len(shape)
        return pl.BlockSpec(shape, lambda i, _nd=nd: (0,) * _nd)

    kernel = functools.partial(_encoder_kernel,
                               num_layers=num_layers,
                               use_final_norm=use_final_norm)

    out2 = pl.pallas_call(
        kernel,
        out_shape=jax.ShapeDtypeStruct((NS, E), jnp.float32),
        grid=(1,),                                  # single block: whole batch resident
        in_specs=[full_spec(a.shape) for a in args],
        out_specs=full_spec((NS, E)),
        compiler_params=pltpu.CompilerParams(
            dimension_semantics=("arbitrary",)),
        cost_estimate=pl.CostEstimate(flops=840_000,
                                      transcendentals=2_048,
                                      bytes_accessed=40_000),
    )(*args)

    # (N*S, E) -> (N, S, E) -> (S, N, E)
    return jnp.transpose(out2.reshape(N, S, E), (1, 0, 2))


def init_params(key):
    """Deterministic synthetic weights matching nn.TransformerEncoderLayer shapes."""
    ks = jax.random.split(key, 8)
    sc = 0.05
    p = {
        # MultiheadAttention
        "wqkv": jax.random.normal(ks[0], (3 * E, E), jnp.float32) * sc,
        "bqkv": jax.random.normal(ks[1], (1, 3 * E), jnp.float32) * sc,
        "wo":   jax.random.normal(ks[2], (E, E), jnp.float32) * sc,
        "bo":   jax.random.normal(ks[3], (1, E), jnp.float32) * sc,
        # Feed-forward
        "w1":   jax.random.normal(ks[4], (FF, E), jnp.float32) * sc,
        "b1":   jax.random.normal(ks[5], (1, FF), jnp.float32) * sc,
        "w2":   jax.random.normal(ks[6], (E, FF), jnp.float32) * sc,
        "b2":   jax.random.normal(ks[7], (1, E), jnp.float32) * sc,
        # LayerNorms (gamma=1, beta=0 as PyTorch init)
        "ln1w": jnp.ones((1, E), jnp.float32),
        "ln1b": jnp.zeros((1, E), jnp.float32),
        "ln2w": jnp.ones((1, E), jnp.float32),
        "ln2b": jnp.zeros((1, E), jnp.float32),
        # optional final norm (self.norm)
        "lnfw": jnp.ones((1, E), jnp.float32),
        "lnfb": jnp.zeros((1, E), jnp.float32),
    }
    return p


if __name__ == "__main__":
    key = jax.random.PRNGKey(0)
    k_src, k_par = jax.random.split(key)

    src = jax.random.normal(k_src, (S, N, E), jnp.float32)   # (seq, batch, d_model)
    params = init_params(k_par)

    out = tied_transformer_encoder(src, params,
                                   num_layers=NUM_LAYERS,
                                   use_final_norm=True)
    out = jax.block_until_ready(out)

    assert out.shape == (S, N, E) and out.dtype == jnp.float32
    assert bool(jnp.all(jnp.isfinite(out)))
    print("KERNEL_OK")
</pallas_src>

<mosaic_0001>
module attributes {stable_mosaic.version = 11 : i64} {
  func.func @_encoder_kernel(%arg0: i32, %arg1: memref<16x32xf32, #tpu.memory_space<vmem>>, %arg2: memref<32x96xf32, #tpu.memory_space<vmem>>, %arg3: memref<1x96xf32, #tpu.memory_space<vmem>>, %arg4: memref<32x32xf32, #tpu.memory_space<vmem>>, %arg5: memref<1x32xf32, #tpu.memory_space<vmem>>, %arg6: memref<32x64xf32, #tpu.memory_space<vmem>>, %arg7: memref<1x64xf32, #tpu.memory_space<vmem>>, %arg8: memref<64x32xf32, #tpu.memory_space<vmem>>, %arg9: memref<1x32xf32, #tpu.memory_space<vmem>>, %arg10: memref<1x32xf32, #tpu.memory_space<vmem>>, %arg11: memref<1x32xf32, #tpu.memory_space<vmem>>, %arg12: memref<1x32xf32, #tpu.memory_space<vmem>>, %arg13: memref<1x32xf32, #tpu.memory_space<vmem>>, %arg14: memref<1x32xf32, #tpu.memory_space<vmem>>, %arg15: memref<1x32xf32, #tpu.memory_space<vmem>>, %arg16: memref<16x32xf32, #tpu.memory_space<vmem>>) attributes {dimension_semantics = [#tpu.dimension_semantics<arbitrary>], iteration_bounds = array<i64: 1>, scalar_prefetch = 0 : i64, scratch_operands = 0 : i64, tpu.core_type = #tpu.core_type<tc>, window_params = [{pipeline_mode = #tpu.pipeline_mode<synchronous>, transform_indices = @transform_0, window_bounds = array<i64: 16, 32>}, {pipeline_mode = #tpu.pipeline_mode<synchronous>, transform_indices = @transform_1, window_bounds = array<i64: 32, 96>}, {pipeline_mode = #tpu.pipeline_mode<synchronous>, transform_indices = @transform_2, window_bounds = array<i64: 1, 96>}, {pipeline_mode = #tpu.pipeline_mode<synchronous>, transform_indices = @transform_3, window_bounds = array<i64: 32, 32>}, {pipeline_mode = #tpu.pipeline_mode<synchronous>, transform_indices = @transform_4, window_bounds = array<i64: 1, 32>}, {pipeline_mode = #tpu.pipeline_mode<synchronous>, transform_indices = @transform_5, window_bounds = array<i64: 32, 64>}, {pipeline_mode = #tpu.pipeline_mode<synchronous>, transform_indices = @transform_6, window_bounds = array<i64: 1, 64>}, {pipeline_mode = #tpu.pipeline_mode<synchronous>, transform_indices = @transform_7, window_bounds = array<i64: 64, 32>}, {pipeline_mode = #tpu.pipeline_mode<synchronous>, transform_indices = @transform_8, window_bounds = array<i64: 1, 32>}, {pipeline_mode = #tpu.pipeline_mode<synchronous>, transform_indices = @transform_9, window_bounds = array<i64: 1, 32>}, {pipeline_mode = #tpu.pipeline_mode<synchronous>, transform_indices = @transform_10, window_bounds = array<i64: 1, 32>}, {pipeline_mode = #tpu.pipeline_mode<synchronous>, transform_indices = @transform_11, window_bounds = array<i64: 1, 32>}, {pipeline_mode = #tpu.pipeline_mode<synchronous>, transform_indices = @transform_12, window_bounds = array<i64: 1, 32>}, {pipeline_mode = #tpu.pipeline_mode<synchronous>, transform_indices = @transform_13, window_bounds = array<i64: 1, 32>}, {pipeline_mode = #tpu.pipeline_mode<synchronous>, transform_indices = @transform_14, window_bounds = array<i64: 1, 32>}, {pipeline_mode = #tpu.pipeline_mode<synchronous>, transform_indices = @transform_15, window_bounds = array<i64: 16, 32>}]} {
    %c0 = arith.constant 0 : index
    %c0_0 = arith.constant 0 : index
    %0 = vector.load %arg1[%c0, %c0_0] : memref<16x32xf32, #tpu.memory_space<vmem>>, vector<16x32xf32>
    %c0_1 = arith.constant 0 : index
    %c0_2 = arith.constant 0 : index
    %1 = vector.load %arg2[%c0_1, %c0_2] : memref<32x96xf32, #tpu.memory_space<vmem>>, vector<32x96xf32>
    %c0_3 = arith.constant 0 : index
    %c0_4 = arith.constant 0 : index
    %2 = vector.load %arg4[%c0_3, %c0_4] : memref<32x32xf32, #tpu.memory_space<vmem>>, vector<32x32xf32>
    %c0_5 = arith.constant 0 : index
    %c0_6 = arith.constant 0 : index
    %3 = vector.load %arg6[%c0_5, %c0_6] : memref<32x64xf32, #tpu.memory_space<vmem>>, vector<32x64xf32>
    %c0_7 = arith.constant 0 : index
    %c0_8 = arith.constant 0 : index
    %4 = vector.load %arg8[%c0_7, %c0_8] : memref<64x32xf32, #tpu.memory_space<vmem>>, vector<64x32xf32>
    %c0_9 = arith.constant 0 : index
    %c0_10 = arith.constant 0 : index
    %5 = vector.load %arg3[%c0_9, %c0_10] : memref<1x96xf32, #tpu.memory_space<vmem>>, vector<1x96xf32>
    %6 = vector.shape_cast %5 : vector<1x96xf32> to vector<1x96xf32>
    %7 = vector.broadcast %6 : vector<1x96xf32> to vector<16x96xf32>
    %c0_11 = arith.constant 0 : index
    %c0_12 = arith.constant 0 : index
    %8 = vector.load %arg5[%c0_11, %c0_12] : memref<1x32xf32, #tpu.memory_space<vmem>>, vector<1x32xf32>
    %9 = vector.shape_cast %8 : vector<1x32xf32> to vector<1x32xf32>
    %10 = vector.broadcast %9 : vector<1x32xf32> to vector<16x32xf32>
    %c0_13 = arith.constant 0 : index
    %c0_14 = arith.constant 0 : index
    %11 = vector.load %arg7[%c0_13, %c0_14] : memref<1x64xf32, #tpu.memory_space<vmem>>, vector<1x64xf32>
    %12 = vector.shape_cast %11 : vector<1x64xf32> to vector<1x64xf32>
    %13 = vector.broadcast %12 : vector<1x64xf32> to vector<16x64xf32>
    %c0_15 = arith.constant 0 : index
    %c0_16 = arith.constant 0 : index
    %14 = vector.load %arg9[%c0_15, %c0_16] : memref<1x32xf32, #tpu.memory_space<vmem>>, vector<1x32xf32>
    %15 = vector.shape_cast %14 : vector<1x32xf32> to vector<1x32xf32>
    %16 = vector.broadcast %15 : vector<1x32xf32> to vector<16x32xf32>
    %c0_17 = arith.constant 0 : index
    %c0_18 = arith.constant 0 : index
    %17 = vector.load %arg10[%c0_17, %c0_18] : memref<1x32xf32, #tpu.memory_space<vmem>>, vector<1x32xf32>
    %18 = vector.shape_cast %17 : vector<1x32xf32> to vector<1x32xf32>
    %19 = vector.broadcast %18 : vector<1x32xf32> to vector<16x32xf32>
    %c0_19 = arith.constant 0 : index
    %c0_20 = arith.constant 0 : index
    %20 = vector.load %arg11[%c0_19, %c0_20] : memref<1x32xf32, #tpu.memory_space<vmem>>, vector<1x32xf32>
    %21 = vector.shape_cast %20 : vector<1x32xf32> to vector<1x32xf32>
    %22 = vector.broadcast %21 : vector<1x32xf32> to vector<16x32xf32>
    %c0_21 = arith.constant 0 : index
    %c0_22 = arith.constant 0 : index
    %23 = vector.load %arg12[%c0_21, %c0_22] : memref<1x32xf32, #tpu.memory_space<vmem>>, vector<1x32xf32>
    %24 = vector.shape_cast %23 : vector<1x32xf32> to vector<1x32xf32>
    %25 = vector.broadcast %24 : vector<1x32xf32> to vector<16x32xf32>
    %c0_23 = arith.constant 0 : index
    %c0_24 = arith.constant 0 : index
    %26 = vector.load %arg13[%c0_23, %c0_24] : memref<1x32xf32, #tpu.memory_space<vmem>>, vector<1x32xf32>
    %27 = vector.shape_cast %26 : vector<1x32xf32> to vector<1x32xf32>
    %28 = vector.broadcast %27 : vector<1x32xf32> to vector<16x32xf32>
    %29 = vector.extract_strided_slice %2 {offsets = [0, 0], sizes = [8, 32], strides = [1, 1]} : vector<32x32xf32> to vector<8x32xf32>
    %30 = vector.extract_strided_slice %2 {offsets = [8, 0], sizes = [8, 32], strides = [1, 1]} : vector<32x32xf32> to vector<8x32xf32>
    %31 = vector.extract_strided_slice %2 {offsets = [16, 0], sizes = [8, 32], strides = [1, 1]} : vector<32x32xf32> to vector<8x32xf32>
    %32 = vector.extract_strided_slice %2 {offsets = [24, 0], sizes = [8, 32], strides = [1, 1]} : vector<32x32xf32> to vector<8x32xf32>
    %cst = arith.constant dense<0.000000e+00> : vector<16x96xf32>
    %33 = tpu.matmul %0, %1, %cst {dimension_numbers = #tpu.dot_dimension_numbers<[1], [0], [0], [1], [0, 0, 1, 1], [], []>} : vector<16x32xf32>, vector<32x96xf32>, vector<16x96xf32> -> vector<16x96xf32>
    %34 = arith.addf %33, %7 : vector<16x96xf32>
    %35 = vector.extract_strided_slice %34 {offsets = [0, 0], sizes = [16, 8], strides = [1, 1]} : vector<16x96xf32> to vector<16x8xf32>
    %36 = vector.shape_cast %35 : vector<16x8xf32> to vector<2x8x8xf32>
    %37 = vector.extract_strided_slice %34 {offsets = [0, 32], sizes = [16, 8], strides = [1, 1]} : vector<16x96xf32> to vector<16x8xf32>
    %38 = vector.shape_cast %37 : vector<16x8xf32> to vector<2x8x8xf32>
    %39 = vector.extract_strided_slice %34 {offsets = [0, 64], sizes = [16, 8], strides = [1, 1]} : vector<16x96xf32> to vector<16x8xf32>
    %40 = vector.shape_cast %39 : vector<16x8xf32> to vector<2x8x8xf32>
    "tpu.trace_start"() <{level = 10 : i32, message = "nqd,nkd->nqk"}> : () -> ()
    %cst_25 = arith.constant dense<0.000000e+00> : vector<2x8x8xf32>
    %41 = tpu.matmul %36, %38, %cst_25 {dimension_numbers = #tpu.dot_dimension_numbers<[2], [2], [1], [1], [0, 0, 0, 1, 1, 1], [0], [0]>} : vector<2x8x8xf32>, vector<2x8x8xf32>, vector<2x8x8xf32> -> vector<2x8x8xf32>
    "tpu.trace_stop"() : () -> ()
    %cst_26 = arith.constant dense<0xFF800000> : vector<2x8xf32>
    %42 = vector.multi_reduction <maximumf>, %41, %cst_26 [2] : vector<2x8x8xf32> to vector<2x8xf32>
    %43 = vector.shape_cast %42 : vector<2x8xf32> to vector<2x8x1xf32>
    %44 = vector.broadcast %43 : vector<2x8x1xf32> to vector<2x8x8xf32>
    %45 = arith.subf %41, %44 : vector<2x8x8xf32>
    %46 = math.exp %45 : vector<2x8x8xf32>
    %cst_27 = arith.constant dense<0.000000e+00> : vector<2x8xf32>
    %47 = vector.multi_reduction <add>, %46, %cst_27 [2] : vector<2x8x8xf32> to vector<2x8xf32>
    %48 = vector.shape_cast %47 : vector<2x8xf32> to vector<2x8x1xf32>
    %49 = tpu.reciprocal %48 {approx = true} : vector<2x8x1xf32> -> vector<2x8x1xf32>
    %50 = vector.broadcast %49 : vector<2x8x1xf32> to vector<2x8x8xf32>
    %51 = arith.mulf %46, %50 : vector<2x8x8xf32>
    "tpu.trace_start"() <{level = 10 : i32, message = "nqk,nkd->nqd"}> : () -> ()
    %cst_28 = arith.constant dense<0.000000e+00> : vector<2x8x8xf32>
    %52 = tpu.matmul %51, %40, %cst_28 {dimension_numbers = #tpu.dot_dimension_numbers<[2], [1], [1], [2], [0, 0, 0, 1, 1, 2], [0], [0]>} : vector<2x8x8xf32>, vector<2x8x8xf32>, vector<2x8x8xf32> -> vector<2x8x8xf32>
    "tpu.trace_stop"() : () -> ()
    %53 = vector.shape_cast %52 : vector<2x8x8xf32> to vector<16x8xf32>
    %cst_29 = arith.constant dense<0.000000e+00> : vector<16x32xf32>
    %54 = tpu.matmul %53, %29, %cst_29 {dimension_numbers = #tpu.dot_dimension_numbers<[1], [0], [0], [1], [0, 0, 1, 1], [], []>} : vector<16x8xf32>, vector<8x32xf32>, vector<16x32xf32> -> vector<16x32xf32>
    %55 = arith.addf %10, %54 : vector<16x32xf32>
    %56 = vector.extract_strided_slice %34 {offsets = [0, 8], sizes = [16, 8], strides = [1, 1]} : vector<16x96xf32> to vector<16x8xf32>
    %57 = vector.shape_cast %56 : vector<16x8xf32> to vector<2x8x8xf32>
    %58 = vector.extract_strided_slice %34 {offsets = [0, 40], sizes = [16, 8], strides = [1, 1]} : vector<16x96xf32> to vector<16x8xf32>
    %59 = vector.shape_cast %58 : vector<16x8xf32> to vector<2x8x8xf32>
    %60 = vector.extract_strided_slice %34 {offsets = [0, 72], sizes = [16, 8], strides = [1, 1]} : vector<16x96xf32> to vector<16x8xf32>
    %61 = vector.shape_cast %60 : vector<16x8xf32> to vector<2x8x8xf32>
    "tpu.trace_start"() <{level = 10 : i32, message = "nqd,nkd->nqk"}> : () -> ()
    %cst_30 = arith.constant dense<0.000000e+00> : vector<2x8x8xf32>
    %62 = tpu.matmul %57, %59, %cst_30 {dimension_numbers = #tpu.dot_dimension_numbers<[2], [2], [1], [1], [0, 0, 0, 1, 1, 1], [0], [0]>} : vector<2x8x8xf32>, vector<2x8x8xf32>, vector<2x8x8xf32> -> vector<2x8x8xf32>
    "tpu.trace_stop"() : () -> ()
    %cst_31 = arith.constant dense<0xFF800000> : vector<2x8xf32>
    %63 = vector.multi_reduction <maximumf>, %62, %cst_31 [2] : vector<2x8x8xf32> to vector<2x8xf32>
    %64 = vector.shape_cast %63 : vector<2x8xf32> to vector<2x8x1xf32>
    %65 = vector.broadcast %64 : vector<2x8x1xf32> to vector<2x8x8xf32>
    %66 = arith.subf %62, %65 : vector<2x8x8xf32>
    %67 = math.exp %66 : vector<2x8x8xf32>
    %cst_32 = arith.constant dense<0.000000e+00> : vector<2x8xf32>
    %68 = vector.multi_reduction <add>, %67, %cst_32 [2] : vector<2x8x8xf32> to vector<2x8xf32>
    %69 = vector.shape_cast %68 : vector<2x8xf32> to vector<2x8x1xf32>
    %70 = tpu.reciprocal %69 {approx = true} : vector<2x8x1xf32> -> vector<2x8x1xf32>
    %71 = vector.broadcast %70 : vector<2x8x1xf32> to vector<2x8x8xf32>
    %72 = arith.mulf %67, %71 : vector<2x8x8xf32>
    "tpu.trace_start"() <{level = 10 : i32, message = "nqk,nkd->nqd"}> : () -> ()
    %cst_33 = arith.constant dense<0.000000e+00> : vector<2x8x8xf32>
    %73 = tpu.matmul %72, %61, %cst_33 {dimension_numbers = #tpu.dot_dimension_numbers<[2], [1], [1], [2], [0, 0, 0, 1, 1, 2], [0], [0]>} : vector<2x8x8xf32>, vector<2x8x8xf32>, vector<2x8x8xf32> -> vector<2x8x8xf32>
    "tpu.trace_stop"() : () -> ()
    %74 = vector.shape_cast %73 : vector<2x8x8xf32> to vector<16x8xf32>
    %cst_34 = arith.constant dense<0.000000e+00> : vector<16x32xf32>
    %75 = tpu.matmul %74, %30, %cst_34 {dimension_numbers = #tpu.dot_dimension_numbers<[1], [0], [0], [1], [0, 0, 1, 1], [], []>} : vector<16x8xf32>, vector<8x32xf32>, vector<16x32xf32> -> vector<16x32xf32>
    %76 = arith.addf %55, %75 : vector<16x32xf32>
    %77 = vector.extract_strided_slice %34 {offsets = [0, 16], sizes = [16, 8], strides = [1, 1]} : vector<16x96xf32> to vector<16x8xf32>
    %78 = vector.shape_cast %77 : vector<16x8xf32> to vector<2x8x8xf32>
    %79 = vector.extract_strided_slice %34 {offsets = [0, 48], sizes = [16, 8], strides = [1, 1]} : vector<16x96xf32> to vector<16x8xf32>
    %80 = vector.shape_cast %79 : vector<16x8xf32> to vector<2x8x8xf32>
    %81 = vector.extract_strided_slice %34 {offsets = [0, 80], sizes = [16, 8], strides = [1, 1]} : vector<16x96xf32> to vector<16x8xf32>
    %82 = vector.shape_cast %81 : vector<16x8xf32> to vector<2x8x8xf32>
    "tpu.trace_start"() <{level = 10 : i32, message = "nqd,nkd->nqk"}> : () -> ()
    %cst_35 = arith.constant dense<0.000000e+00> : vector<2x8x8xf32>
    %83 = tpu.matmul %78, %80, %cst_35 {dimension_numbers = #tpu.dot_dimension_numbers<[2], [2], [1], [1], [0, 0, 0, 1, 1, 1], [0], [0]>} : vector<2x8x8xf32>, vector<2x8x8xf32>, vector<2x8x8xf32> -> vector<2x8x8xf32>
    "tpu.trace_stop"() : () -> ()
    %cst_36 = arith.constant dense<0xFF800000> : vector<2x8xf32>
    %84 = vector.multi_reduction <maximumf>, %83, %cst_36 [2] : vector<2x8x8xf32> to vector<2x8xf32>
    %85 = vector.shape_cast %84 : vector<2x8xf32> to vector<2x8x1xf32>
    %86 = vector.broadcast %85 : vector<2x8x1xf32> to vector<2x8x8xf32>
    %87 = arith.subf %83, %86 : vector<2x8x8xf32>
    %88 = math.exp %87 : vector<2x8x8xf32>
    %cst_37 = arith.constant dense<0.000000e+00> : vector<2x8xf32>
    %89 = vector.multi_reduction <add>, %88, %cst_37 [2] : vector<2x8x8xf32> to vector<2x8xf32>
    %90 = vector.shape_cast %89 : vector<2x8xf32> to vector<2x8x1xf32>
    %91 = tpu.reciprocal %90 {approx = true} : vector<2x8x1xf32> -> vector<2x8x1xf32>
    %92 = vector.broadcast %91 : vector<2x8x1xf32> to vector<2x8x8xf32>
    %93 = arith.mulf %88, %92 : vector<2x8x8xf32>
    "tpu.trace_start"() <{level = 10 : i32, message = "nqk,nkd->nqd"}> : () -> ()
    %cst_38 = arith.constant dense<0.000000e+00> : vector<2x8x8xf32>
    %94 = tpu.matmul %93, %82, %cst_38 {dimension_numbers = #tpu.dot_dimension_numbers<[2], [1], [1], [2], [0, 0, 0, 1, 1, 2], [0], [0]>} : vector<2x8x8xf32>, vector<2x8x8xf32>, vector<2x8x8xf32> -> vector<2x8x8xf32>
    "tpu.trace_stop"() : () -> ()
    %95 = vector.shape_cast %94 : vector<2x8x8xf32> to vector<16x8xf32>
    %cst_39 = arith.constant dense<0.000000e+00> : vector<16x32xf32>
    %96 = tpu.matmul %95, %31, %cst_39 {dimension_numbers = #tpu.dot_dimension_numbers<[1], [0], [0], [1], [0, 0, 1, 1], [], []>} : vector<16x8xf32>, vector<8x32xf32>, vector<16x32xf32> -> vector<16x32xf32>
    %97 = arith.addf %76, %96 : vector<16x32xf32>
    %98 = vector.extract_strided_slice %34 {offsets = [0, 24], sizes = [16, 8], strides = [1, 1]} : vector<16x96xf32> to vector<16x8xf32>
    %99 = vector.shape_cast %98 : vector<16x8xf32> to vector<2x8x8xf32>
    %100 = vector.extract_strided_slice %34 {offsets = [0, 56], sizes = [16, 8], strides = [1, 1]} : vector<16x96xf32> to vector<16x8xf32>
    %101 = vector.shape_cast %100 : vector<16x8xf32> to vector<2x8x8xf32>
    %102 = vector.extract_strided_slice %34 {offsets = [0, 88], sizes = [16, 8], strides = [1, 1]} : vector<16x96xf32> to vector<16x8xf32>
    %103 = vector.shape_cast %102 : vector<16x8xf32> to vector<2x8x8xf32>
    "tpu.trace_start"() <{level = 10 : i32, message = "nqd,nkd->nqk"}> : () -> ()
    %cst_40 = arith.constant dense<0.000000e+00> : vector<2x8x8xf32>
    %104 = tpu.matmul %99, %101, %cst_40 {dimension_numbers = #tpu.dot_dimension_numbers<[2], [2], [1], [1], [0, 0, 0, 1, 1, 1], [0], [0]>} : vector<2x8x8xf32>, vector<2x8x8xf32>, vector<2x8x8xf32> -> vector<2x8x8xf32>
    "tpu.trace_stop"() : () -> ()
    %cst_41 = arith.constant dense<0xFF800000> : vector<2x8xf32>
    %105 = vector.multi_reduction <maximumf>, %104, %cst_41 [2] : vector<2x8x8xf32> to vector<2x8xf32>
    %106 = vector.shape_cast %105 : vector<2x8xf32> to vector<2x8x1xf32>
    %107 = vector.broadcast %106 : vector<2x8x1xf32> to vector<2x8x8xf32>
    %108 = arith.subf %104, %107 : vector<2x8x8xf32>
    %109 = math.exp %108 : vector<2x8x8xf32>
    %cst_42 = arith.constant dense<0.000000e+00> : vector<2x8xf32>
    %110 = vector.multi_reduction <add>, %109, %cst_42 [2] : vector<2x8x8xf32> to vector<2x8xf32>
    %111 = vector.shape_cast %110 : vector<2x8xf32> to vector<2x8x1xf32>
    %112 = tpu.reciprocal %111 {approx = true} : vector<2x8x1xf32> -> vector<2x8x1xf32>
    %113 = vector.broadcast %112 : vector<2x8x1xf32> to vector<2x8x8xf32>
    %114 = arith.mulf %109, %113 : vector<2x8x8xf32>
    "tpu.trace_start"() <{level = 10 : i32, message = "nqk,nkd->nqd"}> : () -> ()
    %cst_43 = arith.constant dense<0.000000e+00> : vector<2x8x8xf32>
    %115 = tpu.matmul %114, %103, %cst_43 {dimension_numbers = #tpu.dot_dimension_numbers<[2], [1], [1], [2], [0, 0, 0, 1, 1, 2], [0], [0]>} : vector<2x8x8xf32>, vector<2x8x8xf32>, vector<2x8x8xf32> -> vector<2x8x8xf32>
    "tpu.trace_stop"() : () -> ()
    %116 = vector.shape_cast %115 : vector<2x8x8xf32> to vector<16x8xf32>
    %cst_44 = arith.constant dense<0.000000e+00> : vector<16x32xf32>
    %117 = tpu.matmul %116, %32, %cst_44 {dimension_numbers = #tpu.dot_dimension_numbers<[1], [0], [0], [1], [0, 0, 1, 1], [], []>} : vector<16x8xf32>, vector<8x32xf32>, vector<16x32xf32> -> vector<16x32xf32>
    %118 = arith.addf %97, %117 : vector<16x32xf32>
    %119 = arith.addf %0, %118 : vector<16x32xf32>
    %cst_45 = arith.constant dense<0.000000e+00> : vector<16xf32>
    %120 = vector.multi_reduction <add>, %119, %cst_45 [1] : vector<16x32xf32> to vector<16xf32>
    %121 = vector.shape_cast %120 : vector<16xf32> to vector<16x1xf32>
    %122 = arith.mulf %119, %119 : vector<16x32xf32>
    %cst_46 = arith.constant dense<0.000000e+00> : vector<16xf32>
    %123 = vector.multi_reduction <add>, %122, %cst_46 [1] : vector<16x32xf32> to vector<16xf32>
    %124 = vector.shape_cast %123 : vector<16xf32> to vector<16x1xf32>
    %cst_47 = arith.constant 3.125000e-02 : f32
    %125 = vector.broadcast %cst_47 : f32 to vector<16x1xf32>
    %126 = arith.mulf %121, %125 : vector<16x1xf32>
    %cst_48 = arith.constant 3.125000e-02 : f32
    %127 = vector.broadcast %cst_48 : f32 to vector<16x1xf32>
    %128 = arith.mulf %124, %127 : vector<16x1xf32>
    %129 = arith.mulf %126, %126 : vector<16x1xf32>
    %130 = arith.subf %128, %129 : vector<16x1xf32>
    %131 = vector.broadcast %126 : vector<16x1xf32> to vector<16x32xf32>
    %132 = arith.subf %119, %131 : vector<16x32xf32>
    %cst_49 = arith.constant 9.99999974E-6 : f32
    %133 = vector.broadcast %cst_49 : f32 to vector<16x1xf32>
    %134 = arith.addf %130, %133 : vector<16x1xf32>
    %135 = math.rsqrt %134 : vector<16x1xf32>
    %136 = vector.broadcast %135 : vector<16x1xf32> to vector<16x32xf32>
    %137 = arith.mulf %132, %136 : vector<16x32xf32>
    %138 = arith.mulf %137, %19 : vector<16x32xf32>
    %139 = arith.addf %138, %22 : vector<16x32xf32>
    %cst_50 = arith.constant dense<0.000000e+00> : vector<16x64xf32>
    %140 = tpu.matmul %139, %3, %cst_50 {dimension_numbers = #tpu.dot_dimension_numbers<[1], [0], [0], [1], [0, 0, 1, 1], [], []>} : vector<16x32xf32>, vector<32x64xf32>, vector<16x64xf32> -> vector<16x64xf32>
    %141 = arith.addf %140, %13 : vector<16x64xf32>
    %cst_51 = arith.constant 0.000000e+00 : f32
    %142 = vector.broadcast %cst_51 : f32 to vector<16x64xf32>
    %143 = arith.maximumf %141, %142 : vector<16x64xf32>
    %cst_52 = arith.constant dense<0.000000e+00> : vector<16x32xf32>
    %144 = tpu.matmul %143, %4, %cst_52 {dimension_numbers = #tpu.dot_dimension_numbers<[1], [0], [0], [1], [0, 0, 1, 1], [], []>} : vector<16x64xf32>, vector<64x32xf32>, vector<16x32xf32> -> vector<16x32xf32>
    %145 = arith.addf %144, %16 : vector<16x32xf32>
    %146 = arith.addf %139, %145 : vector<16x32xf32>
    %cst_53 = arith.constant dense<0.000000e+00> : vector<16xf32>
    %147 = vector.multi_reduction <add>, %146, %cst_53 [1] : vector<16x32xf32> to vector<16xf32>
    %148 = vector.shape_cast %147 : vector<16xf32> to vector<16x1xf32>
    %149 = arith.mulf %146, %146 : vector<16x32xf32>
    %cst_54 = arith.constant dense<0.000000e+00> : vector<16xf32>
    %150 = vector.multi_reduction <add>, %149, %cst_54 [1] : vector<16x32xf32> to vector<16xf32>
    %151 = vector.shape_cast %150 : vector<16xf32> to vector<16x1xf32>
    %cst_55 = arith.constant 3.125000e-02 : f32
    %152 = vector.broadcast %cst_55 : f32 to vector<16x1xf32>
    %153 = arith.mulf %148, %152 : vector<16x1xf32>
    %cst_56 = arith.constant 3.125000e-02 : f32
    %154 = vector.broadcast %cst_56 : f32 to vector<16x1xf32>
    %155 = arith.mulf %151, %154 : vector<16x1xf32>
    %156 = arith.mulf %153, %153 : vector<16x1xf32>
    %157 = arith.subf %155, %156 : vector<16x1xf32>
    %158 = vector.broadcast %153 : vector<16x1xf32> to vector<16x32xf32>
    %159 = arith.subf %146, %158 : vector<16x32xf32>
    %cst_57 = arith.constant 9.99999974E-6 : f32
    %160 = vector.broadcast %cst_57 : f32 to vector<16x1xf32>
    %161 = arith.addf %157, %160 : vector<16x1xf32>
    %162 = math.rsqrt %161 : vector<16x1xf32>
    %163 = vector.broadcast %162 : vector<16x1xf32> to vector<16x32xf32>
    %164 = arith.mulf %159, %163 : vector<16x32xf32>
    %165 = arith.mulf %164, %25 : vector<16x32xf32>
    %166 = arith.addf %165, %28 : vector<16x32xf32>
    %cst_58 = arith.constant dense<0.000000e+00> : vector<16x96xf32>
    %167 = tpu.matmul %166, %1, %cst_58 {dimension_numbers = #tpu.dot_dimension_numbers<[1], [0], [0], [1], [0, 0, 1, 1], [], []>} : vector<16x32xf32>, vector<32x96xf32>, vector<16x96xf32> -> vector<16x96xf32>
    %168 = arith.addf %167, %7 : vector<16x96xf32>
    %169 = vector.extract_strided_slice %168 {offsets = [0, 0], sizes = [16, 8], strides = [1, 1]} : vector<16x96xf32> to vector<16x8xf32>
    %170 = vector.shape_cast %169 : vector<16x8xf32> to vector<2x8x8xf32>
    %171 = vector.extract_strided_slice %168 {offsets = [0, 32], sizes = [16, 8], strides = [1, 1]} : vector<16x96xf32> to vector<16x8xf32>
    %172 = vector.shape_cast %171 : vector<16x8xf32> to vector<2x8x8xf32>
    %173 = vector.extract_strided_slice %168 {offsets = [0, 64], sizes = [16, 8], strides = [1, 1]} : vector<16x96xf32> to vector<16x8xf32>
    %174 = vector.shape_cast %173 : vector<16x8xf32> to vector<2x8x8xf32>
    "tpu.trace_start"() <{level = 10 : i32, message = "nqd,nkd->nqk"}> : () -> ()
    %cst_59 = arith.constant dense<0.000000e+00> : vector<2x8x8xf32>
    %175 = tpu.matmul %170, %172, %cst_59 {dimension_numbers = #tpu.dot_dimension_numbers<[2], [2], [1], [1], [0, 0, 0, 1, 1, 1], [0], [0]>} : vector<2x8x8xf32>, vector<2x8x8xf32>, vector<2x8x8xf32> -> vector<2x8x8xf32>
    "tpu.trace_stop"() : () -> ()
    %cst_60 = arith.constant dense<0xFF800000> : vector<2x8xf32>
    %176 = vector.multi_reduction <maximumf>, %175, %cst_60 [2] : vector<2x8x8xf32> to vector<2x8xf32>
    %177 = vector.shape_cast %176 : vector<2x8xf32> to vector<2x8x1xf32>
    %178 = vector.broadcast %177 : vector<2x8x1xf32> to vector<2x8x8xf32>
    %179 = arith.subf %175, %178 : vector<2x8x8xf32>
    %180 = math.exp %179 : vector<2x8x8xf32>
    %cst_61 = arith.constant dense<0.000000e+00> : vector<2x8xf32>
    %181 = vector.multi_reduction <add>, %180, %cst_61 [2] : vector<2x8x8xf32> to vector<2x8xf32>
    %182 = vector.shape_cast %181 : vector<2x8xf32> to vector<2x8x1xf32>
    %183 = tpu.reciprocal %182 {approx = true} : vector<2x8x1xf32> -> vector<2x8x1xf32>
    %184 = vector.broadcast %183 : vector<2x8x1xf32> to vector<2x8x8xf32>
    %185 = arith.mulf %180, %184 : vector<2x8x8xf32>
    "tpu.trace_start"() <{level = 10 : i32, message = "nqk,nkd->nqd"}> : () -> ()
    %cst_62 = arith.constant dense<0.000000e+00> : vector<2x8x8xf32>
    %186 = tpu.matmul %185, %174, %cst_62 {dimension_numbers = #tpu.dot_dimension_numbers<[2], [1], [1], [2], [0, 0, 0, 1, 1, 2], [0], [0]>} : vector<2x8x8xf32>, vector<2x8x8xf32>, vector<2x8x8xf32> -> vector<2x8x8xf32>
    "tpu.trace_stop"() : () -> ()
    %187 = vector.shape_cast %186 : vector<2x8x8xf32> to vector<16x8xf32>
    %cst_63 = arith.constant dense<0.000000e+00> : vector<16x32xf32>
    %188 = tpu.matmul %187, %29, %cst_63 {dimension_numbers = #tpu.dot_dimension_numbers<[1], [0], [0], [1], [0, 0, 1, 1], [], []>} : vector<16x8xf32>, vector<8x32xf32>, vector<16x32xf32> -> vector<16x32xf32>
    %189 = arith.addf %10, %188 : vector<16x32xf32>
    %190 = vector.extract_strided_slice %168 {offsets = [0, 8], sizes = [16, 8], strides = [1, 1]} : vector<16x96xf32> to vector<16x8xf32>
    %191 = vector.shape_cast %190 : vector<16x8xf32> to vector<2x8x8xf32>
    %192 = vector.extract_strided_slice %168 {offsets = [0, 40], sizes = [16, 8], strides = [1, 1]} : vector<16x96xf32> to vector<16x8xf32>
    %193 = vector.shape_cast %192 : vector<16x8xf32> to vector<2x8x8xf32>
    %194 = vector.extract_strided_slice %168 {offsets = [0, 72], sizes = [16, 8], strides = [1, 1]} : vector<16x96xf32> to vector<16x8xf32>
    %195 = vector.shape_cast %194 : vector<16x8xf32> to vector<2x8x8xf32>
    "tpu.trace_start"() <{level = 10 : i32, message = "nqd,nkd->nqk"}> : () -> ()
    %cst_64 = arith.constant dense<0.000000e+00> : vector<2x8x8xf32>
    %196 = tpu.matmul %191, %193, %cst_64 {dimension_numbers = #tpu.dot_dimension_numbers<[2], [2], [1], [1], [0, 0, 0, 1, 1, 1], [0], [0]>} : vector<2x8x8xf32>, vector<2x8x8xf32>, vector<2x8x8xf32> -> vector<2x8x8xf32>
    "tpu.trace_stop"() : () -> ()
    %cst_65 = arith.constant dense<0xFF800000> : vector<2x8xf32>
    %197 = vector.multi_reduction <maximumf>, %196, %cst_65 [2] : vector<2x8x8xf32> to vector<2x8xf32>
    %198 = vector.shape_cast %197 : vector<2x8xf32> to vector<2x8x1xf32>
    %199 = vector.broadcast %198 : vector<2x8x1xf32> to vector<2x8x8xf32>
    %200 = arith.subf %196, %199 : vector<2x8x8xf32>
    %201 = math.exp %200 : vector<2x8x8xf32>
    %cst_66 = arith.constant dense<0.000000e+00> : vector<2x8xf32>
    %202 = vector.multi_reduction <add>, %201, %cst_66 [2] : vector<2x8x8xf32> to vector<2x8xf32>
    %203 = vector.shape_cast %202 : vector<2x8xf32> to vector<2x8x1xf32>
    %204 = tpu.reciprocal %203 {approx = true} : vector<2x8x1xf32> -> vector<2x8x1xf32>
    %205 = vector.broadcast %204 : vector<2x8x1xf32> to vector<2x8x8xf32>
    %206 = arith.mulf %201, %205 : vector<2x8x8xf32>
    "tpu.trace_start"() <{level = 10 : i32, message = "nqk,nkd->nqd"}> : () -> ()
    %cst_67 = arith.constant dense<0.000000e+00> : vector<2x8x8xf32>
    %207 = tpu.matmul %206, %195, %cst_67 {dimension_numbers = #tpu.dot_dimension_numbers<[2], [1], [1], [2], [0, 0, 0, 1, 1, 2], [0], [0]>} : vector<2x8x8xf32>, vector<2x8x8xf32>, vector<2x8x8xf32> -> vector<2x8x8xf32>
    "tpu.trace_stop"() : () -> ()
    %208 = vector.shape_cast %207 : vector<2x8x8xf32> to vector<16x8xf32>
    %cst_68 = arith.constant dense<0.000000e+00> : vector<16x32xf32>
    %209 = tpu.matmul %208, %30, %cst_68 {dimension_numbers = #tpu.dot_dimension_numbers<[1], [0], [0], [1], [0, 0, 1, 1], [], []>} : vector<16x8xf32>, vector<8x32xf32>, vector<16x32xf32> -> vector<16x32xf32>
    %210 = arith.addf %189, %209 : vector<16x32xf32>
    %211 = vector.extract_strided_slice %168 {offsets = [0, 16], sizes = [16, 8], strides = [1, 1]} : vector<16x96xf32> to vector<16x8xf32>
    %212 = vector.shape_cast %211 : vector<16x8xf32> to vector<2x8x8xf32>
    %213 = vector.extract_strided_slice %168 {offsets = [0, 48], sizes = [16, 8], strides = [1, 1]} : vector<16x96xf32> to vector<16x8xf32>
    %214 = vector.shape_cast %213 : vector<16x8xf32> to vector<2x8x8xf32>
    %215 = vector.extract_strided_slice %168 {offsets = [0, 80], sizes = [16, 8], strides = [1, 1]} : vector<16x96xf32> to vector<16x8xf32>
    %216 = vector.shape_cast %215 : vector<16x8xf32> to vector<2x8x8xf32>
    "tpu.trace_start"() <{level = 10 : i32, message = "nqd,nkd->nqk"}> : () -> ()
    %cst_69 = arith.constant dense<0.000000e+00> : vector<2x8x8xf32>
    %217 = tpu.matmul %212, %214, %cst_69 {dimension_numbers = #tpu.dot_dimension_numbers<[2], [2], [1], [1], [0, 0, 0, 1, 1, 1], [0], [0]>} : vector<2x8x8xf32>, vector<2x8x8xf32>, vector<2x8x8xf32> -> vector<2x8x8xf32>
    "tpu.trace_stop"() : () -> ()
    %cst_70 = arith.constant dense<0xFF800000> : vector<2x8xf32>
    %218 = vector.multi_reduction <maximumf>, %217, %cst_70 [2] : vector<2x8x8xf32> to vector<2x8xf32>
    %219 = vector.shape_cast %218 : vector<2x8xf32> to vector<2x8x1xf32>
    %220 = vector.broadcast %219 : vector<2x8x1xf32> to vector<2x8x8xf32>
    %221 = arith.subf %217, %220 : vector<2x8x8xf32>
    %222 = math.exp %221 : vector<2x8x8xf32>
    %cst_71 = arith.constant dense<0.000000e+00> : vector<2x8xf32>
    %223 = vector.multi_reduction <add>, %222, %cst_71 [2] : vector<2x8x8xf32> to vector<2x8xf32>
    %224 = vector.shape_cast %223 : vector<2x8xf32> to vector<2x8x1xf32>
    %225 = tpu.reciprocal %224 {approx = true} : vector<2x8x1xf32> -> vector<2x8x1xf32>
    %226 = vector.broadcast %225 : vector<2x8x1xf32> to vector<2x8x8xf32>
    %227 = arith.mulf %222, %226 : vector<2x8x8xf32>
    "tpu.trace_start"() <{level = 10 : i32, message = "nqk,nkd->nqd"}> : () -> ()
    %cst_72 = arith.constant dense<0.000000e+00> : vector<2x8x8xf32>
    %228 = tpu.matmul %227, %216, %cst_72 {dimension_numbers = #tpu.dot_dimension_numbers<[2], [1], [1], [2], [0, 0, 0, 1, 1, 2], [0], [0]>} : vector<2x8x8xf32>, vector<2x8x8xf32>, vector<2x8x8xf32> -> vector<2x8x8xf32>
    "tpu.trace_stop"() : () -> ()
    %229 = vector.shape_cast %228 : vector<2x8x8xf32> to vector<16x8xf32>
    %cst_73 = arith.constant dense<0.000000e+00> : vector<16x32xf32>
    %230 = tpu.matmul %229, %31, %cst_73 {dimension_numbers = #tpu.dot_dimension_numbers<[1], [0], [0], [1], [0, 0, 1, 1], [], []>} : vector<16x8xf32>, vector<8x32xf32>, vector<16x32xf32> -> vector<16x32xf32>
    %231 = arith.addf %210, %230 : vector<16x32xf32>
    %232 = vector.extract_strided_slice %168 {offsets = [0, 24], sizes = [16, 8], strides = [1, 1]} : vector<16x96xf32> to vector<16x8xf32>
    %233 = vector.shape_cast %232 : vector<16x8xf32> to vector<2x8x8xf32>
    %234 = vector.extract_strided_slice %168 {offsets = [0, 56], sizes = [16, 8], strides = [1, 1]} : vector<16x96xf32> to vector<16x8xf32>
    %235 = vector.shape_cast %234 : vector<16x8xf32> to vector<2x8x8xf32>
    %236 = vector.extract_strided_slice %168 {offsets = [0, 88], sizes = [16, 8], strides = [1, 1]} : vector<16x96xf32> to vector<16x8xf32>
    %237 = vector.shape_cast %236 : vector<16x8xf32> to vector<2x8x8xf32>
    "tpu.trace_start"() <{level = 10 : i32, message = "nqd,nkd->nqk"}> : () -> ()
    %cst_74 = arith.constant dense<0.000000e+00> : vector<2x8x8xf32>
    %238 = tpu.matmul %233, %235, %cst_74 {dimension_numbers = #tpu.dot_dimension_numbers<[2], [2], [1], [1], [0, 0, 0, 1, 1, 1], [0], [0]>} : vector<2x8x8xf32>, vector<2x8x8xf32>, vector<2x8x8xf32> -> vector<2x8x8xf32>
    "tpu.trace_stop"() : () -> ()
    %cst_75 = arith.constant dense<0xFF800000> : vector<2x8xf32>
    %239 = vector.multi_reduction <maximumf>, %238, %cst_75 [2] : vector<2x8x8xf32> to vector<2x8xf32>
    %240 = vector.shape_cast %239 : vector<2x8xf32> to vector<2x8x1xf32>
    %241 = vector.broadcast %240 : vector<2x8x1xf32> to vector<2x8x8xf32>
    %242 = arith.subf %238, %241 : vector<2x8x8xf32>
    %243 = math.exp %242 : vector<2x8x8xf32>
    %cst_76 = arith.constant dense<0.000000e+00> : vector<2x8xf32>
    %244 = vector.multi_reduction <add>, %243, %cst_76 [2] : vector<2x8x8xf32> to vector<2x8xf32>
    %245 = vector.shape_cast %244 : vector<2x8xf32> to vector<2x8x1xf32>
    %246 = tpu.reciprocal %245 {approx = true} : vector<2x8x1xf32> -> vector<2x8x1xf32>
    %247 = vector.broadcast %246 : vector<2x8x1xf32> to vector<2x8x8xf32>
    %248 = arith.mulf %243, %247 : vector<2x8x8xf32>
    "tpu.trace_start"() <{level = 10 : i32, message = "nqk,nkd->nqd"}> : () -> ()
    %cst_77 = arith.constant dense<0.000000e+00> : vector<2x8x8xf32>
    %249 = tpu.matmul %248, %237, %cst_77 {dimension_numbers = #tpu.dot_dimension_numbers<[2], [1], [1], [2], [0, 0, 0, 1, 1, 2], [0], [0]>} : vector<2x8x8xf32>, vector<2x8x8xf32>, vector<2x8x8xf32> -> vector<2x8x8xf32>
    "tpu.trace_stop"() : () -> ()
    %250 = vector.shape_cast %249 : vector<2x8x8xf32> to vector<16x8xf32>
    %cst_78 = arith.constant dense<0.000000e+00> : vector<16x32xf32>
    %251 = tpu.matmul %250, %32, %cst_78 {dimension_numbers = #tpu.dot_dimension_numbers<[1], [0], [0], [1], [0, 0, 1, 1], [], []>} : vector<16x8xf32>, vector<8x32xf32>, vector<16x32xf32> -> vector<16x32xf32>
    %252 = arith.addf %231, %251 : vector<16x32xf32>
    %253 = arith.addf %166, %252 : vector<16x32xf32>
    %cst_79 = arith.constant dense<0.000000e+00> : vector<16xf32>
    %254 = vector.multi_reduction <add>, %253, %cst_79 [1] : vector<16x32xf32> to vector<16xf32>
    %255 = vector.shape_cast %254 : vector<16xf32> to vector<16x1xf32>
    %256 = arith.mulf %253, %253 : vector<16x32xf32>
    %cst_80 = arith.constant dense<0.000000e+00> : vector<16xf32>
    %257 = vector.multi_reduction <add>, %256, %cst_80 [1] : vector<16x32xf32> to vector<16xf32>
    %258 = vector.shape_cast %257 : vector<16xf32> to vector<16x1xf32>
    %cst_81 = arith.constant 3.125000e-02 : f32
    %259 = vector.broadcast %cst_81 : f32 to vector<16x1xf32>
    %260 = arith.mulf %255, %259 : vector<16x1xf32>
    %cst_82 = arith.constant 3.125000e-02 : f32
    %261 = vector.broadcast %cst_82 : f32 to vector<16x1xf32>
    %262 = arith.mulf %258, %261 : vector<16x1xf32>
    %263 = arith.mulf %260, %260 : vector<16x1xf32>
    %264 = arith.subf %262, %263 : vector<16x1xf32>
    %265 = vector.broadcast %260 : vector<16x1xf32> to vector<16x32xf32>
    %266 = arith.subf %253, %265 : vector<16x32xf32>
    %cst_83 = arith.constant 9.99999974E-6 : f32
    %267 = vector.broadcast %cst_83 : f32 to vector<16x1xf32>
    %268 = arith.addf %264, %267 : vector<16x1xf32>
    %269 = math.rsqrt %268 : vector<16x1xf32>
    %270 = vector.broadcast %269 : vector<16x1xf32> to vector<16x32xf32>
    %271 = arith.mulf %266, %270 : vector<16x32xf32>
    %272 = arith.mulf %271, %19 : vector<16x32xf32>
    %273 = arith.addf %272, %22 : vector<16x32xf32>
    %cst_84 = arith.constant dense<0.000000e+00> : vector<16x64xf32>
    %274 = tpu.matmul %273, %3, %cst_84 {dimension_numbers = #tpu.dot_dimension_numbers<[1], [0], [0], [1], [0, 0, 1, 1], [], []>} : vector<16x32xf32>, vector<32x64xf32>, vector<16x64xf32> -> vector<16x64xf32>
    %275 = arith.addf %274, %13 : vector<16x64xf32>
    %cst_85 = arith.constant 0.000000e+00 : f32
    %276 = vector.broadcast %cst_85 : f32 to vector<16x64xf32>
    %277 = arith.maximumf %275, %276 : vector<16x64xf32>
    %cst_86 = arith.constant dense<0.000000e+00> : vector<16x32xf32>
    %278 = tpu.matmul %277, %4, %cst_86 {dimension_numbers = #tpu.dot_dimension_numbers<[1], [0], [0], [1], [0, 0, 1, 1], [], []>} : vector<16x64xf32>, vector<64x32xf32>, vector<16x32xf32> -> vector<16x32xf32>
    %279 = arith.addf %278, %16 : vector<16x32xf32>
    %280 = arith.addf %273, %279 : vector<16x32xf32>
    %cst_87 = arith.constant dense<0.000000e+00> : vector<16xf32>
    %281 = vector.multi_reduction <add>, %280, %cst_87 [1] : vector<16x32xf32> to vector<16xf32>
    %282 = vector.shape_cast %281 : vector<16xf32> to vector<16x1xf32>
    %283 = arith.mulf %280, %280 : vector<16x32xf32>
    %cst_88 = arith.constant dense<0.000000e+00> : vector<16xf32>
    %284 = vector.multi_reduction <add>, %283, %cst_88 [1] : vector<16x32xf32> to vector<16xf32>
    %285 = vector.shape_cast %284 : vector<16xf32> to vector<16x1xf32>
    %cst_89 = arith.constant 3.125000e-02 : f32
    %286 = vector.broadcast %cst_89 : f32 to vector<16x1xf32>
    %287 = arith.mulf %282, %286 : vector<16x1xf32>
    %cst_90 = arith.constant 3.125000e-02 : f32
    %288 = vector.broadcast %cst_90 : f32 to vector<16x1xf32>
    %289 = arith.mulf %285, %288 : vector<16x1xf32>
    %290 = arith.mulf %287, %287 : vector<16x1xf32>
    %291 = arith.subf %289, %290 : vector<16x1xf32>
    %292 = vector.broadcast %287 : vector<16x1xf32> to vector<16x32xf32>
    %293 = arith.subf %280, %292 : vector<16x32xf32>
    %cst_91 = arith.constant 9.99999974E-6 : f32
    %294 = vector.broadcast %cst_91 : f32 to vector<16x1xf32>
    %295 = arith.addf %291, %294 : vector<16x1xf32>
    %296 = math.rsqrt %295 : vector<16x1xf32>
    %297 = vector.broadcast %296 : vector<16x1xf32> to vector<16x32xf32>
    %298 = arith.mulf %293, %297 : vector<16x32xf32>
    %299 = arith.mulf %298, %25 : vector<16x32xf32>
    %300 = arith.addf %299, %28 : vector<16x32xf32>
    %cst_92 = arith.constant dense<0.000000e+00> : vector<16x96xf32>
    %301 = tpu.matmul %300, %1, %cst_92 {dimension_numbers = #tpu.dot_dimension_numbers<[1], [0], [0], [1], [0, 0, 1, 1], [], []>} : vector<16x32xf32>, vector<32x96xf32>, vector<16x96xf32> -> vector<16x96xf32>
    %302 = arith.addf %301, %7 : vector<16x96xf32>
    %303 = vector.extract_strided_slice %302 {offsets = [0, 0], sizes = [16, 8], strides = [1, 1]} : vector<16x96xf32> to vector<16x8xf32>
    %304 = vector.shape_cast %303 : vector<16x8xf32> to vector<2x8x8xf32>
    %305 = vector.extract_strided_slice %302 {offsets = [0, 32], sizes = [16, 8], strides = [1, 1]} : vector<16x96xf32> to vector<16x8xf32>
    %306 = vector.shape_cast %305 : vector<16x8xf32> to vector<2x8x8xf32>
    %307 = vector.extract_strided_slice %302 {offsets = [0, 64], sizes = [16, 8], strides = [1, 1]} : vector<16x96xf32> to vector<16x8xf32>
    %308 = vector.shape_cast %307 : vector<16x8xf32> to vector<2x8x8xf32>
    "tpu.trace_start"() <{level = 10 : i32, message = "nqd,nkd->nqk"}> : () -> ()
    %cst_93 = arith.constant dense<0.000000e+00> : vector<2x8x8xf32>
    %309 = tpu.matmul %304, %306, %cst_93 {dimension_numbers = #tpu.dot_dimension_numbers<[2], [2], [1], [1], [0, 0, 0, 1, 1, 1], [0], [0]>} : vector<2x8x8xf32>, vector<2x8x8xf32>, vector<2x8x8xf32> -> vector<2x8x8xf32>
    "tpu.trace_stop"() : () -> ()
    %cst_94 = arith.constant dense<0xFF800000> : vector<2x8xf32>
    %310 = vector.multi_reduction <maximumf>, %309, %cst_94 [2] : vector<2x8x8xf32> to vector<2x8xf32>
    %311 = vector.shape_cast %310 : vector<2x8xf32> to vector<2x8x1xf32>
    %312 = vector.broadcast %311 : vector<2x8x1xf32> to vector<2x8x8xf32>
    %313 = arith.subf %309, %312 : vector<2x8x8xf32>
    %314 = math.exp %313 : vector<2x8x8xf32>
    %cst_95 = arith.constant dense<0.000000e+00> : vector<2x8xf32>
    %315 = vector.multi_reduction <add>, %314, %cst_95 [2] : vector<2x8x8xf32> to vector<2x8xf32>
    %316 = vector.shape_cast %315 : vector<2x8xf32> to vector<2x8x1xf32>
    %317 = tpu.reciprocal %316 {approx = true} : vector<2x8x1xf32> -> vector<2x8x1xf32>
    %318 = vector.broadcast %317 : vector<2x8x1xf32> to vector<2x8x8xf32>
    %319 = arith.mulf %314, %318 : vector<2x8x8xf32>
    "tpu.trace_start"() <{level = 10 : i32, message = "nqk,nkd->nqd"}> : () -> ()
    %cst_96 = arith.constant dense<0.000000e+00> : vector<2x8x8xf32>
    %320 = tpu.matmul %319, %308, %cst_96 {dimension_numbers = #tpu.dot_dimension_numbers<[2], [1], [1], [2], [0, 0, 0, 1, 1, 2], [0], [0]>} : vector<2x8x8xf32>, vector<2x8x8xf32>, vector<2x8x8xf32> -> vector<2x8x8xf32>
    "tpu.trace_stop"() : () -> ()
    %321 = vector.shape_cast %320 : vector<2x8x8xf32> to vector<16x8xf32>
    %cst_97 = arith.constant dense<0.000000e+00> : vector<16x32xf32>
    %322 = tpu.matmul %321, %29, %cst_97 {dimension_numbers = #tpu.dot_dimension_numbers<[1], [0], [0], [1], [0, 0, 1, 1], [], []>} : vector<16x8xf32>, vector<8x32xf32>, vector<16x32xf32> -> vector<16x32xf32>
    %323 = arith.addf %10, %322 : vector<16x32xf32>
    %324 = vector.extract_strided_slice %302 {offsets = [0, 8], sizes = [16, 8], strides = [1, 1]} : vector<16x96xf32> to vector<16x8xf32>
    %325 = vector.shape_cast %324 : vector<16x8xf32> to vector<2x8x8xf32>
    %326 = vector.extract_strided_slice %302 {offsets = [0, 40], sizes = [16, 8], strides = [1, 1]} : vector<16x96xf32> to vector<16x8xf32>
    %327 = vector.shape_cast %326 : vector<16x8xf32> to vector<2x8x8xf32>
    %328 = vector.extract_strided_slice %302 {offsets = [0, 72], sizes = [16, 8], strides = [1, 1]} : vector<16x96xf32> to vector<16x8xf32>
    %329 = vector.shape_cast %328 : vector<16x8xf32> to vector<2x8x8xf32>
    "tpu.trace_start"() <{level = 10 : i32, message = "nqd,nkd->nqk"}> : () -> ()
    %cst_98 = arith.constant dense<0.000000e+00> : vector<2x8x8xf32>
    %330 = tpu.matmul %325, %327, %cst_98 {dimension_numbers = #tpu.dot_dimension_numbers<[2], [2], [1], [1], [0, 0, 0, 1, 1, 1], [0], [0]>} : vector<2x8x8xf32>, vector<2x8x8xf32>, vector<2x8x8xf32> -> vector<2x8x8xf32>
    "tpu.trace_stop"() : () -> ()
    %cst_99 = arith.constant dense<0xFF800000> : vector<2x8xf32>
    %331 = vector.multi_reduction <maximumf>, %330, %cst_99 [2] : vector<2x8x8xf32> to vector<2x8xf32>
    %332 = vector.shape_cast %331 : vector<2x8xf32> to vector<2x8x1xf32>
    %333 = vector.broadcast %332 : vector<2x8x1xf32> to vector<2x8x8xf32>
    %334 = arith.subf %330, %333 : vector<2x8x8xf32>
    %335 = math.exp %334 : vector<2x8x8xf32>
    %cst_100 = arith.constant dense<0.000000e+00> : vector<2x8xf32>
    %336 = vector.multi_reduction <add>, %335, %cst_100 [2] : vector<2x8x8xf32> to vector<2x8xf32>
    %337 = vector.shape_cast %336 : vector<2x8xf32> to vector<2x8x1xf32>
    %338 = tpu.reciprocal %337 {approx = true} : vector<2x8x1xf32> -> vector<2x8x1xf32>
    %339 = vector.broadcast %338 : vector<2x8x1xf32> to vector<2x8x8xf32>
    %340 = arith.mulf %335, %339 : vector<2x8x8xf32>
    "tpu.trace_start"() <{level = 10 : i32, message = "nqk,nkd->nqd"}> : () -> ()
    %cst_101 = arith.constant dense<0.000000e+00> : vector<2x8x8xf32>
    %341 = tpu.matmul %340, %329, %cst_101 {dimension_numbers = #tpu.dot_dimension_numbers<[2], [1], [1], [2], [0, 0, 0, 1, 1, 2], [0], [0]>} : vector<2x8x8xf32>, vector<2x8x8xf32>, vector<2x8x8xf32> -> vector<2x8x8xf32>
    "tpu.trace_stop"() : () -> ()
    %342 = vector.shape_cast %341 : vector<2x8x8xf32> to vector<16x8xf32>
    %cst_102 = arith.constant dense<0.000000e+00> : vector<16x32xf32>
    %343 = tpu.matmul %342, %30, %cst_102 {dimension_numbers = #tpu.dot_dimension_numbers<[1], [0], [0], [1], [0, 0, 1, 1], [], []>} : vector<16x8xf32>, vector<8x32xf32>, vector<16x32xf32> -> vector<16x32xf32>
    %344 = arith.addf %323, %343 : vector<16x32xf32>
    %345 = vector.extract_strided_slice %302 {offsets = [0, 16], sizes = [16, 8], strides = [1, 1]} : vector<16x96xf32> to vector<16x8xf32>
    %346 = vector.shape_cast %345 : vector<16x8xf32> to vector<2x8x8xf32>
    %347 = vector.extract_strided_slice %302 {offsets = [0, 48], sizes = [16, 8], strides = [1, 1]} : vector<16x96xf32> to vector<16x8xf32>
    %348 = vector.shape_cast %347 : vector<16x8xf32> to vector<2x8x8xf32>
    %349 = vector.extract_strided_slice %302 {offsets = [0, 80], sizes = [16, 8], strides = [1, 1]} : vector<16x96xf32> to vector<16x8xf32>
    %350 = vector.shape_cast %349 : vector<16x8xf32> to vector<2x8x8xf32>
    "tpu.trace_start"() <{level = 10 : i32, message = "nqd,nkd->nqk"}> : () -> ()
    %cst_103 = arith.constant dense<0.000000e+00> : vector<2x8x8xf32>
    %351 = tpu.matmul %346, %348, %cst_103 {dimension_numbers = #tpu.dot_dimension_numbers<[2], [2], [1], [1], [0, 0, 0, 1, 1, 1], [0], [0]>} : vector<2x8x8xf32>, vector<2x8x8xf32>, vector<2x8x8xf32> -> vector<2x8x8xf32>
    "tpu.trace_stop"() : () -> ()
    %cst_104 = arith.constant dense<0xFF800000> : vector<2x8xf32>
    %352 = vector.multi_reduction <maximumf>, %351, %cst_104 [2] : vector<2x8x8xf32> to vector<2x8xf32>
    %353 = vector.shape_cast %352 : vector<2x8xf32> to vector<2x8x1xf32>
    %354 = vector.broadcast %353 : vector<2x8x1xf32> to vector<2x8x8xf32>
    %355 = arith.subf %351, %354 : vector<2x8x8xf32>
    %356 = math.exp %355 : vector<2x8x8xf32>
    %cst_105 = arith.constant dense<0.000000e+00> : vector<2x8xf32>
    %357 = vector.multi_reduction <add>, %356, %cst_105 [2] : vector<2x8x8xf32> to vector<2x8xf32>
    %358 = vector.shape_cast %357 : vector<2x8xf32> to vector<2x8x1xf32>
    %359 = tpu.reciprocal %358 {approx = true} : vector<2x8x1xf32> -> vector<2x8x1xf32>
    %360 = vector.broadcast %359 : vector<2x8x1xf32> to vector<2x8x8xf32>
    %361 = arith.mulf %356, %360 : vector<2x8x8xf32>
    "tpu.trace_start"() <{level = 10 : i32, message = "nqk,nkd->nqd"}> : () -> ()
    %cst_106 = arith.constant dense<0.000000e+00> : vector<2x8x8xf32>
    %362 = tpu.matmul %361, %350, %cst_106 {dimension_numbers = #tpu.dot_dimension_numbers<[2], [1], [1], [2], [0, 0, 0, 1, 1, 2], [0], [0]>} : vector<2x8x8xf32>, vector<2x8x8xf32>, vector<2x8x8xf32> -> vector<2x8x8xf32>
    "tpu.trace_stop"() : () -> ()
    %363 = vector.shape_cast %362 : vector<2x8x8xf32> to vector<16x8xf32>
    %cst_107 = arith.constant dense<0.000000e+00> : vector<16x32xf32>
    %364 = tpu.matmul %363, %31, %cst_107 {dimension_numbers = #tpu.dot_dimension_numbers<[1], [0], [0], [1], [0, 0, 1, 1], [], []>} : vector<16x8xf32>, vector<8x32xf32>, vector<16x32xf32> -> vector<16x32xf32>
    %365 = arith.addf %344, %364 : vector<16x32xf32>
    %366 = vector.extract_strided_slice %302 {offsets = [0, 24], sizes = [16, 8], strides = [1, 1]} : vector<16x96xf32> to vector<16x8xf32>
    %367 = vector.shape_cast %366 : vector<16x8xf32> to vector<2x8x8xf32>
    %368 = vector.extract_strided_slice %302 {offsets = [0, 56], sizes = [16, 8], strides = [1, 1]} : vector<16x96xf32> to vector<16x8xf32>
    %369 = vector.shape_cast %368 : vector<16x8xf32> to vector<2x8x8xf32>
    %370 = vector.extract_strided_slice %302 {offsets = [0, 88], sizes = [16, 8], strides = [1, 1]} : vector<16x96xf32> to vector<16x8xf32>
    %371 = vector.shape_cast %370 : vector<16x8xf32> to vector<2x8x8xf32>
    "tpu.trace_start"() <{level = 10 : i32, message = "nqd,nkd->nqk"}> : () -> ()
    %cst_108 = arith.constant dense<0.000000e+00> : vector<2x8x8xf32>
    %372 = tpu.matmul %367, %369, %cst_108 {dimension_numbers = #tpu.dot_dimension_numbers<[2], [2], [1], [1], [0, 0, 0, 1, 1, 1], [0], [0]>} : vector<2x8x8xf32>, vector<2x8x8xf32>, vector<2x8x8xf32> -> vector<2x8x8xf32>
    "tpu.trace_stop"() : () -> ()
    %cst_109 = arith.constant dense<0xFF800000> : vector<2x8xf32>
    %373 = vector.multi_reduction <maximumf>, %372, %cst_109 [2] : vector<2x8x8xf32> to vector<2x8xf32>
    %374 = vector.shape_cast %373 : vector<2x8xf32> to vector<2x8x1xf32>
    %375 = vector.broadcast %374 : vector<2x8x1xf32> to vector<2x8x8xf32>
    %376 = arith.subf %372, %375 : vector<2x8x8xf32>
    %377 = math.exp %376 : vector<2x8x8xf32>
    %cst_110 = arith.constant dense<0.000000e+00> : vector<2x8xf32>
    %378 = vector.multi_reduction <add>, %377, %cst_110 [2] : vector<2x8x8xf32> to vector<2x8xf32>
    %379 = vector.shape_cast %378 : vector<2x8xf32> to vector<2x8x1xf32>
    %380 = tpu.reciprocal %379 {approx = true} : vector<2x8x1xf32> -> vector<2x8x1xf32>
    %381 = vector.broadcast %380 : vector<2x8x1xf32> to vector<2x8x8xf32>
    %382 = arith.mulf %377, %381 : vector<2x8x8xf32>
    "tpu.trace_start"() <{level = 10 : i32, message = "nqk,nkd->nqd"}> : () -> ()
    %cst_111 = arith.constant dense<0.000000e+00> : vector<2x8x8xf32>
    %383 = tpu.matmul %382, %371, %cst_111 {dimension_numbers = #tpu.dot_dimension_numbers<[2], [1], [1], [2], [0, 0, 0, 1, 1, 2], [0], [0]>} : vector<2x8x8xf32>, vector<2x8x8xf32>, vector<2x8x8xf32> -> vector<2x8x8xf32>
    "tpu.trace_stop"() : () -> ()
    %384 = vector.shape_cast %383 : vector<2x8x8xf32> to vector<16x8xf32>
    %cst_112 = arith.constant dense<0.000000e+00> : vector<16x32xf32>
    %385 = tpu.matmul %384, %32, %cst_112 {dimension_numbers = #tpu.dot_dimension_numbers<[1], [0], [0], [1], [0, 0, 1, 1], [], []>} : vector<16x8xf32>, vector<8x32xf32>, vector<16x32xf32> -> vector<16x32xf32>
    %386 = arith.addf %365, %385 : vector<16x32xf32>
    %387 = arith.addf %300, %386 : vector<16x32xf32>
    %cst_113 = arith.constant dense<0.000000e+00> : vector<16xf32>
    %388 = vector.multi_reduction <add>, %387, %cst_113 [1] : vector<16x32xf32> to vector<16xf32>
    %389 = vector.shape_cast %388 : vector<16xf32> to vector<16x1xf32>
    %390 = arith.mulf %387, %387 : vector<16x32xf32>
    %cst_114 = arith.constant dense<0.000000e+00> : vector<16xf32>
    %391 = vector.multi_reduction <add>, %390, %cst_114 [1] : vector<16x32xf32> to vector<16xf32>
    %392 = vector.shape_cast %391 : vector<16xf32> to vector<16x1xf32>
    %cst_115 = arith.constant 3.125000e-02 : f32
    %393 = vector.broadcast %cst_115 : f32 to vector<16x1xf32>
    %394 = arith.mulf %389, %393 : vector<16x1xf32>
    %cst_116 = arith.constant 3.125000e-02 : f32
    %395 = vector.broadcast %cst_116 : f32 to vector<16x1xf32>
    %396 = arith.mulf %392, %395 : vector<16x1xf32>
    %397 = arith.mulf %394, %394 : vector<16x1xf32>
    %398 = arith.subf %396, %397 : vector<16x1xf32>
    %399 = vector.broadcast %394 : vector<16x1xf32> to vector<16x32xf32>
    %400 = arith.subf %387, %399 : vector<16x32xf32>
    %cst_117 = arith.constant 9.99999974E-6 : f32
    %401 = vector.broadcast %cst_117 : f32 to vector<16x1xf32>
    %402 = arith.addf %398, %401 : vector<16x1xf32>
    %403 = math.rsqrt %402 : vector<16x1xf32>
    %404 = vector.broadcast %403 : vector<16x1xf32> to vector<16x32xf32>
    %405 = arith.mulf %400, %404 : vector<16x32xf32>
    %406 = arith.mulf %405, %19 : vector<16x32xf32>
    %407 = arith.addf %406, %22 : vector<16x32xf32>
    %cst_118 = arith.constant dense<0.000000e+00> : vector<16x64xf32>
    %408 = tpu.matmul %407, %3, %cst_118 {dimension_numbers = #tpu.dot_dimension_numbers<[1], [0], [0], [1], [0, 0, 1, 1], [], []>} : vector<16x32xf32>, vector<32x64xf32>, vector<16x64xf32> -> vector<16x64xf32>
    %409 = arith.addf %408, %13 : vector<16x64xf32>
    %cst_119 = arith.constant 0.000000e+00 : f32
    %410 = vector.broadcast %cst_119 : f32 to vector<16x64xf32>
    %411 = arith.maximumf %409, %410 : vector<16x64xf32>
    %cst_120 = arith.constant dense<0.000000e+00> : vector<16x32xf32>
    %412 = tpu.matmul %411, %4, %cst_120 {dimension_numbers = #tpu.dot_dimension_numbers<[1], [0], [0], [1], [0, 0, 1, 1], [], []>} : vector<16x64xf32>, vector<64x32xf32>, vector<16x32xf32> -> vector<16x32xf32>
    %413 = arith.addf %412, %16 : vector<16x32xf32>
    %414 = arith.addf %407, %413 : vector<16x32xf32>
    %cst_121 = arith.constant dense<0.000000e+00> : vector<16xf32>
    %415 = vector.multi_reduction <add>, %414, %cst_121 [1] : vector<16x32xf32> to vector<16xf32>
    %416 = vector.shape_cast %415 : vector<16xf32> to vector<16x1xf32>
    %417 = arith.mulf %414, %414 : vector<16x32xf32>
    %cst_122 = arith.constant dense<0.000000e+00> : vector<16xf32>
    %418 = vector.multi_reduction <add>, %417, %cst_122 [1] : vector<16x32xf32> to vector<16xf32>
    %419 = vector.shape_cast %418 : vector<16xf32> to vector<16x1xf32>
    %cst_123 = arith.constant 3.125000e-02 : f32
    %420 = vector.broadcast %cst_123 : f32 to vector<16x1xf32>
    %421 = arith.mulf %416, %420 : vector<16x1xf32>
    %cst_124 = arith.constant 3.125000e-02 : f32
    %422 = vector.broadcast %cst_124 : f32 to vector<16x1xf32>
    %423 = arith.mulf %419, %422 : vector<16x1xf32>
    %424 = arith.mulf %421, %421 : vector<16x1xf32>
    %425 = arith.subf %423, %424 : vector<16x1xf32>
    %426 = vector.broadcast %421 : vector<16x1xf32> to vector<16x32xf32>
    %427 = arith.subf %414, %426 : vector<16x32xf32>
    %cst_125 = arith.constant 9.99999974E-6 : f32
    %428 = vector.broadcast %cst_125 : f32 to vector<16x1xf32>
    %429 = arith.addf %425, %428 : vector<16x1xf32>
    %430 = math.rsqrt %429 : vector<16x1xf32>
    %431 = vector.broadcast %430 : vector<16x1xf32> to vector<16x32xf32>
    %432 = arith.mulf %427, %431 : vector<16x32xf32>
    %433 = arith.mulf %432, %25 : vector<16x32xf32>
    %434 = arith.addf %433, %28 : vector<16x32xf32>
    %c0_126 = arith.constant 0 : index
    %c0_127 = arith.constant 0 : index
    %435 = vector.load %arg14[%c0_126, %c0_127] : memref<1x32xf32, #tpu.memory_space<vmem>>, vector<1x32xf32>
    %436 = vector.shape_cast %435 : vector<1x32xf32> to vector<1x32xf32>
    %437 = vector.broadcast %436 : vector<1x32xf32> to vector<16x32xf32>
    %c0_128 = arith.constant 0 : index
    %c0_129 = arith.constant 0 : index
    %438 = vector.load %arg15[%c0_128, %c0_129] : memref<1x32xf32, #tpu.memory_space<vmem>>, vector<1x32xf32>
    %439 = vector.shape_cast %438 : vector<1x32xf32> to vector<1x32xf32>
    %440 = vector.broadcast %439 : vector<1x32xf32> to vector<16x32xf32>
    %cst_130 = arith.constant dense<0.000000e+00> : vector<16xf32>
    %441 = vector.multi_reduction <add>, %434, %cst_130 [1] : vector<16x32xf32> to vector<16xf32>
    %442 = vector.shape_cast %441 : vector<16xf32> to vector<16x1xf32>
    %443 = arith.mulf %434, %434 : vector<16x32xf32>
    %cst_131 = arith.constant dense<0.000000e+00> : vector<16xf32>
    %444 = vector.multi_reduction <add>, %443, %cst_131 [1] : vector<16x32xf32> to vector<16xf32>
    %445 = vector.shape_cast %444 : vector<16xf32> to vector<16x1xf32>
    %cst_132 = arith.constant 3.125000e-02 : f32
    %446 = vector.broadcast %cst_132 : f32 to vector<16x1xf32>
    %447 = arith.mulf %442, %446 : vector<16x1xf32>
    %cst_133 = arith.constant 3.125000e-02 : f32
    %448 = vector.broadcast %cst_133 : f32 to vector<16x1xf32>
    %449 = arith.mulf %445, %448 : vector<16x1xf32>
    %450 = arith.mulf %447, %447 : vector<16x1xf32>
    %451 = arith.subf %449, %450 : vector<16x1xf32>
    %452 = vector.broadcast %447 : vector<16x1xf32> to vector<16x32xf32>
    %453 = arith.subf %434, %452 : vector<16x32xf32>
    %cst_134 = arith.constant 9.99999974E-6 : f32
    %454 = vector.broadcast %cst_134 : f32 to vector<16x1xf32>
    %455 = arith.addf %451, %454 : vector<16x1xf32>
    %456 = math.rsqrt %455 : vector<16x1xf32>
    %457 = vector.broadcast %456 : vector<16x1xf32> to vector<16x32xf32>
    %458 = arith.mulf %453, %457 : vector<16x32xf32>
    %459 = arith.mulf %458, %437 : vector<16x32xf32>
    %460 = arith.addf %459, %440 : vector<16x32xf32>
    %c0_135 = arith.constant 0 : index
    %c0_136 = arith.constant 0 : index
    %461 = vector.load %arg16[%c0_135, %c0_136] : memref<16x32xf32, #tpu.memory_space<vmem>>, vector<16x32xf32>
    tpu.vector_store %arg16[%c0_135, %c0_136], %460 {strides = array<i32>} : memref<16x32xf32, #tpu.memory_space<vmem>>, vector<16x32xf32>,
    return
  }
  func.func @transform_0(%arg0: i32) -> (i32, i32) {
    %c0_i32 = arith.constant 0 : i32
    %c0_i32_0 = arith.constant 0 : i32
    %c0_i32_1 = arith.constant 0 : i32
    return %c0_i32, %c0_i32_0 : i32, i32
  }
  func.func @transform_1(%arg0: i32) -> (i32, i32) {
    %c0_i32 = arith.constant 0 : i32
    %c0_i32_0 = arith.constant 0 : i32
    %c0_i32_1 = arith.constant 0 : i32
    return %c0_i32, %c0_i32_0 : i32, i32
  }
  func.func @transform_2(%arg0: i32) -> (i32, i32) {
    %c0_i32 = arith.constant 0 : i32
    %c0_i32_0 = arith.constant 0 : i32
    %c0_i32_1 = arith.constant 0 : i32
    return %c0_i32, %c0_i32_0 : i32, i32
  }
  func.func @transform_3(%arg0: i32) -> (i32, i32) {
    %c0_i32 = arith.constant 0 : i32
    %c0_i32_0 = arith.constant 0 : i32
    %c0_i32_1 = arith.constant 0 : i32
    return %c0_i32, %c0_i32_0 : i32, i32
  }
  func.func @transform_4(%arg0: i32) -> (i32, i32) {
    %c0_i32 = arith.constant 0 : i32
    %c0_i32_0 = arith.constant 0 : i32
    %c0_i32_1 = arith.constant 0 : i32
    return %c0_i32, %c0_i32_0 : i32, i32
  }
  func.func @transform_5(%arg0: i32) -> (i32, i32) {
    %c0_i32 = arith.constant 0 : i32
    %c0_i32_0 = arith.constant 0 : i32
    %c0_i32_1 = arith.constant 0 : i32
    return %c0_i32, %c0_i32_0 : i32, i32
  }
  func.func @transform_6(%arg0: i32) -> (i32, i32) {
    %c0_i32 = arith.constant 0 : i32
    %c0_i32_0 = arith.constant 0 : i32
    %c0_i32_1 = arith.constant 0 : i32
    return %c0_i32, %c0_i32_0 : i32, i32
  }
  func.func @transform_7(%arg0: i32) -> (i32, i32) {
    %c0_i32 = arith.constant 0 : i32
    %c0_i32_0 = arith.constant 0 : i32
    %c0_i32_1 = arith.constant 0 : i32
    return %c0_i32, %c0_i32_0 : i32, i32
  }
  func.func @transform_8(%arg0: i32) -> (i32, i32) {
    %c0_i32 = arith.constant 0 : i32
    %c0_i32_0 = arith.constant 0 : i32
    %c0_i32_1 = arith.constant 0 : i32
    return %c0_i32, %c0_i32_0 : i32, i32
  }
  func.func @transform_9(%arg0: i32) -> (i32, i32) {
    %c0_i32 = arith.constant 0 : i32
    %c0_i32_0 = arith.constant 0 : i32
    %c0_i32_1 = arith.constant 0 : i32
    return %c0_i32, %c0_i32_0 : i32, i32
  }
  func.func @transform_10(%arg0: i32) -> (i32, i32) {
    %c0_i32 = arith.constant 0 : i32
    %c0_i32_0 = arith.constant 0 : i32
    %c0_i32_1 = arith.constant 0 : i32
    return %c0_i32, %c0_i32_0 : i32, i32
  }
  func.func @transform_11(%arg0: i32) -> (i32, i32) {
    %c0_i32 = arith.constant 0 : i32
    %c0_i32_0 = arith.constant 0 : i32
    %c0_i32_1 = arith.constant 0 : i32
    return %c0_i32, %c0_i32_0 : i32, i32
  }
  func.func @transform_12(%arg0: i32) -> (i32, i32) {
    %c0_i32 = arith.constant 0 : i32
    %c0_i32_0 = arith.constant 0 : i32
    %c0_i32_1 = arith.constant 0 : i32
    return %c0_i32, %c0_i32_0 : i32, i32
  }
  func.func @transform_13(%arg0: i32) -> (i32, i32) {
    %c0_i32 = arith.constant 0 : i32
    %c0_i32_0 = arith.constant 0 : i32
    %c0_i32_1 = arith.constant 0 : i32
    return %c0_i32, %c0_i32_0 : i32, i32
  }
  func.func @transform_14(%arg0: i32) -> (i32, i32) {
    %c0_i32 = arith.constant 0 : i32
    %c0_i32_0 = arith.constant 0 : i32
    %c0_i32_1 = arith.constant 0 : i32
    return %c0_i32, %c0_i32_0 : i32, i32
  }
  func.func @transform_15(%arg0: i32) -> (i32, i32) {
    %c0_i32 = arith.constant 0 : i32
    %c0_i32_0 = arith.constant 0 : i32
    %c0_i32_1 = arith.constant 0 : i32
    return %c0_i32, %c0_i32_0 : i32, i32
  }
}

</mosaic_0001>

<bundles_post_ra>
// kernel: tpu_custom_call.1
= control target key start
LH: loop header
LB: loop body
LE: loop exit
PB: predicated region body
PF: predicated region fallthrough
CT: control target
= control target key end

     0   :  { %20 = vsyncpa [#allocation3], 0  ;;  %s8085_s0 = inlined_call_operand.hbm [shape: f32[16,32], index: 0, kind: input, shape index: {}]   ;;  %s8086_s1 = inlined_call_operand.vmem [shape: f32[32,96], index: 1, kind: input, shape index: {}]   ;;  %s8087_s2 = inlined_call_operand.vmem [shape: f32[1,96], index: 2, kind: input, shape index: {}]   ;;  %s8088_s3 = inlined_call_operand.vmem [shape: f32[32,32], index: 3, kind: input, shape index: {}]   ;;  %s8089_s4 = inlined_call_operand.vmem [shape: f32[1,32], index: 4, kind: input, shape index: {}]   ;;  %s8090_s5 = inlined_call_operand.vmem [shape: f32[32,64], index: 5, kind: input, shape index: {}]   ;;  %s8091_s6 = inlined_call_operand.vmem [shape: f32[1,64], index: 6, kind: input, shape index: {}]   ;;  %s8092_s7 = inlined_call_operand.vmem [shape: f32[64,32], index: 7, kind: input, shape index: {}]   ;;  %s8093_s8 = inlined_call_operand.vmem [shape: f32[1,32], index: 8, kind: input, shape index: {}]   ;;  %s8094_s9 = inlined_call_operand.vmem [shape: f32[1,32], index: 9, kind: input, shape index: {}]   ;;  %s8095_s10 = inlined_call_operand.vmem [shape: f32[1,32], index: 10, kind: input, shape index: {}]   ;;  %s8096_s11 = inlined_call_operand.vmem [shape: f32[1,32], index: 11, kind: input, shape index: {}]   ;;  %s8097_s12 = inlined_call_operand.vmem [shape: f32[1,32], index: 12, kind: input, shape index: {}]   ;;  %s8098_s13 = inlined_call_operand.vmem [shape: f32[1,32], index: 13, kind: input, shape index: {}]   ;;  %s8099_s14 = inlined_call_operand.vmem [shape: f32[1,32], index: 14, kind: input, shape index: {}]   ;;  %s8100_s15 = inlined_call_operand.hbm [shape: f32[16,32], index: 15, kind: output, shape index: {}]  }
   0x1   :  { %21 = vsyncpa [#allocation4], 0  ;;  %s7072_s18 = smov [#allocation2]  }
   0x2   :  { %s27_s19 = sshll.u32 %s7072_s18, 4  ;;  %s28_s19 = int_to_ptr.vmem [resolvable:$true] %s27_s19 }
   0x3   :  { %s7036_s20 = scalar_lea.vmem %s28_s19, 256  ;;  %p7041_p1 = scmp.lt.s32.totalorder %s28_s19, %s28_s19 }
   0x4   :  { %p7037_p0 = scmp.ne.s32.totalorder %s28_s19, %s7036_s20  ;;  %p7042_p2 = scmp.lt.s32.totalorder %s7036_s20, %s7036_s20 }
   0x6   :  { %p7043_p3 = por %p7042_p2, %p7041_p1 }
   0x8   :  { %p7044_p4 = pnand %p7043_p3, %p7037_p0 }
   0xa   :  { %7047 = shalt.err (!%p7044_p4)
}
   0xb   :  { %s8101_s21 = smov 128   ;;  %s8102_s22 = smov 8  }
   0xc   :  { %33 = dma.hbm_to_vmem [thread:$0]  %s8085_s0, 256, %s28_s19, [#allocation3], %s8101_s21, %s8101_s21, %s8102_s22  }
   0xd   :  { %7068 = dma.done.wait [#allocation3], 256  }
   0xe   :  { %7069 = vsyncadd [#allocation3], 4294967040  ;;  %vm143_vm0 = vcmask 261120   ;;  %v7178_v0 = vld [vmem:[%s8086_s1 + $0x18] sm:$0xff]  ;;  %v7183_v1 = vld [vmem:[%s8086_s1 + $0x10] sm:$0xff]  ;;  %v7075_v6 = vmov 0.0  }
   0xf   :  { %6436 = vmatprep.subr.mxu0 %v7178_v0  ;;  %v7186_v2 = vld [vmem:[#allocation2] sm:$0xff]  ;;  %v7192_v3 = vld [vmem:[%s8086_s1 + $0x8] sm:$0xff]  ;;  %6452 = vmatprep.subr.mxu1 %v7075_v6  ;;  %vm7076_vm1 = vmmov 0   ;;  %s7077_s19 = smov 96   ;;  %vm228_vm2 = vcmask 64512   ;;  %s7078_s20 = smov 64  }
  0x10   :  { %6437 = vmatpush3.msra.mxu0 %v7178_v0  ;;  %6444 = vmatprep.mubr.msk.f32.mxu0 %vm143_vm0, %v7186_v2  ;;  %v7201_v4 = vld [vmem:[%s8086_s1] sm:$0xff]  ;;  %v7205_v5 = vld [vmem:[#allocation2 + $0x8] sm:$0xff]  ;;  %s7079_s23 = smov 120   ;;  %s7080_s24 = smov 88   ;;  %vm1995_vm3 = vcmask 523264  }
  0x11   :  { %6438 = vmatprep.subr.mxu0 %v7183_v1  ;;  %6454 = vmatprep.mubr.msk.f32.mxu1 %vm7076_vm1, %v7075_v6  ;;  %v7220_v8 = vld [vmem:[%s8087_s2] ss:$0 sm:$0xff]  ;;  %s7081_s27 = smov 56   ;;  %s7082_s28 = smov 112  }
  0x12   :  { %6439 = vmatpush3.msra.mxu0 %v7183_v1  ;;  %v7273_v40 = vld [vmem:[%s8088_s3] sm:$0xff]  ;;  %s7083_s0 = smov 80   ;;  %s7084_s18 = smov 48  }
  0x13   :  { %6440 = vmatprep.subr.mxu0 %v7192_v3  ;;  %s7085_s25 = smov 72   ;;  %s8105_s26 = smov 104  }
  0x14   :  { %6441 = vmatpush3.msra.mxu0 %v7192_v3  ;;  %s8103_s16 = smov 40   ;;  %s8107_s30 = smov 40  }
  0x15   :  { %6442 = vmatprep.subr.mxu0 %v7201_v4 }
  0x16   :  { %6443 = vmatpush3.msra.mxu0 %v7201_v4 }
  0x17   :  { %6445 = vmatmul.mubr.msk.f32.vlgmr.msra.gmra.mxu0 %vm143_vm0, %v7205_v5  ;;  %6447 = vmatprep.subr.mxu0 %v7075_v6 }
  0x18   :  { %6449 = vmatprep.mubr.msk.f32.mxu0 %vm7076_vm1, %v7075_v6 }
  0xd7   :  { %v6446_v7 = vpop.f32.mrf.mxu0 }
  0xd8   :  { %v7228_v11 = vadd.f32 %v6446_v7, %v7220_v8 }
  0xd9   :  { %v216_v9 = vpop.f32.mrf.mxu0 }
  0xda   :  { %v7223_v10 = vadd.f32 %v7220_v8, %v216_v9 }
  0xdc   :  { %226 = vrot.lane.b32.xlu0 %v7223_v10, %s7077_s19 }
  0xe0   :  { %304 = vrot.lane.b32.xlu0 %v7228_v11, %s7077_s19 }
 0x14e   :  { %v227_v12 = vpop.permute.xlu0 %226 }
 0x14f   :  { %6448 = vmatpush3.xpose.msk.msra.mxu0 %vm228_vm2, %v227_v12 }
 0x150   :  { %6457 = vmatprep.subr.mxu0 %v7075_v6 }
 0x152   :  { %6450 = vmatmul.mubr.msk.f32.vlgmr.msra.gmra.mxu0 %vm228_vm2, %v7223_v10  ;;  %v305_v13 = vpop.permute.xlu0 %304 }
 0x153   :  { %6453 = vmatpush3.xpose.msk.msra.mxu1 %vm228_vm2, %v305_v13  ;;  %6459 = vmatprep.mubr.msk.f32.mxu0 %vm7076_vm1, %v7075_v6 }
 0x154   :  { %6462 = vmatprep.subr.mxu1 %v7075_v6 }
 0x156   :  { %6455 = vmatmul.mubr.msk.f32.vlgmr.msra.gmra.mxu1 %vm228_vm2, %v7228_v11 }
 0x157   :  { %6464 = vmatprep.mubr.msk.f32.mxu1 %vm7076_vm1, %v7075_v6 }
 0x212   :  { %v299_v14 = vpop.f32.mrf.mxu0 }
 0x213   :  { %v380_v15 = vsel %vm228_vm2, %v299_v14, -inf }
 0x214   :  { %381 = vmax.xlane.f32.xlu1 %v380_v15  ;;  %v6451_v16 = vpop.f32.mrf.mxu0 }
 0x216   :  { %v376_v17 = vpop.f32.mrf.mxu1 }
 0x217   :  { %v383_v18 = vsel %vm228_vm2, %v376_v17, -inf }
 0x218   :  { %384 = vmax.xlane.f32.xlu1 %v383_v18  ;;  %v6456_v19 = vpop.f32.mrf.mxu1 }
 0x29d   :  { %v382_v20 = vpop.xlane.xlu1 %381 }
 0x29e   :  { %v386_v21 = vsub.f32 %v299_v14, %v382_v20 }
 0x2a0   :  { %v388_v22 = vmul.f32 1.442695, %v386_v21  ;;  %v7320_v21 = vld [vmem:[%s8088_s3 + $0x8] sm:$0xff] }
 0x2a1   :  { %v385_v23 = vpop.xlane.xlu1 %384 }
 0x2a2   :  { %6876 = vpow2.f32 %v388_v22  ;;  %v387_v24 = vsub.f32 %v376_v17, %v385_v23 }
 0x2a4   :  { %v390_v25 = vmul.f32 1.442695, %v387_v24 }
 0x2a6   :  { %6878 = vpow2.f32 %v390_v25 }
 0x2af   :  { %v6877_v26 = vpop.eup %6876 }
 0x2b0   :  { %v392_v27 = vsel %vm228_vm2, %v6877_v26, 0.0 }
 0x2b1   :  { %393 = vadd.xlane.f32.xlu0 %v392_v27 }
 0x2b3   :  { %v6879_v28 = vpop.eup %6878 }
 0x2b4   :  { %v395_v29 = vsel %vm228_vm2, %v6879_v28, 0.0 }
 0x2b5   :  { %396 = vadd.xlane.f32.xlu1 %v395_v29 }
 0x2c6   :  { %402 = vrot.lane.b32.xlu1 %v7223_v10, %s7078_s20 }
 0x2c7   :  { %637 = vrot.lane.b32.xlu0 %v7223_v10, %s7079_s23 }
 0x2ca   :  { %478 = vrot.lane.b32.xlu1 %v7228_v11, %s7078_s20 }
 0x2ce   :  { %639 = vrot.lane.b32.xlu1 %v7223_v10, %s7080_s24 }
 0x2d2   :  { %717 = vrot.lane.b32.xlu1 %v7228_v11, %s7080_s24 }
 0x2d6   :  { %715 = vrot.lane.b32.xlu1 %v7228_v11, %s7079_s23 }
 0x33a   :  { %v394_v30 = vpop.xlane.xlu0 %393 }
 0x33b   :  { %6880 = vrcp.f32 %v394_v30 }
 0x33e   :  { %v397_v31 = vpop.xlane.xlu1 %396  ;;  %v638_v39 = vpop.permute.xlu0 %637 }
 0x33f   :  { %6882 = vrcp.f32 %v397_v31 }
 0x342   :  { %v403_v32 = vpop.permute.xlu1 %402 }
 0x343   :  { %6458 = vmatpush3.msra.mxu0 %v403_v32 }
 0x344   :  { %6467 = vmatprep.subr.mxu0 %v7273_v40 }
 0x346   :  { %v479_v33 = vpop.permute.xlu1 %478 }
 0x347   :  { %6463 = vmatpush3.msra.mxu1 %v479_v33 }
 0x348   :  { %v6881_v34 = vpop.eup %6880  ;;  %6472 = vmatprep.subr.mxu1 %v7075_v6 }
 0x349   :  { %v400_v35 = vmul.f32 %v6881_v34, %v6877_v26 }
 0x34a   :  { %v640_v38 = vpop.permute.xlu1 %639 }
 0x34b   :  { %6460 = vmatmul.mubr.msk.f32.vlgmr.msra.gmra.mxu0 %vm228_vm2, %v400_v35 }
 0x34c   :  { %v6883_v36 = vpop.eup %6882  ;;  %6468 = vmatpush3.msra.mxu0 %v7273_v40 }
 0x34d   :  { %v401_v37 = vmul.f32 %v6883_v36, %v6879_v28  ;;  %6477 = vmatprep.subr.mxu0 %v7075_v6  ;;  %v7339_v36 = vld [vmem:[%s8089_s4] ss:$0 sm:$0xff] }
 0x34e   :  { %v718_v42 = vpop.permute.xlu1 %717 }
 0x34f   :  { %6465 = vmatmul.mubr.msk.f32.vlgmr.msra.gmra.mxu1 %vm228_vm2, %v401_v37 }
 0x350   :  { %6473 = vmatpush3.xpose.msk.msra.mxu1 %vm228_vm2, %v640_v38  ;;  %6474 = vmatprep.mubr.msk.f32.mxu1 %vm7076_vm1, %v7075_v6 }
 0x351   :  { %6482 = vmatprep.subr.mxu1 %v7075_v6 }
 0x352   :  { %v716_v46 = vpop.permute.xlu1 %715 }
 0x353   :  { %6475 = vmatmul.mubr.msk.f32.vlgmr.msra.gmra.mxu1 %vm228_vm2, %v638_v39 }
 0x354   :  { %6484 = vmatprep.mubr.msk.f32.mxu1 %vm7076_vm1, %v7075_v6 }
 0x40b   :  { %v474_v41 = vpop.f32.mrf.mxu0 }
 0x40c   :  { %6469 = vmatprep.mubr.msk.f32.mxu0 %vm228_vm2, %v474_v41 }
 0x40d   :  { %v6461_v43 = vpop.f32.mrf.mxu0 }
 0x40f   :  { %v550_v44 = vpop.f32.mrf.mxu1 }
 0x410   :  { %6470 = vmatmul.mubr.msk.f32.vlgmr.msra.gmra.mxu0 %vm228_vm2, %v550_v44 }
 0x411   :  { %6478 = vmatpush3.xpose.msk.msra.mxu0 %vm228_vm2, %v718_v42  ;;  %v6466_v45 = vpop.f32.mrf.mxu1  ;;  %6479 = vmatprep.mubr.msk.f32.mxu0 %vm7076_vm1, %v7075_v6 }
 0x412   :  { %6487 = vmatprep.subr.mxu0 %v7075_v6 }
 0x413   :  { %v711_v47 = vpop.f32.mrf.mxu1 }
 0x414   :  { %6480 = vmatmul.mubr.msk.f32.vlgmr.msra.gmra.mxu0 %vm228_vm2, %v716_v46  ;;  %v793_v48 = vsel %vm228_vm2, %v711_v47, -inf }
 0x415   :  { %794 = vmax.xlane.f32.xlu1 %v793_v48  ;;  %v6476_v49 = vpop.f32.mrf.mxu1  ;;  %6489 = vmatprep.mubr.msk.f32.mxu0 %vm7076_vm1, %v7075_v6 }
 0x49e   :  { %v795_v50 = vpop.xlane.xlu1 %794 }
 0x49f   :  { %v799_v51 = vsub.f32 %v711_v47, %v795_v50 }
 0x4a1   :  { %v801_v52 = vmul.f32 1.442695, %v799_v51 }
 0x4a3   :  { %6884 = vpow2.f32 %v801_v52 }
 0x4b0   :  { %v6885_v53 = vpop.eup %6884 }
 0x4b1   :  { %v805_v54 = vsel %vm228_vm2, %v6885_v53, 0.0 }
 0x4b2   :  { %806 = vadd.xlane.f32.xlu1 %v805_v54 }
 0x4d0   :  { %v7289_v55 = vpop.f32.mrf.mxu0 }
 0x4d1   :  { %v636_v37 = vadd.f32 %v7289_v55, %v7339_v36 }
 0x4d2   :  { %v7291_v56 = vpop.f32.mrf.mxu0 }
 0x4d3   :  { %v635_v39 = vadd.f32 %v7339_v36, %v7291_v56  ;;  %v7367_v56 = vld [vmem:[%s8088_s3 + $0x10] sm:$0xff] }
 0x4d4   :  { %v789_v57 = vpop.f32.mrf.mxu0 }
 0x4d5   :  { %v796_v58 = vsel %vm228_vm2, %v789_v57, -inf }
 0x4d6   :  { %797 = vmax.xlane.f32.xlu0 %v796_v58  ;;  %v6481_v59 = vpop.f32.mrf.mxu0 }
 0x4ec   :  { %891 = vrot.lane.b32.xlu0 %v7228_v11, %s7081_s27 }
 0x4f0   :  { %1050 = vrot.lane.b32.xlu0 %v7223_v10, %s7082_s28 }
 0x53b   :  { %v807_v12 = vpop.xlane.xlu1 %806 }
 0x55f   :  { %v798_v60 = vpop.xlane.xlu0 %797 }
 0x560   :  { %v800_v61 = vsub.f32 %v789_v57, %v798_v60 }
 0x562   :  { %v803_v62 = vmul.f32 1.442695, %v800_v61 }
 0x563   :  { %v892_v63 = vpop.permute.xlu0 %891 }
 0x564   :  { %6886 = vpow2.f32 %v803_v62  ;;  %6488 = vmatpush3.msra.mxu0 %v892_v63 }
 0x565   :  { %6497 = vmatprep.subr.mxu0 %v7075_v6  ;;  %6888 = vrcp.f32 %v807_v12 }
 0x567   :  { %v1051_v20 = vpop.permute.xlu0 %1050 }
 0x571   :  { %v6887_v7 = vpop.eup %6886 }
 0x572   :  { %v808_v9 = vsel %vm228_vm2, %v6887_v7, 0.0  ;;  %v6889_v14 = vpop.eup %6888 }
 0x573   :  { %809 = vadd.xlane.f32.xlu1 %v808_v9  ;;  %v813_v16 = vmul.f32 %v6889_v14, %v6885_v53 }
 0x584   :  { %815 = vrot.lane.b32.xlu1 %v7223_v10, %s7081_s27 }
 0x588   :  { %1052 = vrot.lane.b32.xlu1 %v7223_v10, %s7083_s0 }
 0x58c   :  { %1130 = vrot.lane.b32.xlu1 %v7228_v11, %s7083_s0 }
 0x590   :  { %1128 = vrot.lane.b32.xlu1 %v7228_v11, %s7082_s28 }
 0x5fc   :  { %v810_v13 = vpop.xlane.xlu1 %809 }
 0x5fd   :  { %6890 = vrcp.f32 %v810_v13 }
 0x600   :  { %v816_v15 = vpop.permute.xlu1 %815 }
 0x601   :  { %6483 = vmatpush3.msra.mxu1 %v816_v15 }
 0x602   :  { %6485 = vmatmul.mubr.msk.f32.vlgmr.msra.gmra.mxu1 %vm228_vm2, %v813_v16  ;;  %6492 = vmatprep.subr.mxu1 %v7320_v21 }
 0x603   :  { %6493 = vmatpush3.msra.mxu1 %v7320_v21 }
 0x604   :  { %v1053_v19 = vpop.permute.xlu1 %1052  ;;  %6502 = vmatprep.subr.mxu1 %v7075_v6 }
 0x608   :  { %v1131_v24 = vpop.permute.xlu1 %1130 }
 0x60a   :  { %v6891_v17 = vpop.eup %6890 }
 0x60b   :  { %v814_v18 = vmul.f32 %v6891_v17, %v6887_v7 }
 0x60c   :  { %v1129_v27 = vpop.permute.xlu1 %1128 }
 0x60d   :  { %6490 = vmatmul.mubr.msk.f32.vlgmr.msra.gmra.mxu0 %vm228_vm2, %v814_v18 }
 0x60e   :  { %6498 = vmatpush3.xpose.msk.msra.mxu0 %vm228_vm2, %v1053_v19  ;;  %6499 = vmatprep.mubr.msk.f32.mxu0 %vm7076_vm1, %v7075_v6 }
 0x60f   :  { %6507 = vmatprep.subr.mxu0 %v7075_v6 }
 0x611   :  { %6500 = vmatmul.mubr.msk.f32.vlgmr.msra.gmra.mxu0 %vm228_vm2, %v1051_v20 }
 0x612   :  { %6509 = vmatprep.mubr.msk.f32.mxu0 %vm7076_vm1, %v7075_v6 }
 0x6c2   :  { %v887_v22 = vpop.f32.mrf.mxu1 }
 0x6c3   :  { %6494 = vmatprep.mubr.msk.f32.mxu1 %vm228_vm2, %v887_v22 }
 0x6c4   :  { %v6486_v23 = vpop.f32.mrf.mxu1 }
 0x6cd   :  { %v963_v25 = vpop.f32.mrf.mxu0 }
 0x6ce   :  { %6495 = vmatmul.mubr.msk.f32.vlgmr.msra.gmra.mxu1 %vm228_vm2, %v963_v25 }
 0x6cf   :  { %6503 = vmatpush3.xpose.msk.msra.mxu1 %vm228_vm2, %v1131_v24  ;;  %v6491_v26 = vpop.f32.mrf.mxu0  ;;  %6504 = vmatprep.mubr.msk.f32.mxu1 %vm7076_vm1, %v7075_v6 }
 0x6d0   :  { %6512 = vmatprep.subr.mxu1 %v7075_v6 }
 0x6d1   :  { %v1124_v28 = vpop.f32.mrf.mxu0 }
 0x6d2   :  { %6505 = vmatmul.mubr.msk.f32.vlgmr.msra.gmra.mxu1 %vm228_vm2, %v1129_v27  ;;  %v1206_v29 = vsel %vm228_vm2, %v1124_v28, -inf }
 0x6d3   :  { %1207 = vmax.xlane.f32.xlu0 %v1206_v29  ;;  %v6501_v30 = vpop.f32.mrf.mxu0  ;;  %6514 = vmatprep.mubr.msk.f32.mxu1 %vm7076_vm1, %v7075_v6 }
 0x75c   :  { %v1208_v31 = vpop.xlane.xlu0 %1207 }
 0x75d   :  { %v1212_v32 = vsub.f32 %v1124_v28, %v1208_v31 }
 0x75f   :  { %v1214_v33 = vmul.f32 1.442695, %v1212_v32 }
 0x761   :  { %6892 = vpow2.f32 %v1214_v33 }
 0x76e   :  { %v6893_v34 = vpop.eup %6892 }
 0x76f   :  { %v1218_v35 = vsel %vm228_vm2, %v6893_v34, 0.0 }
 0x770   :  { %1219 = vadd.xlane.f32.xlu0 %v1218_v35 }
 0x78e   :  { %v6496_v38 = vpop.f32.mrf.mxu1 }
 0x78f   :  { %v7345_v41 = vadd.f32 %v6496_v38, %v636_v37 }
 0x790   :  { %v1039_v42 = vpop.f32.mrf.mxu1 }
 0x791   :  { %v7347_v43 = vadd.f32 %v1039_v42, %v635_v39 }
 0x792   :  { %v1202_v44 = vpop.f32.mrf.mxu1 }
 0x793   :  { %v1209_v45 = vsel %vm228_vm2, %v1202_v44, -inf }
 0x794   :  { %1210 = vmax.xlane.f32.xlu1 %v1209_v45  ;;  %v6506_v46 = vpop.f32.mrf.mxu1 }
 0x7a5   :  { %1228 = vrot.lane.b32.xlu1 %v7223_v10, %s7084_s18 }
 0x7a9   :  { %1465 = vrot.lane.b32.xlu1 %v7223_v10, %s7085_s25 }
 0x7ad   :  { %1543 = vrot.lane.b32.xlu1 %v7228_v11, %s7085_s25 }
 0x7b1   :  { %1541 = vrot.lane.b32.xlu1 %v7228_v11, %s8105_s26 }
 0x7f9   :  { %v1220_v47 = vpop.xlane.xlu0 %1219 }
 0x7fa   :  { %6894 = vrcp.f32 %v1220_v47 }
 0x807   :  { %v6895_v49 = vpop.eup %6894 }
 0x808   :  { %v1226_v53 = vmul.f32 %v6895_v49, %v6893_v34 }
 0x81d   :  { %v1211_v48 = vpop.xlane.xlu1 %1210 }
 0x81e   :  { %v1213_v50 = vsub.f32 %v1202_v44, %v1211_v48 }
 0x820   :  { %v1216_v51 = vmul.f32 1.442695, %v1213_v50 }
 0x821   :  { %v1229_v52 = vpop.permute.xlu1 %1228 }
 0x822   :  { %6896 = vpow2.f32 %v1216_v51  ;;  %6508 = vmatpush3.msra.mxu0 %v1229_v52 }
 0x823   :  { %6510 = vmatmul.mubr.msk.f32.vlgmr.msra.gmra.mxu0 %vm228_vm2, %v1226_v53  ;;  %6517 = vmatprep.subr.mxu0 %v7367_v56 }
 0x824   :  { %6518 = vmatpush3.msra.mxu0 %v7367_v56 }
 0x825   :  { %6527 = vmatprep.subr.mxu0 %v7075_v6  ;;  %v1466_v61 = vpop.permute.xlu1 %1465 }
 0x829   :  { %v1544_v9 = vpop.permute.xlu1 %1543 }
 0x82d   :  { %v1542_v14 = vpop.permute.xlu1 %1541 }
 0x82f   :  { %v6897_v54 = vpop.eup %6896 }
 0x830   :  { %v1221_v55 = vsel %vm228_vm2, %v6897_v54, 0.0 }
 0x831   :  { %1222 = vadd.xlane.f32.xlu0 %v1221_v55 }
 0x847   :  { %1304 = vrot.lane.b32.xlu0 %v7228_v11, %s7084_s18 }
 0x84b   :  { %1463 = vrot.lane.b32.xlu0 %v7223_v10, %s8105_s26 }
 0x8ba   :  { %v1223_v57 = vpop.xlane.xlu0 %1222 }
 0x8bb   :  { %6898 = vrcp.f32 %v1223_v57 }
 0x8be   :  { %v1305_v58 = vpop.permute.xlu0 %1304 }
 0x8bf   :  { %6513 = vmatpush3.msra.mxu1 %v1305_v58 }
 0x8c0   :  { %6522 = vmatprep.subr.mxu1 %v7075_v6 }
 0x8c2   :  { %v1464_v62 = vpop.permute.xlu0 %1463 }
 0x8c8   :  { %v6899_v59 = vpop.eup %6898 }
 0x8c9   :  { %v1227_v60 = vmul.f32 %v6899_v59, %v6897_v54 }
 0x8cb   :  { %6515 = vmatmul.mubr.msk.f32.vlgmr.msra.gmra.mxu1 %vm228_vm2, %v1227_v60 }
 0x8cc   :  { %6523 = vmatpush3.xpose.msk.msra.mxu1 %vm228_vm2, %v1466_v61  ;;  %6524 = vmatprep.mubr.msk.f32.mxu1 %vm7076_vm1, %v7075_v6 }
 0x8cd   :  { %6532 = vmatprep.subr.mxu1 %v7075_v6 }
 0x8cf   :  { %6525 = vmatmul.mubr.msk.f32.vlgmr.msra.gmra.mxu1 %vm228_vm2, %v1464_v62  ;;  %v7432_v62 = vld [vmem:[%s8090_s5 + $0x8] sm:$0xff] }
 0x8d0   :  { %6534 = vmatprep.mubr.msk.f32.mxu1 %vm7076_vm1, %v7075_v6 }
 0x8e3   :  { %v1300_v63 = vpop.f32.mrf.mxu0 }
 0x8e4   :  { %6519 = vmatprep.mubr.msk.f32.mxu0 %vm228_vm2, %v1300_v63  ;;  %v7439_v63 = vld [vmem:[%s8090_s5] sm:$0xff] }
 0x8e5   :  { %v6511_v7 = vpop.f32.mrf.mxu0 }
 0x8e6   :  { %v7449_v7 = vld [vmem:[%s8092_s7 + $0x38] sm:$0xff] }
 0x98b   :  { %v1376_v12 = vpop.f32.mrf.mxu1 }
 0x98c   :  { %6520 = vmatmul.mubr.msk.f32.vlgmr.msra.gmra.mxu0 %vm228_vm2, %v1376_v12  ;;  %v7461_v12 = vld [vmem:[%s8092_s7 + $0x28] sm:$0xff] }
 0x98d   :  { %6528 = vmatpush3.xpose.msk.msra.mxu0 %vm228_vm2, %v1544_v9  ;;  %v6516_v13 = vpop.f32.mrf.mxu1  ;;  %6529 = vmatprep.mubr.msk.f32.mxu0 %vm7076_vm1, %v7075_v6  ;;  %v7454_v9 = vld [vmem:[%s8092_s7 + $0x30] sm:$0xff] }
 0x98e   :  { %6537 = vmatprep.subr.mxu0 %v7075_v6  ;;  %v7468_v13 = vld [vmem:[%s8092_s7 + $0x20] sm:$0xff] }
 0x98f   :  { %v1537_v15 = vpop.f32.mrf.mxu1 }
 0x990   :  { %6530 = vmatmul.mubr.msk.f32.vlgmr.msra.gmra.mxu0 %vm228_vm2, %v1542_v14  ;;  %v1619_v16 = vsel %vm228_vm2, %v1537_v15, -inf }
 0x991   :  { %1620 = vmax.xlane.f32.xlu0 %v1619_v16  ;;  %v6526_v17 = vpop.f32.mrf.mxu1  ;;  %6539 = vmatprep.mubr.msk.f32.mxu0 %vm7076_vm1, %v7075_v6 }
 0xa1a   :  { %v1621_v18 = vpop.xlane.xlu0 %1620 }
 0xa1b   :  { %v1625_v19 = vsub.f32 %v1537_v15, %v1621_v18 }
 0xa1d   :  { %v1627_v20 = vmul.f32 1.442695, %v1625_v19 }
 0xa1f   :  { %6900 = vpow2.f32 %v1627_v20 }
 0xa2c   :  { %v6901_v22 = vpop.eup %6900 }
 0xa2d   :  { %v1631_v23 = vsel %vm228_vm2, %v6901_v22, 0.0 }
 0xa2e   :  { %1632 = vadd.xlane.f32.xlu0 %v1631_v23 }
 0xa4c   :  { %v6521_v24 = vpop.f32.mrf.mxu0 }
 0xa4d   :  { %v1462_v25 = vadd.f32 %v6521_v24, %v7345_v41 }
 0xa4e   :  { %v1452_v26 = vpop.f32.mrf.mxu0 }
 0xa4f   :  { %v1461_v27 = vadd.f32 %v1452_v26, %v7347_v43 }
 0xa50   :  { %v1615_v28 = vpop.f32.mrf.mxu0 }
 0xa51   :  { %v1622_v29 = vsel %vm228_vm2, %v1615_v28, -inf }
 0xa52   :  { %1623 = vmax.xlane.f32.xlu1 %v1622_v29  ;;  %v6531_v30 = vpop.f32.mrf.mxu0 }
 0xa63   :  { %1641 = vrot.lane.b32.xlu1 %v7223_v10, %s8103_s16  ;;  %v7404_v10 = vld [vmem:[%s8088_s3 + $0x18] sm:$0xff] }
 0xab7   :  { %v1633_v31 = vpop.xlane.xlu0 %1632 }
 0xab8   :  { %6902 = vrcp.f32 %v1633_v31 }
 0xac5   :  { %v6903_v33 = vpop.eup %6902 }
 0xac6   :  { %v1639_v38 = vmul.f32 %v6903_v33, %v6901_v22 }
 0xadb   :  { %v1624_v32 = vpop.xlane.xlu1 %1623 }
 0xadc   :  { %v1626_v34 = vsub.f32 %v1615_v28, %v1624_v32  ;;  %v7477_v32 = vld [vmem:[%s8094_s9] ss:$0 sm:$0xff] }
 0xade   :  { %v1629_v35 = vmul.f32 1.442695, %v1626_v34 }
 0xadf   :  { %v1642_v37 = vpop.permute.xlu1 %1641 }
 0xae0   :  { %6904 = vpow2.f32 %v1629_v35  ;;  %6533 = vmatpush3.msra.mxu1 %v1642_v37 }
 0xae1   :  { %6535 = vmatmul.mubr.msk.f32.vlgmr.msra.gmra.mxu1 %vm228_vm2, %v1639_v38  ;;  %6542 = vmatprep.subr.mxu1 %v7404_v10  ;;  %v7483_v38 = vld [vmem:[%s8095_s10] ss:$0 sm:$0xff] }
 0xae2   :  { %6543 = vmatpush3.msra.mxu1 %v7404_v10 }
 0xae3   :  { %6558 = vmatprep.subr.mxu1 %v7449_v7 }
 0xaed   :  { %v6905_v39 = vpop.eup %6904 }
 0xaee   :  { %v1634_v41 = vsel %vm228_vm2, %v6905_v39, 0.0 }
 0xaef   :  { %1635 = vadd.xlane.f32.xlu0 %v1634_v41 }
 0xb05   :  { %1717 = vrot.lane.b32.xlu0 %v7228_v11, %s8103_s16 }
 0xb78   :  { %v1636_v42 = vpop.xlane.xlu0 %1635 }
 0xb79   :  { %6906 = vrcp.f32 %v1636_v42 }
 0xb7c   :  { %v1718_v43 = vpop.permute.xlu0 %1717 }
 0xb7d   :  { %6538 = vmatpush3.msra.mxu0 %v1718_v43  ;;  %v7501_v43 = vld [vmem:[%s8092_s7 + $0x18] sm:$0xff] }
 0xb86   :  { %v6907_v44 = vpop.eup %6906 }
 0xb87   :  { %v1640_v45 = vmul.f32 %v6907_v44, %v6905_v39 }
 0xb89   :  { %6540 = vmatmul.mubr.msk.f32.vlgmr.msra.gmra.mxu0 %vm228_vm2, %v1640_v45 }
 0xba1   :  { %v1713_v46 = vpop.f32.mrf.mxu1 }
 0xba2   :  { %6544 = vmatprep.mubr.msk.f32.mxu1 %vm228_vm2, %v1713_v46 }
 0xba3   :  { %v6536_v11 = vpop.f32.mrf.mxu1 }
 0xc49   :  { %v1789_v47 = vpop.f32.mrf.mxu0 }
 0xc4a   :  { %6545 = vmatmul.mubr.msk.f32.vlgmr.msra.gmra.mxu1 %vm228_vm2, %v1789_v47 }
 0xc4b   :  { %v6541_v48 = vpop.f32.mrf.mxu0  ;;  %6559 = vmatpush3.msra.mxu1 %v7449_v7 }
 0xc4c   :  { %6560 = vmatprep.subr.mxu1 %v7454_v9 }
 0xc4d   :  { %6561 = vmatpush3.msra.mxu1 %v7454_v9 }
 0xc4e   :  { %6562 = vmatprep.subr.mxu1 %v7461_v12 }
 0xc4f   :  { %6563 = vmatpush3.msra.mxu1 %v7461_v12 }
 0xc50   :  { %6564 = vmatprep.subr.mxu1 %v7468_v13 }
 0xc51   :  { %6565 = vmatpush3.msra.mxu1 %v7468_v13 }
 0xc52   :  { %6566 = vmatprep.subr.mxu1 %v7501_v43 }
 0xc53   :  { %6567 = vmatpush3.msra.mxu1 %v7501_v43 }
 0xd0a   :  { %v6546_v49 = vpop.f32.mrf.mxu1 }
 0xd0b   :  { %v1875_v50 = vadd.f32 %v6546_v49, %v1462_v25  ;;  %v7541_v49 = vld [vmem:[%s8093_s8] ss:$0 sm:$0xff] }
 0xd0c   :  { %v1865_v51 = vpop.f32.mrf.mxu1 }
 0xd0d   :  { %v1877_v52 = vadd.f32 %v1875_v50, %v7205_v5  ;;  %v1874_v53 = vadd.f32 %v1865_v51, %v1461_v27  ;;  %v7420_v5 = vld [vmem:[%s8090_s5 + $0x18] sm:$0xff] }
 0xd0e   :  { %6547 = vmatprep.subr.mxu0 %v7420_v5 }
 0xd0f   :  { %v1876_v54 = vadd.f32 %v1874_v53, %v7186_v2  ;;  %v1881_v55 = vsel %vm143_vm0, %v1877_v52, 0.0  ;;  %v1885_v57 = vmul.f32 %v1877_v52, %v1877_v52  ;;  %v7425_v2 = vld [vmem:[%s8090_s5 + $0x10] sm:$0xff]  ;;  %6548 = vmatpush3.msra.mxu0 %v7420_v5 }
 0xd10   :  { %1882 = vadd.xlane.f32.xlu0 %v1881_v55  ;;  %6549 = vmatprep.subr.mxu0 %v7425_v2 }
 0xd11   :  { %v1878_v58 = vsel %vm143_vm0, %v1876_v54, 0.0  ;;  %v1884_v59 = vmul.f32 %v1876_v54, %v1876_v54  ;;  %v1889_v60 = vsel %vm143_vm0, %v1885_v57, 0.0  ;;  %6550 = vmatpush3.msra.mxu0 %v7425_v2 }
 0xd12   :  { %1879 = vadd.xlane.f32.xlu1 %v1878_v58  ;;  %6551 = vmatprep.subr.mxu0 %v7432_v62 }
 0xd13   :  { %v1886_v61 = vsel %vm143_vm0, %v1884_v59, 0.0  ;;  %6552 = vmatpush3.msra.mxu0 %v7432_v62 }
 0xd14   :  { %1890 = vadd.xlane.f32.xlu0 %v1889_v60  ;;  %6553 = vmatprep.subr.mxu0 %v7439_v63 }
 0xd15   :  { %6554 = vmatpush3.msra.mxu0 %v7439_v63 }
 0xd16   :  { %1887 = vadd.xlane.f32.xlu1 %v1886_v61  ;;  %6577 = vmatprep.subr.mxu0 %v7178_v0 }
 0xd99   :  { %v1883_v14 = vpop.xlane.xlu0 %1882 }
 0xd9a   :  { %v1893_v15 = vmul.f32 0.03125, %v1883_v14 }
 0xd9b   :  { %v1880_v16 = vpop.xlane.xlu1 %1879 }
 0xd9c   :  { %v1892_v17 = vmul.f32 0.03125, %v1880_v16  ;;  %v1897_v19 = vmul.f32 %v1893_v15, %v1893_v15  ;;  %v1901_v29 = vsub.f32 %v1877_v52, %v1893_v15 }
 0xd9d   :  { %v1891_v18 = vpop.xlane.xlu0 %1890 }
 0xd9e   :  { %v1895_v20 = vmul.f32 0.03125, %v1891_v18  ;;  %v1896_v23 = vmul.f32 %v1892_v17, %v1892_v17  ;;  %v1900_v31 = vsub.f32 %v1876_v54, %v1892_v17 }
 0xd9f   :  { %v1888_v22 = vpop.xlane.xlu1 %1887 }
 0xda0   :  { %v1899_v24 = vsub.f32 %v1895_v20, %v1897_v19  ;;  %v1894_v25 = vmul.f32 0.03125, %v1888_v22 }
 0xda2   :  { %v1903_v26 = vadd.f32 1e-05, %v1899_v24  ;;  %v1898_v27 = vsub.f32 %v1894_v25, %v1896_v23 }
 0xda4   :  { %6908 = vrsqrt.f32 %v1903_v26  ;;  %v1902_v28 = vadd.f32 1e-05, %v1898_v27 }
 0xda6   :  { %6910 = vrsqrt.f32 %v1902_v28 }
 0xdb1   :  { %v6909_v30 = vpop.eup %6908 }
 0xdb2   :  { %v1907_v33 = vmul.f32 %v6909_v30, %v1901_v29 }
 0xdb3   :  { %v6911_v34 = vpop.eup %6910 }
 0xdb4   :  { %v1906_v35 = vmul.f32 %v6911_v34, %v1900_v31  ;;  %v1909_v37 = vmul.f32 %v7477_v32, %v1907_v33  ;;  %v7552_v34 = vld [vmem:[%s8096_s11] ss:$0 sm:$0xff] }
 0xdb6   :  { %v1908_v39 = vmul.f32 %v7477_v32, %v1906_v35  ;;  %v1911_v42 = vadd.f32 %v7483_v38, %v1909_v37 }
 0xdb8   :  { %v1910_v41 = vadd.f32 %v7483_v38, %v1908_v39 }
 0xdba   :  { %6555 = vmatprep.mubr.msk.f32.mxu0 %vm143_vm0, %v1910_v41 }
 0xdbb   :  { %6556 = vmatmul.mubr.msk.f32.vlgmr.msra.gmra.mxu0 %vm143_vm0, %v1911_v42 }
 0xdbc   :  { %6578 = vmatpush3.msra.mxu0 %v7178_v0  ;;  %v7508_v0 = vld [vmem:[%s8092_s7 + $0x10] sm:$0xff] }
 0xdbd   :  { %6579 = vmatprep.subr.mxu0 %v7183_v1  ;;  %6568 = vmatprep.subr.mxu1 %v7508_v0 }
 0xdbe   :  { %6580 = vmatpush3.msra.mxu0 %v7183_v1  ;;  %6569 = vmatpush3.msra.mxu1 %v7508_v0  ;;  %v7515_v1 = vld [vmem:[%s8092_s7 + $0x8] sm:$0xff] }
 0xdbf   :  { %6581 = vmatprep.subr.mxu0 %v7192_v3  ;;  %6570 = vmatprep.subr.mxu1 %v7515_v1 }
 0xdc0   :  { %6582 = vmatpush3.msra.mxu0 %v7192_v3  ;;  %v7521_v3 = vld [vmem:[%s8092_s7] sm:$0xff]  ;;  %6571 = vmatpush3.msra.mxu1 %v7515_v1 }
 0xdc1   :  { %6583 = vmatprep.subr.mxu0 %v7201_v4  ;;  %6572 = vmatprep.subr.mxu1 %v7521_v3 }
 0xdc2   :  { %6584 = vmatpush3.msra.mxu0 %v7201_v4  ;;  %6573 = vmatpush3.msra.mxu1 %v7521_v3  ;;  %v7530_v4 = vld [vmem:[%s8091_s6] ss:$0 sm:$0xff] }
 0xdc3   :  { %6588 = vmatprep.subr.mxu0 %v7075_v6  ;;  %6593 = vmatprep.subr.mxu1 %v7075_v6 }
 0xe7b   :  { %v6557_v44 = vpop.f32.mrf.mxu0 }
 0xe7c   :  { %v1990_v45 = vadd.f32 %v6557_v44, %v7530_v4 }
 0xe7d   :  { %v1984_v46 = vpop.f32.mrf.mxu0 }
 0xe7e   :  { %v1985_v11 = vadd.f32 %v7530_v4, %v1984_v46  ;;  %v1994_v48 = vmax.f32 %v1990_v45, 0.0 }
 0xe80   :  { %v1993_v47 = vmax.f32 %v1985_v11, 0.0 }
 0xe82   :  { %6574 = vmatprep.mubr.msk.f32.mxu1 %vm1995_vm3, %v1993_v47 }
 0xe83   :  { %6575 = vmatmul.mubr.msk.f32.vlgmr.msra.gmra.mxu1 %vm1995_vm3, %v1994_v48 }
 0xe84   :  { %6595 = vmatprep.mubr.msk.f32.mxu1 %vm7076_vm1, %v7075_v6 }
 0xf43   :  { %v6576_v50 = vpop.f32.mrf.mxu1 }
 0xf44   :  { %v2074_v51 = vadd.f32 %v6576_v50, %v7541_v49 }
 0xf45   :  { %v2068_v52 = vpop.f32.mrf.mxu1 }
 0xf46   :  { %v2078_v53 = vadd.f32 %v2074_v51, %v1911_v42  ;;  %v2069_v54 = vadd.f32 %v7541_v49, %v2068_v52  ;;  %v7558_v42 = vld [vmem:[%s8097_s12] ss:$0 sm:$0xff] }
 0xf48   :  { %v2077_v55 = vadd.f32 %v2069_v54, %v1910_v41  ;;  %v2082_v57 = vsel %vm143_vm0, %v2078_v53, 0.0  ;;  %v2086_v58 = vmul.f32 %v2078_v53, %v2078_v53 }
 0xf49   :  { %2083 = vadd.xlane.f32.xlu0 %v2082_v57 }
 0xf4a   :  { %v2079_v59 = vsel %vm143_vm0, %v2077_v55, 0.0  ;;  %v2085_v60 = vmul.f32 %v2077_v55, %v2077_v55  ;;  %v2090_v61 = vsel %vm143_vm0, %v2086_v58, 0.0 }
 0xf4b   :  { %2080 = vadd.xlane.f32.xlu1 %v2079_v59 }
 0xf4c   :  { %v2087_v14 = vsel %vm143_vm0, %v2085_v60, 0.0 }
 0xf4d   :  { %2091 = vadd.xlane.f32.xlu0 %v2090_v61 }
 0xf4f   :  { %2088 = vadd.xlane.f32.xlu1 %v2087_v14 }
 0xfd2   :  { %v2084_v15 = vpop.xlane.xlu0 %2083 }
 0xfd3   :  { %v2094_v16 = vmul.f32 0.03125, %v2084_v15 }
 0xfd4   :  { %v2081_v17 = vpop.xlane.xlu1 %2080 }
 0xfd5   :  { %v2093_v18 = vmul.f32 0.03125, %v2081_v17  ;;  %v2098_v20 = vmul.f32 %v2094_v16, %v2094_v16  ;;  %v2102_v30 = vsub.f32 %v2078_v53, %v2094_v16 }
 0xfd6   :  { %v2092_v19 = vpop.xlane.xlu0 %2091 }
 0xfd7   :  { %v2096_v22 = vmul.f32 0.03125, %v2092_v19  ;;  %v2097_v24 = vmul.f32 %v2093_v18, %v2093_v18  ;;  %v2101_v33 = vsub.f32 %v2077_v55, %v2093_v18 }
 0xfd8   :  { %v2089_v23 = vpop.xlane.xlu1 %2088 }
 0xfd9   :  { %v2100_v25 = vsub.f32 %v2096_v22, %v2098_v20  ;;  %v2095_v26 = vmul.f32 0.03125, %v2089_v23 }
 0xfdb   :  { %v2104_v27 = vadd.f32 1e-05, %v2100_v25  ;;  %v2099_v28 = vsub.f32 %v2095_v26, %v2097_v24 }
 0xfdd   :  { %6912 = vrsqrt.f32 %v2104_v27  ;;  %v2103_v29 = vadd.f32 1e-05, %v2099_v28 }
 0xfdf   :  { %6914 = vrsqrt.f32 %v2103_v29 }
 0xfea   :  { %v6913_v31 = vpop.eup %6912 }
 0xfeb   :  { %v2108_v35 = vmul.f32 %v6913_v31, %v2102_v30 }
 0xfec   :  { %v6915_v37 = vpop.eup %6914 }
 0xfed   :  { %v2107_v39 = vmul.f32 %v6915_v37, %v2101_v33  ;;  %v2110_v41 = vmul.f32 %v7552_v34, %v2108_v35 }
 0xfef   :  { %v2109_v44 = vmul.f32 %v7552_v34, %v2107_v39  ;;  %v7565_v46 = vadd.f32 %v7558_v42, %v2110_v41 }
 0xff1   :  { %v7562_v45 = vadd.f32 %v7558_v42, %v2109_v44 }
 0xff3   :  { %6585 = vmatprep.mubr.msk.f32.mxu0 %vm143_vm0, %v7562_v45 }
 0xff4   :  { %6586 = vmatmul.mubr.msk.f32.vlgmr.msra.gmra.mxu0 %vm143_vm0, %v7565_v46 }
 0xff5   :  { %6590 = vmatprep.mubr.msk.f32.mxu0 %vm7076_vm1, %v7075_v6 }
0x10b4   :  { %v6587_v11 = vpop.f32.mrf.mxu0 }
0x10b5   :  { %v7574_v47 = vadd.f32 %v6587_v11, %v7220_v8 }
0x10b6   :  { %v2185_v48 = vpop.f32.mrf.mxu0 }
0x10b7   :  { %v7577_v50 = vadd.f32 %v7220_v8, %v2185_v48  ;;  %2272 = vrot.lane.b32.xlu0 %v7574_v47, %s7077_s19 }
0x10b9   :  { %2195 = vrot.lane.b32.xlu1 %v7577_v50, %s7077_s19 }
0x1129   :  { %v2273_v51 = vpop.permute.xlu0 %2272 }
0x112a   :  { %6594 = vmatpush3.xpose.msk.msra.mxu1 %vm228_vm2, %v2273_v51 }
0x112b   :  { %v2196_v52 = vpop.permute.xlu1 %2195  ;;  %6603 = vmatprep.subr.mxu1 %v7075_v6 }
0x112c   :  { %6589 = vmatpush3.xpose.msk.msra.mxu0 %vm228_vm2, %v2196_v52 }
0x112d   :  { %6596 = vmatmul.mubr.msk.f32.vlgmr.msra.gmra.mxu1 %vm228_vm2, %v7574_v47  ;;  %6598 = vmatprep.subr.mxu0 %v7075_v6 }
0x112e   :  { %6605 = vmatprep.mubr.msk.f32.mxu1 %vm7076_vm1, %v7075_v6 }
0x112f   :  { %6591 = vmatmul.mubr.msk.f32.vlgmr.msra.gmra.mxu0 %vm228_vm2, %v7577_v50 }
0x1130   :  { %6600 = vmatprep.mubr.msk.f32.mxu0 %vm7076_vm1, %v7075_v6 }
0x11ed   :  { %v2344_v8 = vpop.f32.mrf.mxu1 }
0x11ee   :  { %v2351_v53 = vsel %vm228_vm2, %v2344_v8, -inf }
0x11ef   :  { %2352 = vmax.xlane.f32.xlu0 %v2351_v53  ;;  %v2267_v54 = vpop.f32.mrf.mxu0  ;;  %v6597_v55 = vpop.f32.mrf.mxu1 }
0x11f0   :  { %v2348_v57 = vsel %vm228_vm2, %v2267_v54, -inf }
0x11f1   :  { %2349 = vmax.xlane.f32.xlu1 %v2348_v57  ;;  %v6592_v58 = vpop.f32.mrf.mxu0 }
0x1278   :  { %v2353_v59 = vpop.xlane.xlu0 %2352 }
0x1279   :  { %v2355_v60 = vsub.f32 %v2344_v8, %v2353_v59 }
0x127a   :  { %v2350_v61 = vpop.xlane.xlu1 %2349 }
0x127b   :  { %v2358_v14 = vmul.f32 1.442695, %v2355_v60  ;;  %v2354_v15 = vsub.f32 %v2267_v54, %v2350_v61 }
0x127d   :  { %6916 = vpow2.f32 %v2358_v14  ;;  %v2356_v16 = vmul.f32 1.442695, %v2354_v15 }
0x127f   :  { %6918 = vpow2.f32 %v2356_v16 }
0x128a   :  { %v6917_v17 = vpop.eup %6916 }
0x128b   :  { %v2363_v18 = vsel %vm228_vm2, %v6917_v17, 0.0 }
0x128c   :  { %v6919_v19 = vpop.eup %6918  ;;  %2364 = vadd.xlane.f32.xlu0 %v2363_v18 }
0x128d   :  { %v2360_v20 = vsel %vm228_vm2, %v6919_v19, 0.0 }
0x128e   :  { %2361 = vadd.xlane.f32.xlu1 %v2360_v20 }
0x129f   :  { %2370 = vrot.lane.b32.xlu1 %v7577_v50, %s7078_s20 }
0x12a2   :  { %2446 = vrot.lane.b32.xlu0 %v7574_v47, %s7078_s20 }
0x12a3   :  { %2607 = vrot.lane.b32.xlu1 %v7577_v50, %s7080_s24 }
0x12a6   :  { %2605 = vrot.lane.b32.xlu0 %v7577_v50, %s7079_s23 }
0x12a7   :  { %2685 = vrot.lane.b32.xlu1 %v7574_v47, %s7080_s24 }
0x12ab   :  { %2683 = vrot.lane.b32.xlu1 %v7574_v47, %s7079_s23 }
0x1315   :  { %v2365_v22 = vpop.xlane.xlu0 %2364 }
0x1316   :  { %6920 = vrcp.f32 %v2365_v22 }
0x1317   :  { %v2362_v23 = vpop.xlane.xlu1 %2361 }
0x1318   :  { %6922 = vrcp.f32 %v2362_v23 }
0x1319   :  { %v2447_v24 = vpop.permute.xlu0 %2446 }
0x131a   :  { %6604 = vmatpush3.msra.mxu1 %v2447_v24 }
0x131b   :  { %v2371_v25 = vpop.permute.xlu1 %2370  ;;  %6613 = vmatprep.subr.mxu1 %v7075_v6 }
0x131c   :  { %6599 = vmatpush3.msra.mxu0 %v2371_v25 }
0x131d   :  { %6608 = vmatprep.subr.mxu0 %v7273_v40  ;;  %v2606_v31 = vpop.permute.xlu0 %2605 }
0x131f   :  { %v2608_v29 = vpop.permute.xlu1 %2607 }
0x1323   :  { %v6921_v26 = vpop.eup %6920  ;;  %v2686_v35 = vpop.permute.xlu1 %2685 }
0x1324   :  { %v2369_v27 = vmul.f32 %v6921_v26, %v6917_v17 }
0x1325   :  { %v6923_v28 = vpop.eup %6922 }
0x1326   :  { %6606 = vmatmul.mubr.msk.f32.vlgmr.msra.gmra.mxu1 %vm228_vm2, %v2369_v27  ;;  %v2368_v30 = vmul.f32 %v6923_v28, %v6919_v19 }
0x1327   :  { %6614 = vmatpush3.xpose.msk.msra.mxu1 %vm228_vm2, %v2608_v29  ;;  %6615 = vmatprep.mubr.msk.f32.mxu1 %vm7076_vm1, %v7075_v6  ;;  %v2684_v48 = vpop.permute.xlu1 %2683 }
0x1328   :  { %6601 = vmatmul.mubr.msk.f32.vlgmr.msra.gmra.mxu0 %vm228_vm2, %v2368_v30  ;;  %6623 = vmatprep.subr.mxu1 %v7075_v6 }
0x1329   :  { %6609 = vmatpush3.msra.mxu0 %v7273_v40 }
0x132a   :  { %6616 = vmatmul.mubr.msk.f32.vlgmr.msra.gmra.mxu1 %vm228_vm2, %v2606_v31  ;;  %6618 = vmatprep.subr.mxu0 %v7075_v6 }
0x132b   :  { %6625 = vmatprep.mubr.msk.f32.mxu1 %vm7076_vm1, %v7075_v6 }
0x13e6   :  { %v2518_v33 = vpop.f32.mrf.mxu1 }
0x13e8   :  { %v2442_v37 = vpop.f32.mrf.mxu0  ;;  %v6607_v39 = vpop.f32.mrf.mxu1 }
0x13e9   :  { %6610 = vmatprep.mubr.msk.f32.mxu0 %vm228_vm2, %v2442_v37 }
0x13ea   :  { %v6602_v41 = vpop.f32.mrf.mxu0  ;;  %6611 = vmatmul.mubr.msk.f32.vlgmr.msra.gmra.mxu0 %vm228_vm2, %v2518_v33  ;;  %v2679_v44 = vpop.f32.mrf.mxu1 }
0x13eb   :  { %6619 = vmatpush3.xpose.msk.msra.mxu0 %vm228_vm2, %v2686_v35  ;;  %v2761_v40 = vsel %vm228_vm2, %v2679_v44, -inf  ;;  %6620 = vmatprep.mubr.msk.f32.mxu0 %vm7076_vm1, %v7075_v6 }
0x13ec   :  { %2762 = vmax.xlane.f32.xlu0 %v2761_v40  ;;  %v6617_v11 = vpop.f32.mrf.mxu1  ;;  %6628 = vmatprep.subr.mxu0 %v7075_v6 }
0x13ee   :  { %6621 = vmatmul.mubr.msk.f32.vlgmr.msra.gmra.mxu0 %vm228_vm2, %v2684_v48 }
0x13ef   :  { %6630 = vmatprep.mubr.msk.f32.mxu0 %vm7076_vm1, %v7075_v6 }
0x1475   :  { %v2763_v51 = vpop.xlane.xlu0 %2762 }
0x1476   :  { %v2767_v52 = vsub.f32 %v2679_v44, %v2763_v51 }
0x1478   :  { %v2769_v8 = vmul.f32 1.442695, %v2767_v52 }
0x147a   :  { %6924 = vpow2.f32 %v2769_v8 }
0x1487   :  { %v6925_v53 = vpop.eup %6924 }
0x1488   :  { %v2773_v54 = vsel %vm228_vm2, %v6925_v53, 0.0 }
0x1489   :  { %2774 = vadd.xlane.f32.xlu0 %v2773_v54 }
0x14aa   :  { %v7635_v55 = vpop.f32.mrf.mxu0 }
0x14ab   :  { %v2604_v52 = vadd.f32 %v7635_v55, %v7339_v36 }
0x14ac   :  { %v7637_v57 = vpop.f32.mrf.mxu0 }
0x14ae   :  { %v2757_v58 = vpop.f32.mrf.mxu0 }
0x14af   :  { %v2764_v59 = vsel %vm228_vm2, %v2757_v58, -inf }
0x14b0   :  { %2765 = vmax.xlane.f32.xlu1 %v2764_v59  ;;  %v6622_v60 = vpop.f32.mrf.mxu0 }
0x14c1   :  { %2783 = vrot.lane.b32.xlu1 %v7577_v50, %s7081_s27 }
0x14c5   :  { %3020 = vrot.lane.b32.xlu1 %v7577_v50, %s7083_s0 }
0x14c9   :  { %3098 = vrot.lane.b32.xlu1 %v7574_v47, %s7083_s0 }
0x14cd   :  { %3096 = vrot.lane.b32.xlu1 %v7574_v47, %s7082_s28 }
0x1512   :  { %v2775_v61 = vpop.xlane.xlu0 %2774 }
0x1513   :  { %6926 = vrcp.f32 %v2775_v61 }
0x1520   :  { %v6927_v15 = vpop.eup %6926 }
0x1521   :  { %v2781_v19 = vmul.f32 %v6927_v15, %v6925_v53  ;;  %v2603_v53 = vadd.f32 %v7339_v36, %v7637_v57 }
0x1539   :  { %v2766_v14 = vpop.xlane.xlu1 %2765 }
0x153a   :  { %v2768_v16 = vsub.f32 %v2757_v58, %v2766_v14 }
0x153c   :  { %v2771_v17 = vmul.f32 1.442695, %v2768_v16 }
0x153d   :  { %v2784_v18 = vpop.permute.xlu1 %2783 }
0x153e   :  { %6928 = vpow2.f32 %v2771_v17  ;;  %6624 = vmatpush3.msra.mxu1 %v2784_v18 }
0x153f   :  { %6626 = vmatmul.mubr.msk.f32.vlgmr.msra.gmra.mxu1 %vm228_vm2, %v2781_v19  ;;  %6633 = vmatprep.subr.mxu1 %v7320_v21 }
0x1540   :  { %6634 = vmatpush3.msra.mxu1 %v7320_v21 }
0x1541   :  { %6643 = vmatprep.subr.mxu1 %v7075_v6  ;;  %v3021_v26 = vpop.permute.xlu1 %3020 }
0x1545   :  { %v3099_v30 = vpop.permute.xlu1 %3098 }
0x1549   :  { %v3097_v35 = vpop.permute.xlu1 %3096 }
0x154b   :  { %v6929_v20 = vpop.eup %6928 }
0x154c   :  { %v2776_v22 = vsel %vm228_vm2, %v6929_v20, 0.0 }
0x154d   :  { %2777 = vadd.xlane.f32.xlu0 %v2776_v22 }
0x1563   :  { %2859 = vrot.lane.b32.xlu0 %v7574_v47, %s7081_s27 }
0x1567   :  { %3018 = vrot.lane.b32.xlu0 %v7577_v50, %s7082_s28 }
0x15d6   :  { %v2778_v23 = vpop.xlane.xlu0 %2777 }
0x15d7   :  { %6930 = vrcp.f32 %v2778_v23 }
0x15da   :  { %v2860_v24 = vpop.permute.xlu0 %2859 }
0x15db   :  { %6629 = vmatpush3.msra.mxu0 %v2860_v24 }
0x15dc   :  { %6638 = vmatprep.subr.mxu0 %v7075_v6 }
0x15de   :  { %v3019_v27 = vpop.permute.xlu0 %3018 }
0x15e4   :  { %v6931_v25 = vpop.eup %6930 }
0x15e5   :  { %v2782_v21 = vmul.f32 %v6931_v25, %v6929_v20 }
0x15e7   :  { %6631 = vmatmul.mubr.msk.f32.vlgmr.msra.gmra.mxu0 %vm228_vm2, %v2782_v21 }
0x15e8   :  { %6639 = vmatpush3.xpose.msk.msra.mxu0 %vm228_vm2, %v3021_v26  ;;  %6640 = vmatprep.mubr.msk.f32.mxu0 %vm7076_vm1, %v7075_v6 }
0x15e9   :  { %6648 = vmatprep.subr.mxu0 %v7075_v6 }
0x15eb   :  { %6641 = vmatmul.mubr.msk.f32.vlgmr.msra.gmra.mxu0 %vm228_vm2, %v3019_v27 }
0x15ec   :  { %6650 = vmatprep.mubr.msk.f32.mxu0 %vm7076_vm1, %v7075_v6 }
0x15ff   :  { %v2855_v28 = vpop.f32.mrf.mxu1 }
0x1600   :  { %6635 = vmatprep.mubr.msk.f32.mxu1 %vm228_vm2, %v2855_v28 }
0x1601   :  { %v6627_v29 = vpop.f32.mrf.mxu1 }
0x16a7   :  { %v2931_v31 = vpop.f32.mrf.mxu0 }
0x16a8   :  { %6636 = vmatmul.mubr.msk.f32.vlgmr.msra.gmra.mxu1 %vm228_vm2, %v2931_v31 }
0x16a9   :  { %6644 = vmatpush3.xpose.msk.msra.mxu1 %vm228_vm2, %v3099_v30  ;;  %v6632_v33 = vpop.f32.mrf.mxu0  ;;  %6645 = vmatprep.mubr.msk.f32.mxu1 %vm7076_vm1, %v7075_v6 }
0x16aa   :  { %6653 = vmatprep.subr.mxu1 %v7075_v6 }
0x16ab   :  { %v3092_v37 = vpop.f32.mrf.mxu0 }
0x16ac   :  { %6646 = vmatmul.mubr.msk.f32.vlgmr.msra.gmra.mxu1 %vm228_vm2, %v3097_v35  ;;  %v3174_v39 = vsel %vm228_vm2, %v3092_v37, -inf }
0x16ad   :  { %3175 = vmax.xlane.f32.xlu0 %v3174_v39  ;;  %v6642_v41 = vpop.f32.mrf.mxu0  ;;  %6655 = vmatprep.mubr.msk.f32.mxu1 %vm7076_vm1, %v7075_v6 }
0x1736   :  { %v3176_v44 = vpop.xlane.xlu0 %3175 }
0x1737   :  { %v3180_v40 = vsub.f32 %v3092_v37, %v3176_v44 }
0x1739   :  { %v3182_v11 = vmul.f32 1.442695, %v3180_v40 }
0x173b   :  { %6932 = vpow2.f32 %v3182_v11 }
0x1748   :  { %v6933_v48 = vpop.eup %6932 }
0x1749   :  { %v3186_v51 = vsel %vm228_vm2, %v6933_v48, 0.0 }
0x174a   :  { %3187 = vadd.xlane.f32.xlu0 %v3186_v51 }
0x1768   :  { %v6637_v8 = vpop.f32.mrf.mxu1 }
0x1769   :  { %v7681_v54 = vadd.f32 %v6637_v8, %v2604_v52 }
0x176a   :  { %v3007_v58 = vpop.f32.mrf.mxu1 }
0x176b   :  { %v7683_v59 = vadd.f32 %v3007_v58, %v2603_v53 }
0x176c   :  { %v3170_v60 = vpop.f32.mrf.mxu1 }
0x176d   :  { %v3177_v61 = vsel %vm228_vm2, %v3170_v60, -inf }
0x176e   :  { %3178 = vmax.xlane.f32.xlu1 %v3177_v61  ;;  %v6647_v14 = vpop.f32.mrf.mxu1 }
0x177f   :  { %3196 = vrot.lane.b32.xlu1 %v7577_v50, %s7084_s18 }
0x1783   :  { %3433 = vrot.lane.b32.xlu1 %v7577_v50, %s7085_s25 }
0x1787   :  { %3511 = vrot.lane.b32.xlu1 %v7574_v47, %s7085_s25 }
0x178b   :  { %3509 = vrot.lane.b32.xlu1 %v7574_v47, %s8105_s26 }
0x17d3   :  { %v3188_v36 = vpop.xlane.xlu0 %3187 }
0x17d4   :  { %6934 = vrcp.f32 %v3188_v36 }
0x17e1   :  { %v6935_v57 = vpop.eup %6934 }
0x17e2   :  { %v3194_v18 = vmul.f32 %v6935_v57, %v6933_v48 }
0x17f7   :  { %v3179_v55 = vpop.xlane.xlu1 %3178 }
0x17f8   :  { %v3181_v15 = vsub.f32 %v3170_v60, %v3179_v55 }
0x17fa   :  { %v3184_v16 = vmul.f32 1.442695, %v3181_v15 }
0x17fb   :  { %v3197_v17 = vpop.permute.xlu1 %3196 }
0x17fc   :  { %6936 = vpow2.f32 %v3184_v16  ;;  %6649 = vmatpush3.msra.mxu0 %v3197_v17 }
0x17fd   :  { %6651 = vmatmul.mubr.msk.f32.vlgmr.msra.gmra.mxu0 %vm228_vm2, %v3194_v18  ;;  %6658 = vmatprep.subr.mxu0 %v7367_v56 }
0x17fe   :  { %6659 = vmatpush3.msra.mxu0 %v7367_v56 }
0x17ff   :  { %6668 = vmatprep.subr.mxu0 %v7075_v6  ;;  %v3434_v25 = vpop.permute.xlu1 %3433 }
0x1803   :  { %v3512_v28 = vpop.permute.xlu1 %3511 }
0x1807   :  { %v3510_v31 = vpop.permute.xlu1 %3509 }
0x1809   :  { %v6937_v19 = vpop.eup %6936 }
0x180a   :  { %v3189_v20 = vsel %vm228_vm2, %v6937_v19, 0.0 }
0x180b   :  { %3190 = vadd.xlane.f32.xlu0 %v3189_v20 }
0x1821   :  { %3272 = vrot.lane.b32.xlu0 %v7574_v47, %s7084_s18 }
0x1825   :  { %3431 = vrot.lane.b32.xlu0 %v7577_v50, %s8105_s26 }
0x1894   :  { %v3191_v22 = vpop.xlane.xlu0 %3190 }
0x1895   :  { %6938 = vrcp.f32 %v3191_v22 }
0x1898   :  { %v3273_v23 = vpop.permute.xlu0 %3272 }
0x1899   :  { %6654 = vmatpush3.msra.mxu1 %v3273_v23 }
0x189a   :  { %6663 = vmatprep.subr.mxu1 %v7075_v6 }
0x189c   :  { %v3432_v21 = vpop.permute.xlu0 %3431 }
0x18a2   :  { %v6939_v24 = vpop.eup %6938 }
0x18a3   :  { %v3195_v56 = vmul.f32 %v6939_v24, %v6937_v19 }
0x18a5   :  { %6656 = vmatmul.mubr.msk.f32.vlgmr.msra.gmra.mxu1 %vm228_vm2, %v3195_v56 }
0x18a6   :  { %6664 = vmatpush3.xpose.msk.msra.mxu1 %vm228_vm2, %v3434_v25  ;;  %6665 = vmatprep.mubr.msk.f32.mxu1 %vm7076_vm1, %v7075_v6 }
0x18a7   :  { %6673 = vmatprep.subr.mxu1 %v7075_v6 }
0x18a9   :  { %6666 = vmatmul.mubr.msk.f32.vlgmr.msra.gmra.mxu1 %vm228_vm2, %v3432_v21 }
0x18aa   :  { %6675 = vmatprep.mubr.msk.f32.mxu1 %vm7076_vm1, %v7075_v6 }
0x18bd   :  { %v3268_v26 = vpop.f32.mrf.mxu0 }
0x18be   :  { %6660 = vmatprep.mubr.msk.f32.mxu0 %vm228_vm2, %v3268_v26 }
0x18bf   :  { %v6652_v27 = vpop.f32.mrf.mxu0 }
0x1965   :  { %v3344_v29 = vpop.f32.mrf.mxu1 }
0x1966   :  { %6661 = vmatmul.mubr.msk.f32.vlgmr.msra.gmra.mxu0 %vm228_vm2, %v3344_v29 }
0x1967   :  { %6669 = vmatpush3.xpose.msk.msra.mxu0 %vm228_vm2, %v3512_v28  ;;  %v6657_v30 = vpop.f32.mrf.mxu1  ;;  %6670 = vmatprep.mubr.msk.f32.mxu0 %vm7076_vm1, %v7075_v6 }
0x1968   :  { %6678 = vmatprep.subr.mxu0 %v7075_v6 }
0x1969   :  { %v3505_v33 = vpop.f32.mrf.mxu1 }
0x196a   :  { %6671 = vmatmul.mubr.msk.f32.vlgmr.msra.gmra.mxu0 %vm228_vm2, %v3510_v31  ;;  %v3587_v35 = vsel %vm228_vm2, %v3505_v33, -inf }
0x196b   :  { %3588 = vmax.xlane.f32.xlu0 %v3587_v35  ;;  %v6667_v37 = vpop.f32.mrf.mxu1  ;;  %6680 = vmatprep.mubr.msk.f32.mxu0 %vm7076_vm1, %v7075_v6 }
0x19f4   :  { %v3589_v39 = vpop.xlane.xlu0 %3588 }
0x19f5   :  { %v3593_v41 = vsub.f32 %v3505_v33, %v3589_v39 }
0x19f7   :  { %v3595_v44 = vmul.f32 1.442695, %v3593_v41 }
0x19f9   :  { %6940 = vpow2.f32 %v3595_v44 }
0x1a06   :  { %v6941_v40 = vpop.eup %6940 }
0x1a07   :  { %v3599_v11 = vsel %vm228_vm2, %v6941_v40, 0.0 }
0x1a08   :  { %3600 = vadd.xlane.f32.xlu0 %v3599_v11 }
0x1a26   :  { %v6662_v48 = vpop.f32.mrf.mxu0 }
0x1a27   :  { %v7724_v51 = vadd.f32 %v6662_v48, %v7681_v54 }
0x1a28   :  { %v3420_v52 = vpop.f32.mrf.mxu0 }
0x1a29   :  { %v7727_v8 = vadd.f32 %v3420_v52, %v7683_v59 }
0x1a2a   :  { %v3583_v53 = vpop.f32.mrf.mxu0 }
0x1a2b   :  { %v3590_v58 = vsel %vm228_vm2, %v3583_v53, -inf }
0x1a2c   :  { %3591 = vmax.xlane.f32.xlu1 %v3590_v58  ;;  %v6672_v60 = vpop.f32.mrf.mxu0 }
0x1a3d   :  { %3609 = vrot.lane.b32.xlu1 %v7577_v50, %s8107_s30 }
0x1a91   :  { %v3601_v61 = vpop.xlane.xlu0 %3600 }
0x1a92   :  { %6942 = vrcp.f32 %v3601_v61 }
0x1a9f   :  { %v6943_v36 = vpop.eup %6942 }
0x1aa0   :  { %v3607_v15 = vmul.f32 %v6943_v36, %v6941_v40 }
0x1ab5   :  { %v3592_v14 = vpop.xlane.xlu1 %3591 }
0x1ab6   :  { %v3594_v55 = vsub.f32 %v3583_v53, %v3592_v14  ;;  %v7001_v53 = vld [vmem:[%s8086_s1 + $0x10] sm:$0xff] }
0x1ab8   :  { %v3597_v57 = vmul.f32 1.442695, %v3594_v55 }
0x1ab9   :  { %v3610_v54 = vpop.permute.xlu1 %3609 }
0x1aba   :  { %6944 = vpow2.f32 %v3597_v57  ;;  %6674 = vmatpush3.msra.mxu1 %v3610_v54 }
0x1abb   :  { %6676 = vmatmul.mubr.msk.f32.vlgmr.msra.gmra.mxu1 %vm228_vm2, %v3607_v15  ;;  %6683 = vmatprep.subr.mxu1 %v7404_v10 }
0x1abc   :  { %6684 = vmatpush3.msra.mxu1 %v7404_v10  ;;  %v7751_v10 = vld [vmem:[%s8086_s1 + $0x18] sm:$0xff] }
0x1abd   :  { %6699 = vmatprep.subr.mxu1 %v7449_v7 }
0x1ac7   :  { %v6945_v59 = vpop.eup %6944 }
0x1ac8   :  { %v3602_v50 = vsel %vm228_vm2, %v6945_v59, 0.0 }
0x1ac9   :  { %3603 = vadd.xlane.f32.xlu0 %v3602_v50 }
0x1adf   :  { %3685 = vrot.lane.b32.xlu0 %v7574_v47, %s8107_s30 }
0x1b52   :  { %v3604_v16 = vpop.xlane.xlu0 %3603 }
0x1b53   :  { %6946 = vrcp.f32 %v3604_v16 }
0x1b56   :  { %v3686_v17 = vpop.permute.xlu0 %3685 }
0x1b57   :  { %6679 = vmatpush3.msra.mxu0 %v3686_v17 }
0x1b58   :  { %6688 = vmatprep.subr.mxu0 %v7420_v5 }
0x1b60   :  { %v6947_v18 = vpop.eup %6946 }
0x1b61   :  { %v3608_v19 = vmul.f32 %v6947_v18, %v6945_v59 }
0x1b63   :  { %6681 = vmatmul.mubr.msk.f32.vlgmr.msra.gmra.mxu0 %vm228_vm2, %v3608_v19 }
0x1b64   :  { %6689 = vmatpush3.msra.mxu0 %v7420_v5 }
0x1b65   :  { %6690 = vmatprep.subr.mxu0 %v7425_v2 }
0x1b66   :  { %6691 = vmatpush3.msra.mxu0 %v7425_v2 }
0x1b67   :  { %6692 = vmatprep.subr.mxu0 %v7432_v62 }
0x1b68   :  { %6693 = vmatpush3.msra.mxu0 %v7432_v62 }
0x1b69   :  { %6694 = vmatprep.subr.mxu0 %v7439_v63 }
0x1b6a   :  { %6695 = vmatpush3.msra.mxu0 %v7439_v63 }
0x1b6b   :  { %6718 = vmatprep.subr.mxu0 %v7751_v10 }
0x1b7b   :  { %v3681_v5 = vpop.f32.mrf.mxu1 }
0x1b7c   :  { %6685 = vmatprep.mubr.msk.f32.mxu1 %vm228_vm2, %v3681_v5 }
0x1b7d   :  { %v6677_v47 = vpop.f32.mrf.mxu1 }
0x1c23   :  { %v3757_v2 = vpop.f32.mrf.mxu0 }
0x1c24   :  { %6686 = vmatmul.mubr.msk.f32.vlgmr.msra.gmra.mxu1 %vm228_vm2, %v3757_v2 }
0x1c25   :  { %v6682_v20 = vpop.f32.mrf.mxu0  ;;  %6700 = vmatpush3.msra.mxu1 %v7449_v7 }
0x1c26   :  { %6701 = vmatprep.subr.mxu1 %v7454_v9 }
0x1c27   :  { %6702 = vmatpush3.msra.mxu1 %v7454_v9 }
0x1c28   :  { %6703 = vmatprep.subr.mxu1 %v7461_v12 }
0x1c29   :  { %6704 = vmatpush3.msra.mxu1 %v7461_v12 }
0x1c2a   :  { %6705 = vmatprep.subr.mxu1 %v7468_v13 }
0x1c2b   :  { %6706 = vmatpush3.msra.mxu1 %v7468_v13 }
0x1c2c   :  { %6707 = vmatprep.subr.mxu1 %v7501_v43 }
0x1c2d   :  { %6708 = vmatpush3.msra.mxu1 %v7501_v43 }
0x1c2e   :  { %6709 = vmatprep.subr.mxu1 %v7508_v0 }
0x1c2f   :  { %6710 = vmatpush3.msra.mxu1 %v7508_v0 }
0x1c30   :  { %6711 = vmatprep.subr.mxu1 %v7515_v1 }
0x1c31   :  { %6712 = vmatpush3.msra.mxu1 %v7515_v1 }
0x1c32   :  { %6713 = vmatprep.subr.mxu1 %v7521_v3 }
0x1c33   :  { %6714 = vmatpush3.msra.mxu1 %v7521_v3 }
0x1c34   :  { %6734 = vmatprep.subr.mxu1 %v7075_v6 }
0x1ce4   :  { %v6687_v62 = vpop.f32.mrf.mxu1 }
0x1ce5   :  { %v3843_v63 = vadd.f32 %v6687_v62, %v7724_v51 }
0x1ce6   :  { %v3833_v7 = vpop.f32.mrf.mxu1 }
0x1ce7   :  { %v3845_v9 = vadd.f32 %v3843_v63, %v7565_v46  ;;  %v3842_v12 = vadd.f32 %v3833_v7, %v7727_v8 }
0x1ce9   :  { %v3844_v13 = vadd.f32 %v3842_v12, %v7562_v45  ;;  %v3849_v43 = vsel %vm143_vm0, %v3845_v9, 0.0  ;;  %v3853_v0 = vmul.f32 %v3845_v9, %v3845_v9 }
0x1cea   :  { %3850 = vadd.xlane.f32.xlu0 %v3849_v43 }
0x1ceb   :  { %v3846_v1 = vsel %vm143_vm0, %v3844_v13, 0.0  ;;  %v3852_v22 = vmul.f32 %v3844_v13, %v3844_v13  ;;  %v3857_v3 = vsel %vm143_vm0, %v3853_v0, 0.0 }
0x1cec   :  { %3847 = vadd.xlane.f32.xlu1 %v3846_v1 }
0x1ced   :  { %v3854_v23 = vsel %vm143_vm0, %v3852_v22, 0.0 }
0x1cee   :  { %3858 = vadd.xlane.f32.xlu0 %v3857_v3 }
0x1cf0   :  { %3855 = vadd.xlane.f32.xlu1 %v3854_v23 }
0x1d73   :  { %v3851_v24 = vpop.xlane.xlu0 %3850 }
0x1d74   :  { %v3861_v46 = vmul.f32 0.03125, %v3851_v24 }
0x1d75   :  { %v3848_v56 = vpop.xlane.xlu1 %3847 }
0x1d76   :  { %v3860_v25 = vmul.f32 0.03125, %v3848_v56  ;;  %v3865_v45 = vmul.f32 %v3861_v46, %v3861_v46  ;;  %v3869_v37 = vsub.f32 %v3845_v9, %v3861_v46 }
0x1d77   :  { %v3859_v21 = vpop.xlane.xlu0 %3858 }
0x1d78   :  { %v3863_v26 = vmul.f32 0.03125, %v3859_v21  ;;  %v3864_v28 = vmul.f32 %v3860_v25, %v3860_v25  ;;  %v3868_v41 = vsub.f32 %v3844_v13, %v3860_v25 }
0x1d79   :  { %v3856_v27 = vpop.xlane.xlu1 %3855 }
0x1d7a   :  { %v3867_v29 = vsub.f32 %v3863_v26, %v3865_v45  ;;  %v3862_v30 = vmul.f32 0.03125, %v3856_v27 }
0x1d7c   :  { %v3871_v31 = vadd.f32 1e-05, %v3867_v29  ;;  %v3866_v33 = vsub.f32 %v3862_v30, %v3864_v28 }
0x1d7e   :  { %6948 = vrsqrt.f32 %v3871_v31  ;;  %v3870_v35 = vadd.f32 1e-05, %v3866_v33 }
0x1d80   :  { %6950 = vrsqrt.f32 %v3870_v35 }
0x1d8b   :  { %v6949_v39 = vpop.eup %6948 }
0x1d8c   :  { %v3875_v44 = vmul.f32 %v6949_v39, %v3869_v37 }
0x1d8d   :  { %v6951_v40 = vpop.eup %6950 }
0x1d8e   :  { %v3874_v11 = vmul.f32 %v6951_v40, %v3868_v41  ;;  %v3877_v48 = vmul.f32 %v7477_v32, %v3875_v44 }
0x1d90   :  { %v3876_v51 = vmul.f32 %v7477_v32, %v3874_v11  ;;  %v3879_v8 = vadd.f32 %v7483_v38, %v3877_v48  ;;  %v7002_v32 = vld [vmem:[%s8086_s1 + $0x8] sm:$0xff] }
0x1d92   :  { %v3878_v52 = vadd.f32 %v7483_v38, %v3876_v51  ;;  %v7003_v38 = vld [vmem:[%s8086_s1] sm:$0xff] }
0x1d94   :  { %6696 = vmatprep.mubr.msk.f32.mxu0 %vm143_vm0, %v3878_v52 }
0x1d95   :  { %6697 = vmatmul.mubr.msk.f32.vlgmr.msra.gmra.mxu0 %vm143_vm0, %v3879_v8 }
0x1d96   :  { %6719 = vmatpush3.msra.mxu0 %v7751_v10 }
0x1d97   :  { %6720 = vmatprep.subr.mxu0 %v7001_v53 }
0x1d98   :  { %6721 = vmatpush3.msra.mxu0 %v7001_v53 }
0x1d99   :  { %6722 = vmatprep.subr.mxu0 %v7002_v32 }
0x1d9a   :  { %6723 = vmatpush3.msra.mxu0 %v7002_v32 }
0x1d9b   :  { %6724 = vmatprep.subr.mxu0 %v7003_v38 }
0x1d9c   :  { %6725 = vmatpush3.msra.mxu0 %v7003_v38 }
0x1d9d   :  { %6729 = vmatprep.subr.mxu0 %v7075_v6 }
0x1e55   :  { %v6698_v58 = vpop.f32.mrf.mxu0 }
0x1e56   :  { %v3958_v60 = vadd.f32 %v6698_v58, %v7530_v4 }
0x1e57   :  { %v3952_v61 = vpop.f32.mrf.mxu0 }
0x1e58   :  { %v3953_v14 = vadd.f32 %v7530_v4, %v3952_v61  ;;  %v3962_v55 = vmax.f32 %v3958_v60, 0.0 }
0x1e5a   :  { %v3961_v36 = vmax.f32 %v3953_v14, 0.0 }
0x1e5c   :  { %6715 = vmatprep.mubr.msk.f32.mxu1 %vm1995_vm3, %v3961_v36 }
0x1e5d   :  { %6716 = vmatmul.mubr.msk.f32.vlgmr.msra.gmra.mxu1 %vm1995_vm3, %v3962_v55 }
0x1e5e   :  { %6736 = vmatprep.mubr.msk.f32.mxu1 %vm7076_vm1, %v7075_v6 }
0x1f1d   :  { %v6717_v57 = vpop.f32.mrf.mxu1 }
0x1f1e   :  { %v4041_v54 = vadd.f32 %v6717_v57, %v7541_v49  ;;  %v7005_v57 = vld [vmem:[%s8088_s3] sm:$0xff] }
0x1f1f   :  { %v4035_v15 = vpop.f32.mrf.mxu1 }
0x1f20   :  { %v4045_v59 = vadd.f32 %v4041_v54, %v3879_v8  ;;  %v4036_v50 = vadd.f32 %v7541_v49, %v4035_v15 }
0x1f22   :  { %v4044_v16 = vadd.f32 %v4036_v50, %v3878_v52  ;;  %v4049_v17 = vsel %vm143_vm0, %v4045_v59, 0.0  ;;  %v4053_v4 = vmul.f32 %v4045_v59, %v4045_v59 }
0x1f23   :  { %4050 = vadd.xlane.f32.xlu0 %v4049_v17 }
0x1f24   :  { %v4046_v18 = vsel %vm143_vm0, %v4044_v16, 0.0  ;;  %v4052_v19 = vmul.f32 %v4044_v16, %v4044_v16  ;;  %v4057_v10 = vsel %vm143_vm0, %v4053_v4, 0.0 }
0x1f25   :  { %4047 = vadd.xlane.f32.xlu1 %v4046_v18 }
0x1f26   :  { %v4054_v5 = vsel %vm143_vm0, %v4052_v19, 0.0 }
0x1f27   :  { %4058 = vadd.xlane.f32.xlu0 %v4057_v10 }
0x1f29   :  { %4055 = vadd.xlane.f32.xlu1 %v4054_v5 }
0x1fac   :  { %v4051_v47 = vpop.xlane.xlu0 %4050 }
0x1fad   :  { %v4061_v2 = vmul.f32 0.03125, %v4051_v47 }
0x1fae   :  { %v4048_v20 = vpop.xlane.xlu1 %4047 }
0x1faf   :  { %v4060_v62 = vmul.f32 0.03125, %v4048_v20  ;;  %v4065_v63 = vmul.f32 %v4061_v2, %v4061_v2  ;;  %v4069_v3 = vsub.f32 %v4045_v59, %v4061_v2 }
0x1fb0   :  { %v4059_v49 = vpop.xlane.xlu0 %4058 }
0x1fb1   :  { %v4063_v7 = vmul.f32 0.03125, %v4059_v49  ;;  %v4064_v12 = vmul.f32 %v4060_v62, %v4060_v62  ;;  %v4068_v24 = vsub.f32 %v4044_v16, %v4060_v62 }
0x1fb2   :  { %v4056_v9 = vpop.xlane.xlu1 %4055 }
0x1fb3   :  { %v4067_v13 = vsub.f32 %v4063_v7, %v4065_v63  ;;  %v4062_v43 = vmul.f32 0.03125, %v4056_v9 }
0x1fb5   :  { %v4071_v0 = vadd.f32 1e-05, %v4067_v13  ;;  %v4066_v1 = vsub.f32 %v4062_v43, %v4064_v12 }
0x1fb7   :  { %6952 = vrsqrt.f32 %v4071_v0  ;;  %v4070_v22 = vadd.f32 1e-05, %v4066_v1 }
0x1fb9   :  { %6954 = vrsqrt.f32 %v4070_v22 }
0x1fc4   :  { %v6953_v23 = vpop.eup %6952 }
0x1fc5   :  { %v4075_v46 = vmul.f32 %v6953_v23, %v4069_v3 }
0x1fc6   :  { %v6955_v56 = vpop.eup %6954 }
0x1fc7   :  { %v4074_v25 = vmul.f32 %v6955_v56, %v4068_v24  ;;  %v4077_v21 = vmul.f32 %v7552_v34, %v4075_v46 }
0x1fc9   :  { %v4076_v45 = vmul.f32 %v7552_v34, %v4074_v25  ;;  %v7815_v27 = vadd.f32 %v7558_v42, %v4077_v21  ;;  %v7004_v34 = vld [vmem:[%s8087_s2] ss:$0 sm:$0xff] }
0x1fcb   :  { %v7812_v26 = vadd.f32 %v7558_v42, %v4076_v45  ;;  %v7006_v45 = vld [vmem:[%s8088_s3 + $0x8] sm:$0xff] }
0x1fcd   :  { %6726 = vmatprep.mubr.msk.f32.mxu0 %vm143_vm0, %v7812_v26 }
0x1fce   :  { %6727 = vmatmul.mubr.msk.f32.vlgmr.msra.gmra.mxu0 %vm143_vm0, %v7815_v27 }
0x1fcf   :  { %6731 = vmatprep.mubr.msk.f32.mxu0 %vm7076_vm1, %v7075_v6 }
0x208e   :  { %v6728_v28 = vpop.f32.mrf.mxu0 }
0x208f   :  { %v7826_v29 = vadd.f32 %v7004_v34, %v6728_v28 }
0x2090   :  { %v4152_v30 = vpop.f32.mrf.mxu0 }
0x2091   :  { %v7828_v31 = vadd.f32 %v7004_v34, %v4152_v30  ;;  %4239 = vrot.lane.b32.xlu0 %v7826_v29, %s7077_s19 }
0x2093   :  { %4162 = vrot.lane.b32.xlu1 %v7828_v31, %s7077_s19 }
0x2103   :  { %v4240_v42 = vpop.permute.xlu0 %4239 }
0x2104   :  { %6735 = vmatpush3.xpose.msk.msra.mxu1 %vm228_vm2, %v4240_v42 }
0x2105   :  { %v4163_v33 = vpop.permute.xlu1 %4162  ;;  %6744 = vmatprep.subr.mxu1 %v7075_v6 }
0x2106   :  { %6730 = vmatpush3.xpose.msk.msra.mxu0 %vm228_vm2, %v4163_v33 }
0x2107   :  { %6737 = vmatmul.mubr.msk.f32.vlgmr.msra.gmra.mxu1 %vm228_vm2, %v7826_v29  ;;  %6739 = vmatprep.subr.mxu0 %v7075_v6 }
0x2108   :  { %6746 = vmatprep.mubr.msk.f32.mxu1 %vm7076_vm1, %v7075_v6 }
0x2109   :  { %6732 = vmatmul.mubr.msk.f32.vlgmr.msra.gmra.mxu0 %vm228_vm2, %v7828_v31 }
0x210a   :  { %6741 = vmatprep.mubr.msk.f32.mxu0 %vm7076_vm1, %v7075_v6 }
0x21c7   :  { %v4311_v35 = vpop.f32.mrf.mxu1 }
0x21c8   :  { %v4318_v37 = vsel %vm228_vm2, %v4311_v35, -inf }
0x21c9   :  { %4319 = vmax.xlane.f32.xlu0 %v4318_v37  ;;  %v4234_v39 = vpop.f32.mrf.mxu0  ;;  %v6738_v41 = vpop.f32.mrf.mxu1 }
0x21ca   :  { %v4315_v44 = vsel %vm228_vm2, %v4234_v39, -inf }
0x21cb   :  { %4316 = vmax.xlane.f32.xlu1 %v4315_v44  ;;  %v6733_v40 = vpop.f32.mrf.mxu0 }
0x2252   :  { %v4320_v11 = vpop.xlane.xlu0 %4319 }
0x2253   :  { %v4322_v48 = vsub.f32 %v4311_v35, %v4320_v11 }
0x2254   :  { %v4317_v51 = vpop.xlane.xlu1 %4316 }
0x2255   :  { %v4325_v52 = vmul.f32 1.442695, %v4322_v48  ;;  %v4321_v8 = vsub.f32 %v4234_v39, %v4317_v51 }
0x2257   :  { %6956 = vpow2.f32 %v4325_v52  ;;  %v4323_v53 = vmul.f32 1.442695, %v4321_v8 }
0x2259   :  { %6958 = vpow2.f32 %v4323_v53 }
0x2264   :  { %v6957_v32 = vpop.eup %6956 }
0x2265   :  { %v4330_v38 = vsel %vm228_vm2, %v6957_v32, 0.0 }
0x2266   :  { %v6959_v58 = vpop.eup %6958  ;;  %4331 = vadd.xlane.f32.xlu0 %v4330_v38 }
0x2267   :  { %v4327_v60 = vsel %vm228_vm2, %v6959_v58, 0.0 }
0x2268   :  { %4328 = vadd.xlane.f32.xlu1 %v4327_v60 }
0x2279   :  { %4337 = vrot.lane.b32.xlu1 %v7828_v31, %s7078_s20 }
0x227c   :  { %4413 = vrot.lane.b32.xlu0 %v7826_v29, %s7078_s20 }
0x227d   :  { %4574 = vrot.lane.b32.xlu1 %v7828_v31, %s7080_s24 }
0x2280   :  { %4572 = vrot.lane.b32.xlu0 %v7828_v31, %s7079_s23 }
0x2281   :  { %4652 = vrot.lane.b32.xlu1 %v7826_v29, %s7080_s24 }
0x2285   :  { %4650 = vrot.lane.b32.xlu1 %v7826_v29, %s7079_s23  ;;  %s7088_s23 = smov [#allocation5]  }
0x2286   :  { %s6102_s24 = sshll.u32 %s7088_s23, 4  ;;  %s6103_s24 = int_to_ptr.vmem [resolvable:$true] %s6102_s24 }
0x2287   :  { %p7053_p6 = scmp.lt.s32.totalorder %s6103_s24, %s6103_s24 }
0x22ef   :  { %v4332_v61 = vpop.xlane.xlu0 %4331 }
0x22f0   :  { %6960 = vrcp.f32 %v4332_v61 }
0x22f1   :  { %v4329_v14 = vpop.xlane.xlu1 %4328 }
0x22f2   :  { %6962 = vrcp.f32 %v4329_v14  ;;  %v7007_v14 = vld [vmem:[%s8089_s4] ss:$0 sm:$0xff]  ;;  %s8108_s4 = smov 104  }
0x22f3   :  { %v4414_v36 = vpop.permute.xlu0 %4413 }
0x22f4   :  { %6745 = vmatpush3.msra.mxu1 %v4414_v36 }
0x22f5   :  { %v4338_v55 = vpop.permute.xlu1 %4337  ;;  %6754 = vmatprep.subr.mxu1 %v7075_v6 }
0x22f6   :  { %6740 = vmatpush3.msra.mxu0 %v4338_v55 }
0x22f7   :  { %6749 = vmatprep.subr.mxu0 %v7005_v57  ;;  %v4573_v17 = vpop.permute.xlu0 %4572 }
0x22f9   :  { %v4575_v50 = vpop.permute.xlu1 %4574 }
0x22fd   :  { %v6961_v54 = vpop.eup %6960  ;;  %v4653_v18 = vpop.permute.xlu1 %4652 }
0x22fe   :  { %v4336_v15 = vmul.f32 %v6961_v54, %v6957_v32 }
0x22ff   :  { %v6963_v59 = vpop.eup %6962 }
0x2300   :  { %6747 = vmatmul.mubr.msk.f32.vlgmr.msra.gmra.mxu1 %vm228_vm2, %v4336_v15  ;;  %v4335_v16 = vmul.f32 %v6963_v59, %v6959_v58 }
0x2301   :  { %6755 = vmatpush3.xpose.msk.msra.mxu1 %vm228_vm2, %v4575_v50  ;;  %6756 = vmatprep.mubr.msk.f32.mxu1 %vm7076_vm1, %v7075_v6  ;;  %v4651_v62 = vpop.permute.xlu1 %4650 }
0x2302   :  { %6742 = vmatmul.mubr.msk.f32.vlgmr.msra.gmra.mxu0 %vm228_vm2, %v4335_v16  ;;  %6764 = vmatprep.subr.mxu1 %v7075_v6 }
0x2303   :  { %6750 = vmatpush3.msra.mxu0 %v7005_v57 }
0x2304   :  { %6757 = vmatmul.mubr.msk.f32.vlgmr.msra.gmra.mxu1 %vm228_vm2, %v4573_v17  ;;  %6759 = vmatprep.subr.mxu0 %v7075_v6 }
0x2305   :  { %6766 = vmatprep.mubr.msk.f32.mxu1 %vm7076_vm1, %v7075_v6 }
0x23c0   :  { %v4485_v4 = vpop.f32.mrf.mxu1 }
0x23c2   :  { %v4409_v19 = vpop.f32.mrf.mxu0  ;;  %v6748_v10 = vpop.f32.mrf.mxu1 }
0x23c3   :  { %6751 = vmatprep.mubr.msk.f32.mxu0 %vm228_vm2, %v4409_v19 }
0x23c4   :  { %v6743_v5 = vpop.f32.mrf.mxu0  ;;  %6752 = vmatmul.mubr.msk.f32.vlgmr.msra.gmra.mxu0 %vm228_vm2, %v4485_v4  ;;  %v4646_v47 = vpop.f32.mrf.mxu1 }
0x23c5   :  { %6760 = vmatpush3.xpose.msk.msra.mxu0 %vm228_vm2, %v4653_v18  ;;  %v4728_v2 = vsel %vm228_vm2, %v4646_v47, -inf  ;;  %6761 = vmatprep.mubr.msk.f32.mxu0 %vm7076_vm1, %v7075_v6 }
0x23c6   :  { %4729 = vmax.xlane.f32.xlu0 %v4728_v2  ;;  %v6758_v20 = vpop.f32.mrf.mxu1  ;;  %6769 = vmatprep.subr.mxu0 %v7075_v6 }
0x23c7   :  { %v7008_v20 = vld [vmem:[%s8088_s3 + $0x10] sm:$0xff] }
0x23c8   :  { %6762 = vmatmul.mubr.msk.f32.vlgmr.msra.gmra.mxu0 %vm228_vm2, %v4651_v62 }
0x23c9   :  { %6771 = vmatprep.mubr.msk.f32.mxu0 %vm7076_vm1, %v7075_v6 }
0x244f   :  { %v4730_v49 = vpop.xlane.xlu0 %4729 }
0x2450   :  { %v4734_v63 = vsub.f32 %v4646_v47, %v4730_v49 }
0x2452   :  { %v4736_v7 = vmul.f32 1.442695, %v4734_v63 }
0x2454   :  { %6964 = vpow2.f32 %v4736_v7 }
0x2461   :  { %v6965_v9 = vpop.eup %6964 }
0x2462   :  { %v4740_v12 = vsel %vm228_vm2, %v6965_v9, 0.0 }
0x2463   :  { %4741 = vadd.xlane.f32.xlu0 %v4740_v12 }
0x2484   :  { %v7887_v13 = vpop.f32.mrf.mxu0 }
0x2485   :  { %v4571_v36 = vadd.f32 %v7007_v14, %v7887_v13 }
0x2486   :  { %v7889_v43 = vpop.f32.mrf.mxu0 }
0x2487   :  { %v4570_v57 = vadd.f32 %v7007_v14, %v7889_v43 }
0x2488   :  { %v4724_v0 = vpop.f32.mrf.mxu0 }
0x2489   :  { %v4731_v1 = vsel %vm228_vm2, %v4724_v0, -inf }
0x248a   :  { %4732 = vmax.xlane.f32.xlu1 %v4731_v1  ;;  %v6763_v22 = vpop.f32.mrf.mxu0 }
0x249b   :  { %4750 = vrot.lane.b32.xlu1 %v7828_v31, %s7081_s27 }
0x249f   :  { %4987 = vrot.lane.b32.xlu1 %v7828_v31, %s7083_s0 }
0x24a3   :  { %5065 = vrot.lane.b32.xlu1 %v7826_v29, %s7083_s0 }
0x24a7   :  { %5063 = vrot.lane.b32.xlu1 %v7826_v29, %s7082_s28 }
0x24ec   :  { %v4742_v3 = vpop.xlane.xlu0 %4741 }
0x24ed   :  { %6966 = vrcp.f32 %v4742_v3 }
0x24fa   :  { %v6967_v24 = vpop.eup %6966 }
0x24fb   :  { %v4748_v21 = vmul.f32 %v6967_v24, %v6965_v9 }
0x2513   :  { %v4733_v23 = vpop.xlane.xlu1 %4732 }
0x2514   :  { %v4735_v46 = vsub.f32 %v4724_v0, %v4733_v23 }
0x2516   :  { %v4738_v56 = vmul.f32 1.442695, %v4735_v46 }
0x2517   :  { %v4751_v25 = vpop.permute.xlu1 %4750 }
0x2518   :  { %6968 = vpow2.f32 %v4738_v56  ;;  %6765 = vmatpush3.msra.mxu1 %v4751_v25 }
0x2519   :  { %6767 = vmatmul.mubr.msk.f32.vlgmr.msra.gmra.mxu1 %vm228_vm2, %v4748_v21  ;;  %6774 = vmatprep.subr.mxu1 %v7006_v45 }
0x251a   :  { %6775 = vmatpush3.msra.mxu1 %v7006_v45 }
0x251b   :  { %6784 = vmatprep.subr.mxu1 %v7075_v6  ;;  %v4988_v37 = vpop.permute.xlu1 %4987 }
0x251f   :  { %v5066_v40 = vpop.permute.xlu1 %5065 }
0x2523   :  { %v5064_v51 = vpop.permute.xlu1 %5063 }
0x2525   :  { %v6969_v28 = vpop.eup %6968 }
0x2526   :  { %v4743_v34 = vsel %vm228_vm2, %v6969_v28, 0.0 }
0x2527   :  { %4744 = vadd.xlane.f32.xlu0 %v4743_v34 }
0x253d   :  { %4826 = vrot.lane.b32.xlu0 %v7826_v29, %s7081_s27 }
0x2541   :  { %4985 = vrot.lane.b32.xlu0 %v7828_v31, %s7082_s28 }
0x25b0   :  { %v4745_v30 = vpop.xlane.xlu0 %4744 }
0x25b1   :  { %6970 = vrcp.f32 %v4745_v30 }
0x25b4   :  { %v4827_v42 = vpop.permute.xlu0 %4826 }
0x25b5   :  { %6770 = vmatpush3.msra.mxu0 %v4827_v42 }
0x25b6   :  { %6779 = vmatprep.subr.mxu0 %v7075_v6 }
0x25b8   :  { %v4986_v39 = vpop.permute.xlu0 %4985 }
0x25be   :  { %v6971_v33 = vpop.eup %6970 }
0x25bf   :  { %v4749_v35 = vmul.f32 %v6971_v33, %v6969_v28 }
0x25c1   :  { %6772 = vmatmul.mubr.msk.f32.vlgmr.msra.gmra.mxu0 %vm228_vm2, %v4749_v35 }
0x25c2   :  { %6780 = vmatpush3.xpose.msk.msra.mxu0 %vm228_vm2, %v4988_v37  ;;  %6781 = vmatprep.mubr.msk.f32.mxu0 %vm7076_vm1, %v7075_v6 }
0x25c3   :  { %6789 = vmatprep.subr.mxu0 %v7075_v6 }
0x25c5   :  { %6782 = vmatmul.mubr.msk.f32.vlgmr.msra.gmra.mxu0 %vm228_vm2, %v4986_v39 }
0x25c6   :  { %6791 = vmatprep.mubr.msk.f32.mxu0 %vm7076_vm1, %v7075_v6 }
0x25d9   :  { %v4822_v41 = vpop.f32.mrf.mxu1 }
0x25da   :  { %6776 = vmatprep.mubr.msk.f32.mxu1 %vm228_vm2, %v4822_v41 }
0x25db   :  { %v6768_v44 = vpop.f32.mrf.mxu1 }
0x2681   :  { %v4898_v11 = vpop.f32.mrf.mxu0 }
0x2682   :  { %6777 = vmatmul.mubr.msk.f32.vlgmr.msra.gmra.mxu1 %vm228_vm2, %v4898_v11 }
0x2683   :  { %6785 = vmatpush3.xpose.msk.msra.mxu1 %vm228_vm2, %v5066_v40  ;;  %v6773_v48 = vpop.f32.mrf.mxu0  ;;  %6786 = vmatprep.mubr.msk.f32.mxu1 %vm7076_vm1, %v7075_v6 }
0x2684   :  { %6794 = vmatprep.subr.mxu1 %v7075_v6 }
0x2685   :  { %v5059_v52 = vpop.f32.mrf.mxu0 }
0x2686   :  { %6787 = vmatmul.mubr.msk.f32.vlgmr.msra.gmra.mxu1 %vm228_vm2, %v5064_v51  ;;  %v5141_v8 = vsel %vm228_vm2, %v5059_v52, -inf }
0x2687   :  { %5142 = vmax.xlane.f32.xlu0 %v5141_v8  ;;  %v6783_v53 = vpop.f32.mrf.mxu0  ;;  %6796 = vmatprep.mubr.msk.f32.mxu1 %vm7076_vm1, %v7075_v6 }
0x2688   :  { %v7009_v53 = vld [vmem:[%s8088_s3 + $0x18] sm:$0xff] }
0x2710   :  { %v5143_v32 = vpop.xlane.xlu0 %5142 }
0x2711   :  { %v5147_v38 = vsub.f32 %v5059_v52, %v5143_v32 }
0x2713   :  { %v5149_v58 = vmul.f32 1.442695, %v5147_v38 }
0x2715   :  { %6972 = vpow2.f32 %v5149_v58 }
0x2722   :  { %v6973_v60 = vpop.eup %6972 }
0x2723   :  { %v5153_v61 = vsel %vm228_vm2, %v6973_v60, 0.0 }
0x2724   :  { %5154 = vadd.xlane.f32.xlu0 %v5153_v61  ;;  %v7011_v61 = vld [vmem:[%s8090_s5 + $0x18] sm:$0xff] }
0x2742   :  { %v6778_v55 = vpop.f32.mrf.mxu1 }
0x2743   :  { %v7935_v54 = vadd.f32 %v6778_v55, %v4571_v36  ;;  %v7012_v55 = vld [vmem:[%s8090_s5 + $0x10] sm:$0xff] }
0x2744   :  { %v4974_v15 = vpop.f32.mrf.mxu1 }
0x2745   :  { %v7937_v59 = vadd.f32 %v4974_v15, %v4570_v57  ;;  %v7014_v57 = vld [vmem:[%s8090_s5] sm:$0xff] }
0x2746   :  { %v5137_v50 = vpop.f32.mrf.mxu1 }
0x2747   :  { %v5144_v16 = vsel %vm228_vm2, %v5137_v50, -inf }
0x2748   :  { %5145 = vmax.xlane.f32.xlu1 %v5144_v16  ;;  %v6788_v17 = vpop.f32.mrf.mxu1  ;;  %v7015_v16 = vld [vmem:[%s8092_s7 + $0x30] sm:$0xff] }
0x2749   :  { %v7016_v17 = vld [vmem:[%s8092_s7 + $0x28] sm:$0xff] }
0x2759   :  { %5163 = vrot.lane.b32.xlu1 %v7828_v31, %s7084_s18 }
0x275d   :  { %5400 = vrot.lane.b32.xlu1 %v7828_v31, %s7085_s25 }
0x2761   :  { %5478 = vrot.lane.b32.xlu1 %v7826_v29, %s7085_s25 }
0x2765   :  { %5476 = vrot.lane.b32.xlu1 %v7826_v29, %s8108_s4 }
0x27ad   :  { %v5155_v4 = vpop.xlane.xlu0 %5154 }
0x27ae   :  { %6974 = vrcp.f32 %v5155_v4  ;;  %v7017_v4 = vld [vmem:[%s8092_s7 + $0x20] sm:$0xff] }
0x27bb   :  { %v6975_v19 = vpop.eup %6974 }
0x27bc   :  { %v5161_v2 = vmul.f32 %v6975_v19, %v6973_v60  ;;  %v7019_v19 = vld [vmem:[%s8092_s7 + $0x10] sm:$0xff] }
0x27d1   :  { %v5146_v18 = vpop.xlane.xlu1 %5145 }
0x27d2   :  { %v5148_v10 = vsub.f32 %v5137_v50, %v5146_v18  ;;  %v7018_v18 = vld [vmem:[%s8092_s7 + $0x18] sm:$0xff] }
0x27d4   :  { %v5151_v5 = vmul.f32 1.442695, %v5148_v10  ;;  %v7020_v10 = vld [vmem:[%s8092_s7 + $0x8] sm:$0xff] }
0x27d5   :  { %v5164_v47 = vpop.permute.xlu1 %5163 }
0x27d6   :  { %6976 = vpow2.f32 %v5151_v5  ;;  %6790 = vmatpush3.msra.mxu0 %v5164_v47  ;;  %v7021_v5 = vld [vmem:[%s8092_s7] sm:$0xff] }
0x27d7   :  { %6792 = vmatmul.mubr.msk.f32.vlgmr.msra.gmra.mxu0 %vm228_vm2, %v5161_v2  ;;  %6799 = vmatprep.subr.mxu0 %v7008_v20 }
0x27d8   :  { %6800 = vmatpush3.msra.mxu0 %v7008_v20 }
0x27d9   :  { %6809 = vmatprep.subr.mxu0 %v7075_v6  ;;  %v5401_v13 = vpop.permute.xlu1 %5400 }
0x27dd   :  { %v5479_v22 = vpop.permute.xlu1 %5478 }
0x27e1   :  { %v5477_v24 = vpop.permute.xlu1 %5476 }
0x27e3   :  { %v6977_v62 = vpop.eup %6976 }
0x27e4   :  { %v5156_v49 = vsel %vm228_vm2, %v6977_v62, 0.0 }
0x27e5   :  { %5157 = vadd.xlane.f32.xlu0 %v5156_v49 }
0x27fb   :  { %5239 = vrot.lane.b32.xlu0 %v7826_v29, %s7084_s18 }
0x27ff   :  { %5398 = vrot.lane.b32.xlu0 %v7828_v31, %s8108_s4 }
0x286e   :  { %v5158_v63 = vpop.xlane.xlu0 %5157 }
0x286f   :  { %6978 = vrcp.f32 %v5158_v63 }
0x2872   :  { %v5240_v7 = vpop.permute.xlu0 %5239 }
0x2873   :  { %6795 = vmatpush3.msra.mxu1 %v5240_v7 }
0x2874   :  { %6804 = vmatprep.subr.mxu1 %v7075_v6 }
0x2876   :  { %v5399_v43 = vpop.permute.xlu0 %5398 }
0x287c   :  { %v6979_v9 = vpop.eup %6978 }
0x287d   :  { %v5162_v12 = vmul.f32 %v6979_v9, %v6977_v62 }
0x287f   :  { %6797 = vmatmul.mubr.msk.f32.vlgmr.msra.gmra.mxu1 %vm228_vm2, %v5162_v12 }
0x2880   :  { %6805 = vmatpush3.xpose.msk.msra.mxu1 %vm228_vm2, %v5401_v13  ;;  %6806 = vmatprep.mubr.msk.f32.mxu1 %vm7076_vm1, %v7075_v6 }
0x2881   :  { %6814 = vmatprep.subr.mxu1 %v7075_v6 }
0x2883   :  { %6807 = vmatmul.mubr.msk.f32.vlgmr.msra.gmra.mxu1 %vm228_vm2, %v5399_v43 }
0x2884   :  { %6816 = vmatprep.mubr.msk.f32.mxu1 %vm7076_vm1, %v7075_v6 }
0x2897   :  { %v5235_v0 = vpop.f32.mrf.mxu0 }
0x2898   :  { %6801 = vmatprep.mubr.msk.f32.mxu0 %vm228_vm2, %v5235_v0 }
0x2899   :  { %v6793_v1 = vpop.f32.mrf.mxu0 }
0x293f   :  { %v5311_v3 = vpop.f32.mrf.mxu1 }
0x2940   :  { %6802 = vmatmul.mubr.msk.f32.vlgmr.msra.gmra.mxu0 %vm228_vm2, %v5311_v3 }
0x2941   :  { %6810 = vmatpush3.xpose.msk.msra.mxu0 %vm228_vm2, %v5479_v22  ;;  %v6798_v23 = vpop.f32.mrf.mxu1  ;;  %6811 = vmatprep.mubr.msk.f32.mxu0 %vm7076_vm1, %v7075_v6 }
0x2942   :  { %6819 = vmatprep.subr.mxu0 %v7075_v6 }
0x2943   :  { %v5472_v46 = vpop.f32.mrf.mxu1 }
0x2944   :  { %6812 = vmatmul.mubr.msk.f32.vlgmr.msra.gmra.mxu0 %vm228_vm2, %v5477_v24  ;;  %v5554_v56 = vsel %vm228_vm2, %v5472_v46, -inf }
0x2945   :  { %5555 = vmax.xlane.f32.xlu0 %v5554_v56  ;;  %v6808_v25 = vpop.f32.mrf.mxu1  ;;  %6821 = vmatprep.mubr.msk.f32.mxu0 %vm7076_vm1, %v7075_v6 }
0x29ce   :  { %v5556_v21 = vpop.xlane.xlu0 %5555 }
0x29cf   :  { %v5560_v45 = vsub.f32 %v5472_v46, %v5556_v21 }
0x29d1   :  { %v5562_v28 = vmul.f32 1.442695, %v5560_v45 }
0x29d3   :  { %6980 = vpow2.f32 %v5562_v28 }
0x29e0   :  { %v6981_v34 = vpop.eup %6980 }
0x29e1   :  { %v5566_v30 = vsel %vm228_vm2, %v6981_v34, 0.0 }
0x29e2   :  { %5567 = vadd.xlane.f32.xlu0 %v5566_v30 }
0x2a00   :  { %v6803_v42 = vpop.f32.mrf.mxu0 }
0x2a01   :  { %v7979_v33 = vadd.f32 %v6803_v42, %v7935_v54 }
0x2a02   :  { %v5387_v35 = vpop.f32.mrf.mxu0 }
0x2a03   :  { %v7982_v37 = vadd.f32 %v5387_v35, %v7937_v59 }
0x2a04   :  { %v5550_v39 = vpop.f32.mrf.mxu0 }
0x2a05   :  { %v5557_v41 = vsel %vm228_vm2, %v5550_v39, -inf }
0x2a06   :  { %5558 = vmax.xlane.f32.xlu1 %v5557_v41  ;;  %v6813_v6 = vpop.f32.mrf.mxu0  ;;  %v7022_v41 = vld [vmem:[%s8094_s9] ss:$0 sm:$0xff] }
0x2a17   :  { %5576 = vrot.lane.b32.xlu1 %v7828_v31, %s8107_s30  ;;  %v7010_v31 = vld [vmem:[%s8092_s7 + $0x38] sm:$0xff] }
0x2a6b   :  { %v5568_v44 = vpop.xlane.xlu0 %5567 }
0x2a6c   :  { %6982 = vrcp.f32 %v5568_v44 }
0x2a79   :  { %v6983_v11 = vpop.eup %6982 }
0x2a7a   :  { %v5574_v8 = vmul.f32 %v6983_v11, %v6981_v34 }
0x2a8f   :  { %v5559_v40 = vpop.xlane.xlu1 %5558 }
0x2a90   :  { %v5561_v48 = vsub.f32 %v5550_v39, %v5559_v40  ;;  %v7023_v40 = vld [vmem:[%s8095_s10] ss:$0 sm:$0xff] }
0x2a92   :  { %v5564_v51 = vmul.f32 1.442695, %v5561_v48 }
0x2a93   :  { %v5577_v52 = vpop.permute.xlu1 %5576 }
0x2a94   :  { %6984 = vpow2.f32 %v5564_v51  ;;  %6815 = vmatpush3.msra.mxu1 %v5577_v52  ;;  %v7024_v52 = vld [vmem:[%s8091_s6] ss:$0 sm:$0xff] }
0x2a95   :  { %6817 = vmatmul.mubr.msk.f32.vlgmr.msra.gmra.mxu1 %vm228_vm2, %v5574_v8  ;;  %6824 = vmatprep.subr.mxu1 %v7009_v53 }
0x2a96   :  { %6825 = vmatpush3.msra.mxu1 %v7009_v53 }
0x2a97   :  { %6840 = vmatprep.subr.mxu1 %v7010_v31 }
0x2aa1   :  { %v6985_v32 = vpop.eup %6984 }
0x2aa2   :  { %v5569_v38 = vsel %vm228_vm2, %v6985_v32, 0.0 }
0x2aa3   :  { %5570 = vadd.xlane.f32.xlu0 %v5569_v38 }
0x2ab9   :  { %5652 = vrot.lane.b32.xlu0 %v7826_v29, %s8107_s30  ;;  %v7013_v29 = vld [vmem:[%s8090_s5 + $0x8] sm:$0xff] }
0x2b2c   :  { %v5571_v58 = vpop.xlane.xlu0 %5570 }
0x2b2d   :  { %6986 = vrcp.f32 %v5571_v58 }
0x2b30   :  { %v5653_v60 = vpop.permute.xlu0 %5652 }
0x2b31   :  { %6820 = vmatpush3.msra.mxu0 %v5653_v60  ;;  %v7025_v60 = vld [vmem:[%s8093_s8] ss:$0 sm:$0xff] }
0x2b32   :  { %6829 = vmatprep.subr.mxu0 %v7011_v61 }
0x2b3a   :  { %v6987_v14 = vpop.eup %6986 }
0x2b3b   :  { %v5575_v36 = vmul.f32 %v6987_v14, %v6985_v32 }
0x2b3d   :  { %6822 = vmatmul.mubr.msk.f32.vlgmr.msra.gmra.mxu0 %vm228_vm2, %v5575_v36 }
0x2b3e   :  { %6830 = vmatpush3.msra.mxu0 %v7011_v61 }
0x2b3f   :  { %6831 = vmatprep.subr.mxu0 %v7012_v55 }
0x2b40   :  { %6832 = vmatpush3.msra.mxu0 %v7012_v55 }
0x2b41   :  { %6833 = vmatprep.subr.mxu0 %v7013_v29 }
0x2b42   :  { %6834 = vmatpush3.msra.mxu0 %v7013_v29 }
0x2b43   :  { %6835 = vmatprep.subr.mxu0 %v7014_v57 }
0x2b44   :  { %6836 = vmatpush3.msra.mxu0 %v7014_v57 }
0x2b55   :  { %v5648_v54 = vpop.f32.mrf.mxu1 }
0x2b56   :  { %6826 = vmatprep.mubr.msk.f32.mxu1 %vm228_vm2, %v5648_v54 }
0x2b57   :  { %v6818_v15 = vpop.f32.mrf.mxu1 }
0x2bfd   :  { %v5724_v59 = vpop.f32.mrf.mxu0 }
0x2bfe   :  { %6827 = vmatmul.mubr.msk.f32.vlgmr.msra.gmra.mxu1 %vm228_vm2, %v5724_v59 }
0x2bff   :  { %v6823_v50 = vpop.f32.mrf.mxu0  ;;  %6841 = vmatpush3.msra.mxu1 %v7010_v31 }
0x2c00   :  { %6842 = vmatprep.subr.mxu1 %v7015_v16 }
0x2c01   :  { %6843 = vmatpush3.msra.mxu1 %v7015_v16 }
0x2c02   :  { %6844 = vmatprep.subr.mxu1 %v7016_v17 }
0x2c03   :  { %6845 = vmatpush3.msra.mxu1 %v7016_v17 }
0x2c04   :  { %6846 = vmatprep.subr.mxu1 %v7017_v4 }
0x2c05   :  { %6847 = vmatpush3.msra.mxu1 %v7017_v4 }
0x2c06   :  { %6848 = vmatprep.subr.mxu1 %v7018_v18 }
0x2c07   :  { %6849 = vmatpush3.msra.mxu1 %v7018_v18 }
0x2c08   :  { %6850 = vmatprep.subr.mxu1 %v7019_v19 }
0x2c09   :  { %6851 = vmatpush3.msra.mxu1 %v7019_v19 }
0x2c0a   :  { %6852 = vmatprep.subr.mxu1 %v7020_v10 }
0x2c0b   :  { %6853 = vmatpush3.msra.mxu1 %v7020_v10 }
0x2c0c   :  { %6854 = vmatprep.subr.mxu1 %v7021_v5 }
0x2c0d   :  { %6855 = vmatpush3.msra.mxu1 %v7021_v5 }
0x2cbe   :  { %v6828_v47 = vpop.f32.mrf.mxu1 }
0x2cbf   :  { %v5810_v2 = vadd.f32 %v6828_v47, %v7979_v33 }
0x2cc0   :  { %v5800_v20 = vpop.f32.mrf.mxu1 }
0x2cc1   :  { %v5812_v62 = vadd.f32 %v5810_v2, %v7815_v27  ;;  %v5809_v49 = vadd.f32 %v5800_v20, %v7982_v37 }
0x2cc3   :  { %v5811_v63 = vadd.f32 %v5809_v49, %v7812_v26  ;;  %v5816_v7 = vsel %vm143_vm0, %v5812_v62, 0.0  ;;  %v5820_v9 = vmul.f32 %v5812_v62, %v5812_v62 }
0x2cc4   :  { %5817 = vadd.xlane.f32.xlu0 %v5816_v7 }
0x2cc5   :  { %v5813_v12 = vsel %vm143_vm0, %v5811_v63, 0.0  ;;  %v5819_v13 = vmul.f32 %v5811_v63, %v5811_v63  ;;  %v5824_v43 = vsel %vm143_vm0, %v5820_v9, 0.0 }
0x2cc6   :  { %5814 = vadd.xlane.f32.xlu1 %v5813_v12 }
0x2cc7   :  { %v5821_v0 = vsel %vm143_vm0, %v5819_v13, 0.0 }
0x2cc8   :  { %5825 = vadd.xlane.f32.xlu0 %v5824_v43 }
0x2cca   :  { %5822 = vadd.xlane.f32.xlu1 %v5821_v0 }
0x2d4d   :  { %v5818_v1 = vpop.xlane.xlu0 %5817 }
0x2d4e   :  { %v5828_v27 = vmul.f32 0.03125, %v5818_v1 }
0x2d4f   :  { %v5815_v22 = vpop.xlane.xlu1 %5814 }
0x2d50   :  { %v5827_v3 = vmul.f32 0.03125, %v5815_v22  ;;  %v5832_v26 = vmul.f32 %v5828_v27, %v5828_v27  ;;  %v5836_v30 = vsub.f32 %v5812_v62, %v5828_v27  ;;  %v7026_v27 = vld [vmem:[%s8096_s11] ss:$0 sm:$0xff] }
0x2d51   :  { %v5826_v23 = vpop.xlane.xlu0 %5825 }
0x2d52   :  { %v5830_v24 = vmul.f32 0.03125, %v5826_v23  ;;  %v5831_v56 = vmul.f32 %v5827_v3, %v5827_v3  ;;  %v5835_v33 = vsub.f32 %v5811_v63, %v5827_v3  ;;  %v7027_v23 = vld [vmem:[%s8097_s12] ss:$0 sm:$0xff] }
0x2d53   :  { %v5823_v46 = vpop.xlane.xlu1 %5822 }
0x2d54   :  { %v5834_v25 = vsub.f32 %v5830_v24, %v5832_v26  ;;  %v5829_v21 = vmul.f32 0.03125, %v5823_v46 }
0x2d56   :  { %v5838_v45 = vadd.f32 1e-05, %v5834_v25  ;;  %v5833_v28 = vsub.f32 %v5829_v21, %v5831_v56 }
0x2d58   :  { %6988 = vrsqrt.f32 %v5838_v45  ;;  %v5837_v34 = vadd.f32 1e-05, %v5833_v28 }
0x2d5a   :  { %6990 = vrsqrt.f32 %v5837_v34 }
0x2d65   :  { %v6989_v42 = vpop.eup %6988 }
0x2d66   :  { %v5842_v35 = vmul.f32 %v6989_v42, %v5836_v30 }
0x2d67   :  { %v6991_v37 = vpop.eup %6990 }
0x2d68   :  { %v5841_v39 = vmul.f32 %v6991_v37, %v5835_v33  ;;  %v5844_v6 = vmul.f32 %v7022_v41, %v5842_v35 }
0x2d6a   :  { %v5843_v44 = vmul.f32 %v7022_v41, %v5841_v39  ;;  %v5846_v48 = vadd.f32 %v7023_v40, %v5844_v6 }
0x2d6c   :  { %v5845_v11 = vadd.f32 %v7023_v40, %v5843_v44 }
0x2d6e   :  { %6837 = vmatprep.mubr.msk.f32.mxu0 %vm143_vm0, %v5845_v11 }
0x2d6f   :  { %6838 = vmatmul.mubr.msk.f32.vlgmr.msra.gmra.mxu0 %vm143_vm0, %v5846_v48 }
0x2e2f   :  { %v6839_v51 = vpop.f32.mrf.mxu0 }
0x2e30   :  { %v5925_v8 = vadd.f32 %v7024_v52, %v6839_v51 }
0x2e31   :  { %v5919_v53 = vpop.f32.mrf.mxu0 }
0x2e32   :  { %v5920_v31 = vadd.f32 %v7024_v52, %v5919_v53  ;;  %v5929_v38 = vmax.f32 %v5925_v8, 0.0 }
0x2e34   :  { %v5928_v32 = vmax.f32 %v5920_v31, 0.0  ;;  %v6236_v31 = vld [vmem:[%s8098_s13] ss:$0 sm:$0xff]  ;;  %s7048_s13 = scalar_lea.vmem %s6103_s24, 256 }
0x2e35   :  { %p7049_p5 = scmp.ne.s32.totalorder %s6103_s24, %s7048_s13  ;;  %p7054_p7 = scmp.lt.s32.totalorder %s7048_s13, %s7048_s13 }
0x2e36   :  { %6856 = vmatprep.mubr.msk.f32.mxu1 %vm1995_vm3, %v5928_v32 }
0x2e37   :  { %6857 = vmatmul.mubr.msk.f32.vlgmr.msra.gmra.mxu1 %vm1995_vm3, %v5929_v38  ;;  %p7055_p8 = por %p7054_p7, %p7053_p6 }
0x2e39   :  { %p7056_p9 = pnand %p7055_p8, %p7049_p5 }
0x2ef7   :  { %v6858_v58 = vpop.f32.mrf.mxu1 }
0x2ef8   :  { %v6008_v61 = vadd.f32 %v7025_v60, %v6858_v58 }
0x2ef9   :  { %v6002_v14 = vpop.f32.mrf.mxu1 }
0x2efa   :  { %v6012_v36 = vadd.f32 %v6008_v61, %v5846_v48  ;;  %v6003_v55 = vadd.f32 %v7025_v60, %v6002_v14  ;;  %v6237_v60 = vld [vmem:[%s8099_s14] ss:$0 sm:$0xff] }
0x2efc   :  { %v6011_v29 = vadd.f32 %v6003_v55, %v5845_v11  ;;  %v6016_v57 = vsel %vm143_vm0, %v6012_v36, 0.0  ;;  %v6020_v54 = vmul.f32 %v6012_v36, %v6012_v36 }
0x2efd   :  { %6017 = vadd.xlane.f32.xlu0 %v6016_v57 }
0x2efe   :  { %v6013_v15 = vsel %vm143_vm0, %v6011_v29, 0.0  ;;  %v6019_v59 = vmul.f32 %v6011_v29, %v6011_v29  ;;  %v6024_v50 = vsel %vm143_vm0, %v6020_v54, 0.0 }
0x2eff   :  { %6014 = vadd.xlane.f32.xlu1 %v6013_v15 }
0x2f00   :  { %v6021_v16 = vsel %vm143_vm0, %v6019_v59, 0.0 }
0x2f01   :  { %6025 = vadd.xlane.f32.xlu0 %v6024_v50 }
0x2f03   :  { %6022 = vadd.xlane.f32.xlu1 %v6021_v16 }
0x2f86   :  { %v6018_v17 = vpop.xlane.xlu0 %6017 }
0x2f87   :  { %v6028_v4 = vmul.f32 0.03125, %v6018_v17 }
0x2f88   :  { %v6015_v18 = vpop.xlane.xlu1 %6014 }
0x2f89   :  { %v6027_v19 = vmul.f32 0.03125, %v6015_v18  ;;  %v6032_v5 = vmul.f32 %v6028_v4, %v6028_v4  ;;  %v6036_v12 = vsub.f32 %v6012_v36, %v6028_v4 }
0x2f8a   :  { %v6026_v10 = vpop.xlane.xlu0 %6025 }
0x2f8b   :  { %v6030_v47 = vmul.f32 0.03125, %v6026_v10  ;;  %v6031_v20 = vmul.f32 %v6027_v19, %v6027_v19  ;;  %v6035_v43 = vsub.f32 %v6011_v29, %v6027_v19 }
0x2f8c   :  { %v6023_v2 = vpop.xlane.xlu1 %6022 }
0x2f8d   :  { %v6034_v62 = vsub.f32 %v6030_v47, %v6032_v5  ;;  %v6029_v49 = vmul.f32 0.03125, %v6023_v2 }
0x2f8f   :  { %v6038_v63 = vadd.f32 1e-05, %v6034_v62  ;;  %v6033_v7 = vsub.f32 %v6029_v49, %v6031_v20 }
0x2f91   :  { %6992 = vrsqrt.f32 %v6038_v63  ;;  %v6037_v9 = vadd.f32 1e-05, %v6033_v7 }
0x2f93   :  { %6994 = vrsqrt.f32 %v6037_v9 }
0x2f9e   :  { %v6993_v13 = vpop.eup %6992 }
0x2f9f   :  { %v6042_v0 = vmul.f32 %v6993_v13, %v6036_v12 }
0x2fa0   :  { %v6995_v1 = vpop.eup %6994 }
0x2fa1   :  { %v6044_v22 = vmul.f32 %v7026_v27, %v6042_v0  ;;  %v6041_v3 = vmul.f32 %v6995_v1, %v6035_v43 }
0x2fa3   :  { %v6046_v26 = vadd.f32 %v7027_v23, %v6044_v22  ;;  %v6043_v24 = vmul.f32 %v7026_v27, %v6041_v3 }
0x2fa5   :  { %v6064_v46 = vsel %vm143_vm0, %v6046_v26, 0.0  ;;  %v6045_v56 = vadd.f32 %v7027_v23, %v6043_v24  ;;  %v6068_v25 = vmul.f32 %v6046_v26, %v6046_v26 }
0x2fa6   :  { %6065 = vadd.xlane.f32.xlu0 %v6064_v46 }
0x2fa7   :  { %v6061_v21 = vsel %vm143_vm0, %v6045_v56, 0.0  ;;  %v6067_v45 = vmul.f32 %v6045_v56, %v6045_v56  ;;  %v6072_v28 = vsel %vm143_vm0, %v6068_v25, 0.0 }
0x2fa8   :  { %6062 = vadd.xlane.f32.xlu1 %v6061_v21 }
0x2fa9   :  { %v6069_v34 = vsel %vm143_vm0, %v6067_v45, 0.0 }
0x2faa   :  { %6073 = vadd.xlane.f32.xlu0 %v6072_v28 }
0x2fac   :  { %6070 = vadd.xlane.f32.xlu1 %v6069_v34 }
0x302f   :  { %v6066_v30 = vpop.xlane.xlu0 %6065 }
0x3030   :  { %v6076_v42 = vmul.f32 0.03125, %v6066_v30 }
0x3031   :  { %v6063_v33 = vpop.xlane.xlu1 %6062 }
0x3032   :  { %v6075_v35 = vmul.f32 0.03125, %v6063_v33  ;;  %v6080_v39 = vmul.f32 %v6076_v42, %v6076_v42  ;;  %v6084_v8 = vsub.f32 %v6046_v26, %v6076_v42 }
0x3033   :  { %v6074_v37 = vpop.xlane.xlu0 %6073 }
0x3034   :  { %v6078_v41 = vmul.f32 0.03125, %v6074_v37  ;;  %v6079_v44 = vmul.f32 %v6075_v35, %v6075_v35  ;;  %v6083_v32 = vsub.f32 %v6045_v56, %v6075_v35 }
0x3035   :  { %v6071_v6 = vpop.xlane.xlu1 %6070 }
0x3036   :  { %v6082_v40 = vsub.f32 %v6078_v41, %v6080_v39  ;;  %v6077_v11 = vmul.f32 0.03125, %v6071_v6 }
0x3038   :  { %v6086_v48 = vadd.f32 1e-05, %v6082_v40  ;;  %v6081_v51 = vsub.f32 %v6077_v11, %v6079_v44 }
0x303a   :  { %6996 = vrsqrt.f32 %v6086_v48  ;;  %v6085_v52 = vadd.f32 1e-05, %v6081_v51 }
0x303c   :  { %6998 = vrsqrt.f32 %v6085_v52 }
0x3047   :  { %v6997_v53 = vpop.eup %6996 }
0x3048   :  { %v6090_v38 = vmul.f32 %v6997_v53, %v6084_v8 }
0x3049   :  { %v6999_v58 = vpop.eup %6998 }
0x304a   :  { %v6089_v61 = vmul.f32 %v6999_v58, %v6083_v32  ;;  %v6092_v14 = vmul.f32 %v6236_v31, %v6090_v38 }
0x304c   :  { %v6091_v36 = vmul.f32 %v6236_v31, %v6089_v61  ;;  %v6094_v55 = vadd.f32 %v6237_v60, %v6092_v14 }
0x304e   :  { %v6093_v29 = vadd.f32 %v6237_v60, %v6091_v36  ;;  %6096 = vst.msk [vmem:[#allocation5 + $0x8] sm:$0xff] %vm143_vm0, %v6094_v55 }
0x3050   :  { %6095 = vst.msk [vmem:[#allocation5] sm:$0xff] %vm143_vm0, %v6093_v29 }
0x3051   :  { %7059 = shalt.err (!%p7056_p9)
}
0x3052   :  { %s8109_s14 = smov 8   ;;  %s8110_s5 = smov 128  }
0x3053   :  { %6108 = dma.vmem_to_hbm [thread:$0]  %s6103_s24, 256, %s8100_s15, [#allocation4], %s8110_s5, %s8110_s5, %s8109_s14  }
0x3054   :  { %7070 = dma.done.wait [#allocation4], 256  }
0x3055   :  { %7071 = vsyncadd [#allocation4], 4294967040 }
0x3056   :  { %6112 = vsyncpa [#allocation3], 1 }
0x3057   :  { %6113 = vsyncpa [#allocation4], 1 }

</bundles_post_ra>
